<compile_context>
chip_gen: v7x
topology: tpu7x:2x2x1
jax: 0.10.0
libtpu: 0.0.40
codegen_flags: <defaults>
</compile_context>

<pallas_src>
import jax
import jax.numpy as jnp
from jax.experimental import pallas as pl
from jax.experimental.pallas import tpu as pltpu

_INV_SQRT2 = 0.7071067811865476

# MXU operand dtype; keep f32 until the bf16 tolerance is verified (see TODO above).
MXU_DTYPE = jnp.float32


def _gelu(v):
    # exact GELU (erf form), same as torch.nn.GELU() default
    return 0.5 * v * (1.0 + jax.lax.erf(v * _INV_SQRT2))


def doubledown_kernel(x_ref, p_ref, out_ref, pad_ref):
    """`bb` batch elements per grid step.

    x_ref   : (bb, H2, 2, W2, 2*Cin) -- one contiguous block; axis 2 = pooling row,
              the two horizontal taps of each 2x2 window are interleaved on the
              last axis.
    p_ref   : (R, Cmax) packed parameters: [w1 | w2 | w3 | w4 | b1 b2 b3 b4]
              (BN scale folded into weights, BN shift folded into biases).
    out_ref : (bb, H2*W2, Cout)
    pad_ref : (bb, H2+2, W2+2, Cmax) zero-halo scratch shared by all conv stages.
    """
    bb, H2, _, W2, two_cin = x_ref.shape
    Cin = two_cin // 2
    _, Hp, Wp, Cmax = pad_ref.shape
    Cout = out_ref.shape[-1]
    N = bb * H2 * W2

    # packed-parameter row offsets
    o1, o2, o3, o4 = 0, 9 * Cin, 18 * Cin, 27 * Cin
    ob = 27 * Cin + 9 * Cout

    # ---- zero only the 1-pixel halo (interior is always overwritten before each
    #      read; a zero halo == "SAME" zero padding for every conv stage).
    #      Re-done every step on purpose: a program_id()==0 guard is unsafe when
    #      the parallel batch axis is sharded across TensorCores (v7x megacore).
    pad_ref[:, 0:1, :, :] = jnp.zeros((bb, 1, Wp, Cmax), jnp.float32)
    pad_ref[:, Hp - 1:Hp, :, :] = jnp.zeros((bb, 1, Wp, Cmax), jnp.float32)
    pad_ref[:, :, 0:1, :] = jnp.zeros((bb, Hp, 1, Cmax), jnp.float32)
    pad_ref[:, :, Wp - 1:Wp, :] = jnp.zeros((bb, Hp, 1, Cmax), jnp.float32)

    def write_interior(v2d, c):
        pad_ref[:, 1:1 + H2, 1:1 + W2, :c] = v2d.reshape(bb, H2, W2, c)

    def conv3x3(cin, cout, w_off, b_off):
        bias = p_ref[b_off:b_off + 1, :cout]                  # (1, cout)
        if cin >= 32:
            # Production channel counts: 9 accumulated per-tap dots -> the
            # (N, 9*cin) im2col temp is never materialized (peak VMEM ~9x smaller).
            acc = jnp.zeros((N, cout), jnp.float32)
            t = 0
            for dy in range(3):
                for dx in range(3):
                    a = pad_ref[:, dy:dy + H2, dx:dx + W2, :cin].reshape(N, cin)
                    w = p_ref[w_off + t * cin:w_off + (t + 1) * cin, :cout]
                    acc = acc + jnp.dot(a.astype(MXU_DTYPE), w.astype(MXU_DTYPE),
                                        preferred_element_type=jnp.float32)
                    t += 1
        else:
            # Tiny channels: ONE MXU matmul (N, 9*cin) @ (9*cin, cout), f32 acc.
            patches = [pad_ref[:, dy:dy + H2, dx:dx + W2, :cin]
                       for dy in range(3) for dx in range(3)]
            a = jnp.concatenate(patches, axis=-1).reshape(N, 9 * cin)
            w = p_ref[w_off:w_off + 9 * cin, :cout]
            acc = jnp.dot(a.astype(MXU_DTYPE), w.astype(MXU_DTYPE),
                          preferred_element_type=jnp.float32)
        return acc + bias

    # ---- MaxPool2d(2): max over the two pooling rows, then over the two
    #      interleaved horizontal taps ----
    x0 = x_ref[:, :, 0:1, :, :]
    x1 = x_ref[:, :, 1:2, :, :]
    a = jnp.maximum(x0, x1).reshape(bb, H2, W2, 2 * Cin)
    pooled = jnp.maximum(a[..., :Cin], a[..., Cin:])          # (bb, H2, W2, Cin)
    pooled2 = pooled.reshape(N, Cin)

    # ---- ResBlock(in, in): conv-bn-gelu -> conv-bn -> (+residual) -> gelu ----
    pad_ref[:, 1:1 + H2, 1:1 + W2, :Cin] = pooled
    h = _gelu(conv3x3(Cin, Cin, o1, ob + 0))                  # (N, Cin)
    write_interior(h, Cin)
    h = _gelu(conv3x3(Cin, Cin, o2, ob + 1) + pooled2)

    # ---- DoubleConv(in, out): (conv-bn-gelu) x 2, mid_channels == out_channels ----
    write_interior(h, Cin)
    g = _gelu(conv3x3(Cin, Cout, o3, ob + 2))                 # (N, Cout)
    write_interior(g, Cout)
    g = _gelu(conv3x3(Cout, Cout, o4, ob + 3))

    out_ref[...] = g.reshape(bb, H2 * W2, Cout).astype(out_ref.dtype)


def _pick_bb(B, est_fn, max_bb=8, budget_bytes=40 * 2**20):
    """Largest divisor of B (<= max_bb) whose per-step VMEM estimate fits budget."""
    for cand in range(min(B, max_bb), 0, -1):
        if B % cand == 0 and est_fn(cand) <= budget_bytes:
            return cand
    return 1


def doubledown_forward(x_nchw, params):
    """x_nchw: (B, Cin, H, W) float32 -> (B, Cout, H//2, W//2) float32 (NCHW)."""
    B, Cin, H, W = x_nchw.shape
    assert H % 2 == 0 and W % 2 == 0, "DoubleDown requires even H and W"
    H2, W2 = H // 2, W // 2
    Cout = params["dc_w2"].shape[-1]
    Cmax = max(Cin, Cout)
    R = 27 * Cin + 9 * Cout + 4           # packed-parameter rows

    # NCHW -> NHWC (kernel-internal layout), then a FREE row-major view exposing
    # the 2x2 pooling structure; the whole per-step input is ONE contiguous DMA.
    # TODO(synk): keep the model NHWC end-to-end to drop this HBM round-trip.
    x_nhwc = jnp.transpose(x_nchw, (0, 2, 3, 1)).astype(jnp.float32)
    x_view = x_nhwc.reshape(B, H2, 2, W2, 2 * Cin)

    def fold(w, s):
        # Fold BN scale into the conv weights and flatten to an im2col matrix:
        # (3, 3, ci, co) * (1, co) -> (9*ci, co), (dy, dx, ci) row-major.
        ci, co = w.shape[2], w.shape[3]
        return (w * s.reshape(1, 1, 1, co)).reshape(9 * ci, co).astype(jnp.float32)

    w1 = fold(params["rb_w1"], params["rb_s1"])
    w2 = fold(params["rb_w2"], params["rb_s2"])
    w3 = fold(params["dc_w1"], params["dc_s1"])
    w4 = fold(params["dc_w2"], params["dc_s2"])

    # Pack all folded weights + folded-BN biases into ONE array -> one constant spec
    # (one single-fetch pipeline stream instead of 8 double-buffered ones).
    ob = 27 * Cin + 9 * Cout
    P = jnp.zeros((R, Cmax), jnp.float32)
    P = P.at[0:9 * Cin, :Cin].set(w1)
    P = P.at[9 * Cin:18 * Cin, :Cin].set(w2)
    P = P.at[18 * Cin:27 * Cin, :Cout].set(w3)
    P = P.at[27 * Cin:ob, :Cout].set(w4)
    P = P.at[ob + 0, :Cin].set(params["rb_b1"].reshape(Cin))
    P = P.at[ob + 1, :Cin].set(params["rb_b2"].reshape(Cin))
    P = P.at[ob + 2, :Cout].set(params["dc_b1"].reshape(Cout))
    P = P.at[ob + 3, :Cout].set(params["dc_b2"].reshape(Cout))

    def vmem_estimate(bb):
        in_blk = bb * H2 * 2 * W2 * 2 * Cin * 4
        out_blk = bb * H2 * W2 * Cout * 4
        pad = bb * (H2 + 2) * (W2 + 2) * Cmax * 4
        p_blk = R * Cmax * 4
        # largest live temp: full im2col only when the concat path runs (Cmax < 32)
        im2col = bb * H2 * W2 * (9 * Cmax if Cmax < 32 else Cmax) * 4
        return 2 * in_blk + 2 * out_blk + 2 * p_blk + pad + 2 * im2col

    bb = _pick_bb(B, vmem_estimate)
    # 48 MiB cap keeps headroom on v7x's 64 MiB VMEM; floor at 16 MiB.
    vmem_limit = int(min(max(4 * vmem_estimate(bb), 16 * 2**20), 48 * 2**20))

    out_flat = pl.pallas_call(
        doubledown_kernel,
        grid=(B // bb,),
        in_specs=[
            pl.BlockSpec((bb, H2, 2, W2, 2 * Cin), lambda i: (i, 0, 0, 0, 0)),
            pl.BlockSpec((R, Cmax), lambda i: (0, 0)),
        ],
        out_specs=pl.BlockSpec((bb, H2 * W2, Cout), lambda i: (i, 0, 0)),
        out_shape=jax.ShapeDtypeStruct((B, H2 * W2, Cout), jnp.float32),
        scratch_shapes=[pltpu.VMEM((bb, H2 + 2, W2 + 2, Cmax), jnp.float32)],
        compiler_params=pltpu.CompilerParams(
            dimension_semantics=("parallel",),
            vmem_limit_bytes=vmem_limit,
        ),
    )(x_view, P)

    out_nhwc = out_flat.reshape(B, H2, W2, Cout)
    # TODO(synk): fold this transpose into the next consumer (NHWC end-to-end).
    return jnp.transpose(out_nhwc, (0, 3, 1, 2))


doubledown_forward_jit = jax.jit(doubledown_forward)


def init_params(key, cin, cout):
    """Deterministic synthetic parameters (shapes follow the module __init__)."""
    ks = jax.random.split(key, 8)

    def conv_w(k, ci, co):
        return jax.random.normal(k, (3, 3, ci, co), jnp.float32) / jnp.sqrt(9.0 * ci)

    def folded_bn(k, c):
        kg, kb, km, kv = jax.random.split(k, 4)
        gamma = 1.0 + 0.1 * jax.random.normal(kg, (c,), jnp.float32)
        beta = 0.1 * jax.random.normal(kb, (c,), jnp.float32)
        mean = 0.1 * jax.random.normal(km, (c,), jnp.float32)
        var = jnp.abs(1.0 + 0.1 * jax.random.normal(kv, (c,), jnp.float32))
        s = gamma / jnp.sqrt(var + 1e-5)
        b = beta - mean * s
        return s.reshape(1, c), b.reshape(1, c)

    rb_s1, rb_b1 = folded_bn(ks[1], cin)
    rb_s2, rb_b2 = folded_bn(ks[3], cin)
    dc_s1, dc_b1 = folded_bn(ks[5], cout)
    dc_s2, dc_b2 = folded_bn(ks[7], cout)
    return {
        "rb_w1": conv_w(ks[0], cin, cin), "rb_s1": rb_s1, "rb_b1": rb_b1,
        "rb_w2": conv_w(ks[2], cin, cin), "rb_s2": rb_s2, "rb_b2": rb_b2,
        "dc_w1": conv_w(ks[4], cin, cout), "dc_s1": dc_s1, "dc_b1": dc_b1,
        "dc_w2": conv_w(ks[6], cout, cout), "dc_s2": dc_s2, "dc_b2": dc_b2,
    }


def ref_forward(x_nchw, params):
    """Pure-JAX reference (lax.conv, unfolded BN) for a correctness check."""
    def conv(h, w):
        return jax.lax.conv_general_dilated(
            h, w, window_strides=(1, 1), padding="SAME",
            dimension_numbers=("NHWC", "HWIO", "NHWC"))

    x = jnp.transpose(x_nchw, (0, 2, 3, 1)).astype(jnp.float32)
    B, H, W, C = x.shape
    p = x.reshape(B, H // 2, 2, W // 2, 2, C).max(axis=(2, 4))

    h = _gelu(conv(p, params["rb_w1"]) * params["rb_s1"] + params["rb_b1"])
    h = conv(h, params["rb_w2"]) * params["rb_s2"] + params["rb_b2"]
    h = _gelu(h + p)
    h = _gelu(conv(h, params["dc_w1"]) * params["dc_s1"] + params["dc_b1"])
    h = _gelu(conv(h, params["dc_w2"]) * params["dc_s2"] + params["dc_b2"])
    return jnp.transpose(h, (0, 3, 1, 2))


if __name__ == "__main__":
    key = jax.random.PRNGKey(0)
    kx, kp = jax.random.split(key)

    B, Cin, H, W = 2, 4, 16, 16
    Cout = 8
    x = jax.random.normal(kx, (B, Cin, H, W), jnp.float32)
    params = init_params(kp, Cin, Cout)

    out = jax.block_until_ready(doubledown_forward_jit(x, params))
    assert out.shape == (B, Cout, H // 2, W // 2), out.shape

    ref = ref_forward(x, params)
    max_err = float(jnp.max(jnp.abs(out - ref)))
    if not jnp.allclose(out, ref, atol=1e-3, rtol=1e-3):
        raise AssertionError(f"kernel/reference mismatch, max abs err = {max_err}")

    print("KERNEL_OK")
</pallas_src>

<mosaic_0001>
module attributes {stable_mosaic.version = 11 : i64} {
  func.func @doubledown_kernel(%arg0: i32, %arg1: memref<2x8x2x8x8xf32, #tpu.memory_space<vmem>>, %arg2: memref<184x8xf32, #tpu.memory_space<vmem>>, %arg3: memref<2x64x8xf32, #tpu.memory_space<vmem>>, %arg4: memref<2x10x10x8xf32, #tpu.memory_space<vmem>>) attributes {dimension_semantics = [#tpu.dimension_semantics<parallel>], iteration_bounds = array<i64: 1>, scalar_prefetch = 0 : i64, scratch_operands = 1 : i64, tpu.core_type = #tpu.core_type<tc>, window_params = [{transform_indices = @transform_0, window_bounds = array<i64: 2, 8, 2, 8, 8>}, {pipeline_mode = #tpu.pipeline_mode<synchronous>, transform_indices = @transform_1, window_bounds = array<i64: 184, 8>}, {transform_indices = @transform_2, window_bounds = array<i64: 2, 64, 8>}]} {
    %cst = arith.constant 0.000000e+00 : f32
    %0 = vector.broadcast %cst : f32 to vector<2x1x10x8xf32>
    %c0 = arith.constant 0 : index
    %c0_0 = arith.constant 0 : index
    %c0_1 = arith.constant 0 : index
    %c0_2 = arith.constant 0 : index
    %1 = vector.load %arg4[%c0, %c0_0, %c0_1, %c0_2] : memref<2x10x10x8xf32, #tpu.memory_space<vmem>>, vector<2x1x10x8xf32>
    tpu.vector_store %arg4[%c0, %c0_0, %c0_1, %c0_2], %0 {strides = array<i32>} : memref<2x10x10x8xf32, #tpu.memory_space<vmem>>, vector<2x1x10x8xf32>,
    %cst_3 = arith.constant 0.000000e+00 : f32
    %2 = vector.broadcast %cst_3 : f32 to vector<2x1x10x8xf32>
    %c0_4 = arith.constant 0 : index
    %c9 = arith.constant 9 : index
    %c0_5 = arith.constant 0 : index
    %c0_6 = arith.constant 0 : index
    %3 = vector.load %arg4[%c0_4, %c9, %c0_5, %c0_6] : memref<2x10x10x8xf32, #tpu.memory_space<vmem>>, vector<2x1x10x8xf32>
    tpu.vector_store %arg4[%c0_4, %c9, %c0_5, %c0_6], %2 {strides = array<i32>} : memref<2x10x10x8xf32, #tpu.memory_space<vmem>>, vector<2x1x10x8xf32>,
    %cst_7 = arith.constant 0.000000e+00 : f32
    %4 = vector.broadcast %cst_7 : f32 to vector<2x10x1x8xf32>
    %c0_8 = arith.constant 0 : index
    %c0_9 = arith.constant 0 : index
    %c0_10 = arith.constant 0 : index
    %c0_11 = arith.constant 0 : index
    %5 = vector.load %arg4[%c0_8, %c0_9, %c0_10, %c0_11] : memref<2x10x10x8xf32, #tpu.memory_space<vmem>>, vector<2x10x1x8xf32>
    tpu.vector_store %arg4[%c0_8, %c0_9, %c0_10, %c0_11], %4 {strides = array<i32>} : memref<2x10x10x8xf32, #tpu.memory_space<vmem>>, vector<2x10x1x8xf32>,
    %cst_12 = arith.constant 0.000000e+00 : f32
    %6 = vector.broadcast %cst_12 : f32 to vector<2x10x1x8xf32>
    %c0_13 = arith.constant 0 : index
    %c0_14 = arith.constant 0 : index
    %c9_15 = arith.constant 9 : index
    %c0_16 = arith.constant 0 : index
    %7 = vector.load %arg4[%c0_13, %c0_14, %c9_15, %c0_16] : memref<2x10x10x8xf32, #tpu.memory_space<vmem>>, vector<2x10x1x8xf32>
    tpu.vector_store %arg4[%c0_13, %c0_14, %c9_15, %c0_16], %6 {strides = array<i32>} : memref<2x10x10x8xf32, #tpu.memory_space<vmem>>, vector<2x10x1x8xf32>,
    %c0_17 = arith.constant 0 : index
    %c0_18 = arith.constant 0 : index
    %c0_19 = arith.constant 0 : index
    %c0_20 = arith.constant 0 : index
    %c0_21 = arith.constant 0 : index
    %8 = vector.load %arg1[%c0_17, %c0_18, %c0_19, %c0_20, %c0_21] : memref<2x8x2x8x8xf32, #tpu.memory_space<vmem>>, vector<2x8x1x8x8xf32>
    %c0_22 = arith.constant 0 : index
    %c0_23 = arith.constant 0 : index
    %c1 = arith.constant 1 : index
    %c0_24 = arith.constant 0 : index
    %c0_25 = arith.constant 0 : index
    %9 = vector.load %arg1[%c0_22, %c0_23, %c1, %c0_24, %c0_25] : memref<2x8x2x8x8xf32, #tpu.memory_space<vmem>>, vector<2x8x1x8x8xf32>
    %10 = arith.maximumf %8, %9 : vector<2x8x1x8x8xf32>
    %11 = vector.shape_cast %10 : vector<2x8x1x8x8xf32> to vector<2x8x8x8xf32>
    %12 = vector.extract_strided_slice %11 {offsets = [0, 0, 0, 0], sizes = [2, 8, 8, 4], strides = [1, 1, 1, 1]} : vector<2x8x8x8xf32> to vector<2x8x8x4xf32>
    %13 = vector.extract_strided_slice %11 {offsets = [0, 0, 0, 4], sizes = [2, 8, 8, 4], strides = [1, 1, 1, 1]} : vector<2x8x8x8xf32> to vector<2x8x8x4xf32>
    %14 = arith.maximumf %12, %13 : vector<2x8x8x4xf32>
    %15 = vector.shape_cast %14 : vector<2x8x8x4xf32> to vector<128x4xf32>
    %c0_26 = arith.constant 0 : index
    %c1_27 = arith.constant 1 : index
    %c1_28 = arith.constant 1 : index
    %c0_29 = arith.constant 0 : index
    %16 = vector.load %arg4[%c0_26, %c1_27, %c1_28, %c0_29] : memref<2x10x10x8xf32, #tpu.memory_space<vmem>>, vector<2x8x8x4xf32>
    tpu.vector_store %arg4[%c0_26, %c1_27, %c1_28, %c0_29], %14 {strides = array<i32>} : memref<2x10x10x8xf32, #tpu.memory_space<vmem>>, vector<2x8x8x4xf32>,
    %c180 = arith.constant 180 : index
    %c0_30 = arith.constant 0 : index
    %17 = vector.load %arg2[%c180, %c0_30] : memref<184x8xf32, #tpu.memory_space<vmem>>, vector<1x4xf32>
    %c0_31 = arith.constant 0 : index
    %c0_32 = arith.constant 0 : index
    %c0_33 = arith.constant 0 : index
    %c0_34 = arith.constant 0 : index
    %18 = vector.load %arg4[%c0_31, %c0_32, %c0_33, %c0_34] : memref<2x10x10x8xf32, #tpu.memory_space<vmem>>, vector<2x8x8x4xf32>
    %c0_35 = arith.constant 0 : index
    %c0_36 = arith.constant 0 : index
    %c1_37 = arith.constant 1 : index
    %c0_38 = arith.constant 0 : index
    %19 = vector.load %arg4[%c0_35, %c0_36, %c1_37, %c0_38] : memref<2x10x10x8xf32, #tpu.memory_space<vmem>>, vector<2x8x8x4xf32>
    %c0_39 = arith.constant 0 : index
    %c0_40 = arith.constant 0 : index
    %c2 = arith.constant 2 : index
    %c0_41 = arith.constant 0 : index
    %20 = vector.load %arg4[%c0_39, %c0_40, %c2, %c0_41] : memref<2x10x10x8xf32, #tpu.memory_space<vmem>>, vector<2x8x8x4xf32>
    %c0_42 = arith.constant 0 : index
    %c1_43 = arith.constant 1 : index
    %c0_44 = arith.constant 0 : index
    %c0_45 = arith.constant 0 : index
    %21 = vector.load %arg4[%c0_42, %c1_43, %c0_44, %c0_45] : memref<2x10x10x8xf32, #tpu.memory_space<vmem>>, vector<2x8x8x4xf32>
    %c0_46 = arith.constant 0 : index
    %c1_47 = arith.constant 1 : index
    %c1_48 = arith.constant 1 : index
    %c0_49 = arith.constant 0 : index
    %22 = vector.load %arg4[%c0_46, %c1_47, %c1_48, %c0_49] : memref<2x10x10x8xf32, #tpu.memory_space<vmem>>, vector<2x8x8x4xf32>
    %c0_50 = arith.constant 0 : index
    %c1_51 = arith.constant 1 : index
    %c2_52 = arith.constant 2 : index
    %c0_53 = arith.constant 0 : index
    %23 = vector.load %arg4[%c0_50, %c1_51, %c2_52, %c0_53] : memref<2x10x10x8xf32, #tpu.memory_space<vmem>>, vector<2x8x8x4xf32>
    %c0_54 = arith.constant 0 : index
    %c2_55 = arith.constant 2 : index
    %c0_56 = arith.constant 0 : index
    %c0_57 = arith.constant 0 : index
    %24 = vector.load %arg4[%c0_54, %c2_55, %c0_56, %c0_57] : memref<2x10x10x8xf32, #tpu.memory_space<vmem>>, vector<2x8x8x4xf32>
    %c0_58 = arith.constant 0 : index
    %c2_59 = arith.constant 2 : index
    %c1_60 = arith.constant 1 : index
    %c0_61 = arith.constant 0 : index
    %25 = vector.load %arg4[%c0_58, %c2_59, %c1_60, %c0_61] : memref<2x10x10x8xf32, #tpu.memory_space<vmem>>, vector<2x8x8x4xf32>
    %c0_62 = arith.constant 0 : index
    %c2_63 = arith.constant 2 : index
    %c2_64 = arith.constant 2 : index
    %c0_65 = arith.constant 0 : index
    %26 = vector.load %arg4[%c0_62, %c2_63, %c2_64, %c0_65] : memref<2x10x10x8xf32, #tpu.memory_space<vmem>>, vector<2x8x8x4xf32>
    %27 = tpu.concatenate %18, %19, %20, %21, %22, %23, %24, %25, %26 in 3 : vector<2x8x8x4xf32>, vector<2x8x8x4xf32>, vector<2x8x8x4xf32>, vector<2x8x8x4xf32>, vector<2x8x8x4xf32>, vector<2x8x8x4xf32>, vector<2x8x8x4xf32>, vector<2x8x8x4xf32>, vector<2x8x8x4xf32> -> vector<2x8x8x36xf32>
    %28 = vector.shape_cast %27 : vector<2x8x8x36xf32> to vector<128x36xf32>
    %c0_66 = arith.constant 0 : index
    %c0_67 = arith.constant 0 : index
    %29 = vector.load %arg2[%c0_66, %c0_67] : memref<184x8xf32, #tpu.memory_space<vmem>>, vector<36x4xf32>
    %cst_68 = arith.constant dense<0.000000e+00> : vector<128x4xf32>
    %30 = tpu.matmul %28, %29, %cst_68 {dimension_numbers = #tpu.dot_dimension_numbers<[1], [0], [0], [1], [0, 0, 1, 1], [], []>} : vector<128x36xf32>, vector<36x4xf32>, vector<128x4xf32> -> vector<128x4xf32>
    %31 = vector.broadcast %17 : vector<1x4xf32> to vector<128x4xf32>
    %32 = arith.addf %30, %31 : vector<128x4xf32>
    %cst_69 = arith.constant 5.000000e-01 : f32
    %33 = vector.broadcast %cst_69 : f32 to vector<128x4xf32>
    %34 = arith.mulf %33, %32 : vector<128x4xf32>
    %cst_70 = arith.constant 0.707106769 : f32
    %35 = vector.broadcast %cst_70 : f32 to vector<128x4xf32>
    %36 = arith.mulf %32, %35 : vector<128x4xf32>
    %37 = math.erf %36 : vector<128x4xf32>
    %cst_71 = arith.constant 1.000000e+00 : f32
    %38 = vector.broadcast %cst_71 : f32 to vector<128x4xf32>
    %39 = arith.addf %38, %37 : vector<128x4xf32>
    %40 = arith.mulf %34, %39 : vector<128x4xf32>
    %41 = vector.shape_cast %40 : vector<128x4xf32> to vector<2x8x8x4xf32>
    %c0_72 = arith.constant 0 : index
    %c1_73 = arith.constant 1 : index
    %c1_74 = arith.constant 1 : index
    %c0_75 = arith.constant 0 : index
    %42 = vector.load %arg4[%c0_72, %c1_73, %c1_74, %c0_75] : memref<2x10x10x8xf32, #tpu.memory_space<vmem>>, vector<2x8x8x4xf32>
    tpu.vector_store %arg4[%c0_72, %c1_73, %c1_74, %c0_75], %41 {strides = array<i32>} : memref<2x10x10x8xf32, #tpu.memory_space<vmem>>, vector<2x8x8x4xf32>,
    %c181 = arith.constant 181 : index
    %c0_76 = arith.constant 0 : index
    %43 = vector.load %arg2[%c181, %c0_76] : memref<184x8xf32, #tpu.memory_space<vmem>>, vector<1x4xf32>
    %c0_77 = arith.constant 0 : index
    %c0_78 = arith.constant 0 : index
    %c0_79 = arith.constant 0 : index
    %c0_80 = arith.constant 0 : index
    %44 = vector.load %arg4[%c0_77, %c0_78, %c0_79, %c0_80] : memref<2x10x10x8xf32, #tpu.memory_space<vmem>>, vector<2x8x8x4xf32>
    %c0_81 = arith.constant 0 : index
    %c0_82 = arith.constant 0 : index
    %c1_83 = arith.constant 1 : index
    %c0_84 = arith.constant 0 : index
    %45 = vector.load %arg4[%c0_81, %c0_82, %c1_83, %c0_84] : memref<2x10x10x8xf32, #tpu.memory_space<vmem>>, vector<2x8x8x4xf32>
    %c0_85 = arith.constant 0 : index
    %c0_86 = arith.constant 0 : index
    %c2_87 = arith.constant 2 : index
    %c0_88 = arith.constant 0 : index
    %46 = vector.load %arg4[%c0_85, %c0_86, %c2_87, %c0_88] : memref<2x10x10x8xf32, #tpu.memory_space<vmem>>, vector<2x8x8x4xf32>
    %c0_89 = arith.constant 0 : index
    %c1_90 = arith.constant 1 : index
    %c0_91 = arith.constant 0 : index
    %c0_92 = arith.constant 0 : index
    %47 = vector.load %arg4[%c0_89, %c1_90, %c0_91, %c0_92] : memref<2x10x10x8xf32, #tpu.memory_space<vmem>>, vector<2x8x8x4xf32>
    %c0_93 = arith.constant 0 : index
    %c1_94 = arith.constant 1 : index
    %c1_95 = arith.constant 1 : index
    %c0_96 = arith.constant 0 : index
    %48 = vector.load %arg4[%c0_93, %c1_94, %c1_95, %c0_96] : memref<2x10x10x8xf32, #tpu.memory_space<vmem>>, vector<2x8x8x4xf32>
    %c0_97 = arith.constant 0 : index
    %c1_98 = arith.constant 1 : index
    %c2_99 = arith.constant 2 : index
    %c0_100 = arith.constant 0 : index
    %49 = vector.load %arg4[%c0_97, %c1_98, %c2_99, %c0_100] : memref<2x10x10x8xf32, #tpu.memory_space<vmem>>, vector<2x8x8x4xf32>
    %c0_101 = arith.constant 0 : index
    %c2_102 = arith.constant 2 : index
    %c0_103 = arith.constant 0 : index
    %c0_104 = arith.constant 0 : index
    %50 = vector.load %arg4[%c0_101, %c2_102, %c0_103, %c0_104] : memref<2x10x10x8xf32, #tpu.memory_space<vmem>>, vector<2x8x8x4xf32>
    %c0_105 = arith.constant 0 : index
    %c2_106 = arith.constant 2 : index
    %c1_107 = arith.constant 1 : index
    %c0_108 = arith.constant 0 : index
    %51 = vector.load %arg4[%c0_105, %c2_106, %c1_107, %c0_108] : memref<2x10x10x8xf32, #tpu.memory_space<vmem>>, vector<2x8x8x4xf32>
    %c0_109 = arith.constant 0 : index
    %c2_110 = arith.constant 2 : index
    %c2_111 = arith.constant 2 : index
    %c0_112 = arith.constant 0 : index
    %52 = vector.load %arg4[%c0_109, %c2_110, %c2_111, %c0_112] : memref<2x10x10x8xf32, #tpu.memory_space<vmem>>, vector<2x8x8x4xf32>
    %53 = tpu.concatenate %44, %45, %46, %47, %48, %49, %50, %51, %52 in 3 : vector<2x8x8x4xf32>, vector<2x8x8x4xf32>, vector<2x8x8x4xf32>, vector<2x8x8x4xf32>, vector<2x8x8x4xf32>, vector<2x8x8x4xf32>, vector<2x8x8x4xf32>, vector<2x8x8x4xf32>, vector<2x8x8x4xf32> -> vector<2x8x8x36xf32>
    %54 = vector.shape_cast %53 : vector<2x8x8x36xf32> to vector<128x36xf32>
    %c36 = arith.constant 36 : index
    %c0_113 = arith.constant 0 : index
    %55 = vector.load %arg2[%c36, %c0_113] : memref<184x8xf32, #tpu.memory_space<vmem>>, vector<36x4xf32>
    %cst_114 = arith.constant dense<0.000000e+00> : vector<128x4xf32>
    %56 = tpu.matmul %54, %55, %cst_114 {dimension_numbers = #tpu.dot_dimension_numbers<[1], [0], [0], [1], [0, 0, 1, 1], [], []>} : vector<128x36xf32>, vector<36x4xf32>, vector<128x4xf32> -> vector<128x4xf32>
    %57 = vector.broadcast %43 : vector<1x4xf32> to vector<128x4xf32>
    %58 = arith.addf %56, %57 : vector<128x4xf32>
    %59 = arith.addf %58, %15 : vector<128x4xf32>
    %cst_115 = arith.constant 5.000000e-01 : f32
    %60 = vector.broadcast %cst_115 : f32 to vector<128x4xf32>
    %61 = arith.mulf %60, %59 : vector<128x4xf32>
    %cst_116 = arith.constant 0.707106769 : f32
    %62 = vector.broadcast %cst_116 : f32 to vector<128x4xf32>
    %63 = arith.mulf %59, %62 : vector<128x4xf32>
    %64 = math.erf %63 : vector<128x4xf32>
    %cst_117 = arith.constant 1.000000e+00 : f32
    %65 = vector.broadcast %cst_117 : f32 to vector<128x4xf32>
    %66 = arith.addf %65, %64 : vector<128x4xf32>
    %67 = arith.mulf %61, %66 : vector<128x4xf32>
    %68 = vector.shape_cast %67 : vector<128x4xf32> to vector<2x8x8x4xf32>
    %c0_118 = arith.constant 0 : index
    %c1_119 = arith.constant 1 : index
    %c1_120 = arith.constant 1 : index
    %c0_121 = arith.constant 0 : index
    %69 = vector.load %arg4[%c0_118, %c1_119, %c1_120, %c0_121] : memref<2x10x10x8xf32, #tpu.memory_space<vmem>>, vector<2x8x8x4xf32>
    tpu.vector_store %arg4[%c0_118, %c1_119, %c1_120, %c0_121], %68 {strides = array<i32>} : memref<2x10x10x8xf32, #tpu.memory_space<vmem>>, vector<2x8x8x4xf32>,
    %c182 = arith.constant 182 : index
    %c0_122 = arith.constant 0 : index
    %70 = vector.load %arg2[%c182, %c0_122] : memref<184x8xf32, #tpu.memory_space<vmem>>, vector<1x8xf32>
    %c0_123 = arith.constant 0 : index
    %c0_124 = arith.constant 0 : index
    %c0_125 = arith.constant 0 : index
    %c0_126 = arith.constant 0 : index
    %71 = vector.load %arg4[%c0_123, %c0_124, %c0_125, %c0_126] : memref<2x10x10x8xf32, #tpu.memory_space<vmem>>, vector<2x8x8x4xf32>
    %c0_127 = arith.constant 0 : index
    %c0_128 = arith.constant 0 : index
    %c1_129 = arith.constant 1 : index
    %c0_130 = arith.constant 0 : index
    %72 = vector.load %arg4[%c0_127, %c0_128, %c1_129, %c0_130] : memref<2x10x10x8xf32, #tpu.memory_space<vmem>>, vector<2x8x8x4xf32>
    %c0_131 = arith.constant 0 : index
    %c0_132 = arith.constant 0 : index
    %c2_133 = arith.constant 2 : index
    %c0_134 = arith.constant 0 : index
    %73 = vector.load %arg4[%c0_131, %c0_132, %c2_133, %c0_134] : memref<2x10x10x8xf32, #tpu.memory_space<vmem>>, vector<2x8x8x4xf32>
    %c0_135 = arith.constant 0 : index
    %c1_136 = arith.constant 1 : index
    %c0_137 = arith.constant 0 : index
    %c0_138 = arith.constant 0 : index
    %74 = vector.load %arg4[%c0_135, %c1_136, %c0_137, %c0_138] : memref<2x10x10x8xf32, #tpu.memory_space<vmem>>, vector<2x8x8x4xf32>
    %c0_139 = arith.constant 0 : index
    %c1_140 = arith.constant 1 : index
    %c1_141 = arith.constant 1 : index
    %c0_142 = arith.constant 0 : index
    %75 = vector.load %arg4[%c0_139, %c1_140, %c1_141, %c0_142] : memref<2x10x10x8xf32, #tpu.memory_space<vmem>>, vector<2x8x8x4xf32>
    %c0_143 = arith.constant 0 : index
    %c1_144 = arith.constant 1 : index
    %c2_145 = arith.constant 2 : index
    %c0_146 = arith.constant 0 : index
    %76 = vector.load %arg4[%c0_143, %c1_144, %c2_145, %c0_146] : memref<2x10x10x8xf32, #tpu.memory_space<vmem>>, vector<2x8x8x4xf32>
    %c0_147 = arith.constant 0 : index
    %c2_148 = arith.constant 2 : index
    %c0_149 = arith.constant 0 : index
    %c0_150 = arith.constant 0 : index
    %77 = vector.load %arg4[%c0_147, %c2_148, %c0_149, %c0_150] : memref<2x10x10x8xf32, #tpu.memory_space<vmem>>, vector<2x8x8x4xf32>
    %c0_151 = arith.constant 0 : index
    %c2_152 = arith.constant 2 : index
    %c1_153 = arith.constant 1 : index
    %c0_154 = arith.constant 0 : index
    %78 = vector.load %arg4[%c0_151, %c2_152, %c1_153, %c0_154] : memref<2x10x10x8xf32, #tpu.memory_space<vmem>>, vector<2x8x8x4xf32>
    %c0_155 = arith.constant 0 : index
    %c2_156 = arith.constant 2 : index
    %c2_157 = arith.constant 2 : index
    %c0_158 = arith.constant 0 : index
    %79 = vector.load %arg4[%c0_155, %c2_156, %c2_157, %c0_158] : memref<2x10x10x8xf32, #tpu.memory_space<vmem>>, vector<2x8x8x4xf32>
    %80 = tpu.concatenate %71, %72, %73, %74, %75, %76, %77, %78, %79 in 3 : vector<2x8x8x4xf32>, vector<2x8x8x4xf32>, vector<2x8x8x4xf32>, vector<2x8x8x4xf32>, vector<2x8x8x4xf32>, vector<2x8x8x4xf32>, vector<2x8x8x4xf32>, vector<2x8x8x4xf32>, vector<2x8x8x4xf32> -> vector<2x8x8x36xf32>
    %81 = vector.shape_cast %80 : vector<2x8x8x36xf32> to vector<128x36xf32>
    %c72 = arith.constant 72 : index
    %c0_159 = arith.constant 0 : index
    %82 = vector.load %arg2[%c72, %c0_159] : memref<184x8xf32, #tpu.memory_space<vmem>>, vector<36x8xf32>
    %cst_160 = arith.constant dense<0.000000e+00> : vector<128x8xf32>
    %83 = tpu.matmul %81, %82, %cst_160 {dimension_numbers = #tpu.dot_dimension_numbers<[1], [0], [0], [1], [0, 0, 1, 1], [], []>} : vector<128x36xf32>, vector<36x8xf32>, vector<128x8xf32> -> vector<128x8xf32>
    %84 = vector.broadcast %70 : vector<1x8xf32> to vector<128x8xf32>
    %85 = arith.addf %83, %84 : vector<128x8xf32>
    %cst_161 = arith.constant 5.000000e-01 : f32
    %86 = vector.broadcast %cst_161 : f32 to vector<128x8xf32>
    %87 = arith.mulf %86, %85 : vector<128x8xf32>
    %cst_162 = arith.constant 0.707106769 : f32
    %88 = vector.broadcast %cst_162 : f32 to vector<128x8xf32>
    %89 = arith.mulf %85, %88 : vector<128x8xf32>
    %90 = math.erf %89 : vector<128x8xf32>
    %cst_163 = arith.constant 1.000000e+00 : f32
    %91 = vector.broadcast %cst_163 : f32 to vector<128x8xf32>
    %92 = arith.addf %91, %90 : vector<128x8xf32>
    %93 = arith.mulf %87, %92 : vector<128x8xf32>
    %94 = vector.shape_cast %93 : vector<128x8xf32> to vector<2x8x8x8xf32>
    %c0_164 = arith.constant 0 : index
    %c1_165 = arith.constant 1 : index
    %c1_166 = arith.constant 1 : index
    %c0_167 = arith.constant 0 : index
    %95 = vector.load %arg4[%c0_164, %c1_165, %c1_166, %c0_167] : memref<2x10x10x8xf32, #tpu.memory_space<vmem>>, vector<2x8x8x8xf32>
    tpu.vector_store %arg4[%c0_164, %c1_165, %c1_166, %c0_167], %94 {strides = array<i32>} : memref<2x10x10x8xf32, #tpu.memory_space<vmem>>, vector<2x8x8x8xf32>,
    %c183 = arith.constant 183 : index
    %c0_168 = arith.constant 0 : index
    %96 = vector.load %arg2[%c183, %c0_168] : memref<184x8xf32, #tpu.memory_space<vmem>>, vector<1x8xf32>
    %c0_169 = arith.constant 0 : index
    %c0_170 = arith.constant 0 : index
    %c0_171 = arith.constant 0 : index
    %c0_172 = arith.constant 0 : index
    %97 = vector.load %arg4[%c0_169, %c0_170, %c0_171, %c0_172] : memref<2x10x10x8xf32, #tpu.memory_space<vmem>>, vector<2x8x8x8xf32>
    %c0_173 = arith.constant 0 : index
    %c0_174 = arith.constant 0 : index
    %c1_175 = arith.constant 1 : index
    %c0_176 = arith.constant 0 : index
    %98 = vector.load %arg4[%c0_173, %c0_174, %c1_175, %c0_176] : memref<2x10x10x8xf32, #tpu.memory_space<vmem>>, vector<2x8x8x8xf32>
    %c0_177 = arith.constant 0 : index
    %c0_178 = arith.constant 0 : index
    %c2_179 = arith.constant 2 : index
    %c0_180 = arith.constant 0 : index
    %99 = vector.load %arg4[%c0_177, %c0_178, %c2_179, %c0_180] : memref<2x10x10x8xf32, #tpu.memory_space<vmem>>, vector<2x8x8x8xf32>
    %c0_181 = arith.constant 0 : index
    %c1_182 = arith.constant 1 : index
    %c0_183 = arith.constant 0 : index
    %c0_184 = arith.constant 0 : index
    %100 = vector.load %arg4[%c0_181, %c1_182, %c0_183, %c0_184] : memref<2x10x10x8xf32, #tpu.memory_space<vmem>>, vector<2x8x8x8xf32>
    %c0_185 = arith.constant 0 : index
    %c1_186 = arith.constant 1 : index
    %c1_187 = arith.constant 1 : index
    %c0_188 = arith.constant 0 : index
    %101 = vector.load %arg4[%c0_185, %c1_186, %c1_187, %c0_188] : memref<2x10x10x8xf32, #tpu.memory_space<vmem>>, vector<2x8x8x8xf32>
    %c0_189 = arith.constant 0 : index
    %c1_190 = arith.constant 1 : index
    %c2_191 = arith.constant 2 : index
    %c0_192 = arith.constant 0 : index
    %102 = vector.load %arg4[%c0_189, %c1_190, %c2_191, %c0_192] : memref<2x10x10x8xf32, #tpu.memory_space<vmem>>, vector<2x8x8x8xf32>
    %c0_193 = arith.constant 0 : index
    %c2_194 = arith.constant 2 : index
    %c0_195 = arith.constant 0 : index
    %c0_196 = arith.constant 0 : index
    %103 = vector.load %arg4[%c0_193, %c2_194, %c0_195, %c0_196] : memref<2x10x10x8xf32, #tpu.memory_space<vmem>>, vector<2x8x8x8xf32>
    %c0_197 = arith.constant 0 : index
    %c2_198 = arith.constant 2 : index
    %c1_199 = arith.constant 1 : index
    %c0_200 = arith.constant 0 : index
    %104 = vector.load %arg4[%c0_197, %c2_198, %c1_199, %c0_200] : memref<2x10x10x8xf32, #tpu.memory_space<vmem>>, vector<2x8x8x8xf32>
    %c0_201 = arith.constant 0 : index
    %c2_202 = arith.constant 2 : index
    %c2_203 = arith.constant 2 : index
    %c0_204 = arith.constant 0 : index
    %105 = vector.load %arg4[%c0_201, %c2_202, %c2_203, %c0_204] : memref<2x10x10x8xf32, #tpu.memory_space<vmem>>, vector<2x8x8x8xf32>
    %106 = tpu.concatenate %97, %98, %99, %100, %101, %102, %103, %104, %105 in 3 : vector<2x8x8x8xf32>, vector<2x8x8x8xf32>, vector<2x8x8x8xf32>, vector<2x8x8x8xf32>, vector<2x8x8x8xf32>, vector<2x8x8x8xf32>, vector<2x8x8x8xf32>, vector<2x8x8x8xf32>, vector<2x8x8x8xf32> -> vector<2x8x8x72xf32>
    %107 = vector.shape_cast %106 : vector<2x8x8x72xf32> to vector<128x72xf32>
    %c108 = arith.constant 108 : index
    %c0_205 = arith.constant 0 : index
    %108 = vector.load %arg2[%c108, %c0_205] : memref<184x8xf32, #tpu.memory_space<vmem>>, vector<72x8xf32>
    %cst_206 = arith.constant dense<0.000000e+00> : vector<128x8xf32>
    %109 = tpu.matmul %107, %108, %cst_206 {dimension_numbers = #tpu.dot_dimension_numbers<[1], [0], [0], [1], [0, 0, 1, 1], [], []>} : vector<128x72xf32>, vector<72x8xf32>, vector<128x8xf32> -> vector<128x8xf32>
    %110 = vector.broadcast %96 : vector<1x8xf32> to vector<128x8xf32>
    %111 = arith.addf %109, %110 : vector<128x8xf32>
    %cst_207 = arith.constant 5.000000e-01 : f32
    %112 = vector.broadcast %cst_207 : f32 to vector<128x8xf32>
    %113 = arith.mulf %112, %111 : vector<128x8xf32>
    %cst_208 = arith.constant 0.707106769 : f32
    %114 = vector.broadcast %cst_208 : f32 to vector<128x8xf32>
    %115 = arith.mulf %111, %114 : vector<128x8xf32>
    %116 = math.erf %115 : vector<128x8xf32>
    %cst_209 = arith.constant 1.000000e+00 : f32
    %117 = vector.broadcast %cst_209 : f32 to vector<128x8xf32>
    %118 = arith.addf %117, %116 : vector<128x8xf32>
    %119 = arith.mulf %113, %118 : vector<128x8xf32>
    %120 = vector.shape_cast %119 : vector<128x8xf32> to vector<2x64x8xf32>
    %c0_210 = arith.constant 0 : index
    %c0_211 = arith.constant 0 : index
    %c0_212 = arith.constant 0 : index
    %121 = vector.load %arg3[%c0_210, %c0_211, %c0_212] : memref<2x64x8xf32, #tpu.memory_space<vmem>>, vector<2x64x8xf32>
    tpu.vector_store %arg3[%c0_210, %c0_211, %c0_212], %120 {strides = array<i32>} : memref<2x64x8xf32, #tpu.memory_space<vmem>>, vector<2x64x8xf32>,
    return
  }
  func.func @transform_0(%arg0: i32) -> (i32, i32, i32, i32, i32) {
    %c0_i32 = arith.constant 0 : i32
    %c0_i32_0 = arith.constant 0 : i32
    %c0_i32_1 = arith.constant 0 : i32
    %c0_i32_2 = arith.constant 0 : i32
    %c0_i32_3 = arith.constant 0 : i32
    return %arg0, %c0_i32, %c0_i32_0, %c0_i32_1, %c0_i32_2 : i32, i32, i32, i32, i32
  }
  func.func @transform_1(%arg0: i32) -> (i32, i32) {
    %c0_i32 = arith.constant 0 : i32
    %c0_i32_0 = arith.constant 0 : i32
    %c0_i32_1 = arith.constant 0 : i32
    return %c0_i32, %c0_i32_0 : i32, i32
  }
  func.func @transform_2(%arg0: i32) -> (i32, i32, i32) {
    %c0_i32 = arith.constant 0 : i32
    %c0_i32_0 = arith.constant 0 : i32
    %c0_i32_1 = arith.constant 0 : i32
    return %arg0, %c0_i32, %c0_i32_0 : i32, i32, i32
  }
}

</mosaic_0001>

<bundles_post_ra>
// kernel: doubledown_forward.1
= control target key start
LH: loop header
LB: loop body
LE: loop exit
PB: predicated region body
PF: predicated region fallthrough
CT: control target
= control target key end

     0   :  { %vm11_vm0 = vcmask 64512   ;;  %vm13_vm1 = vcmask 58368   ;;  %v5091_v3 = vmov 0.0   ;;  %vm22_vm2 = vcmask 57344   ;;  %s5092_s25 = smov 124   ;;  %s5093_s19 = smov 4   ;;  %s7461_s0 = inlined_call_operand.vmem [shape: f32[2,8,2,8,8], index: 0, kind: input, shape index: {}]   ;;  %s7462_s1 = inlined_call_operand.vmem [shape: f32[184,8], index: 1, kind: input, shape index: {}]   ;;  %s7463_s2 = inlined_call_operand.vmem [shape: f32[2,64,8], index: 2, kind: output, shape index: {}]  }
   0x1   :  { %v63_v0 = vld [vmem:[%s7461_s0] sm:$0xff]  ;;  %v4589_v1 = vld [vmem:[%s7461_s0 + $0x8] sm:$0xff]  ;;  %v64_v2 = vld [vmem:[%s7461_s0 + $0x10] sm:$0xff]  ;;  %12 = vst.msk [vmem:[#allocation2] sm:$0xff] %vm11_vm0, %v5091_v3  ;;  %vm193_vm3 = vcmask 31744   ;;  %s5096_s20 = smov 16  }
   0x2   :  { %14 = vst.msk [vmem:[#allocation2 + $0x8] sm:$0x3] %vm13_vm1, %v5091_v3  ;;  %16 = vst.msk [vmem:[#allocation2 + $0xa8] sm:$0x3] %vm13_vm1, %v5091_v3  ;;  %v5133_v4 = vmax.f32 %v63_v0, %v4589_v1  ;;  %v4590_v5 = vld [vmem:[%s7461_s0 + $0x18] sm:$0xff]  ;;  %v65_v6 = vld [vmem:[%s7461_s0 + $0x20] sm:$0xff] }
   0x3   :  { %15 = vst.msk [vmem:[#allocation2 + $0xa0] sm:$0xff] %vm11_vm0, %v5091_v3  ;;  %18 = vst.msk [vmem:[#allocation2 + $0x90] sm:$0xff] %vm11_vm0, %v5091_v3  ;;  %v4591_v7 = vld [vmem:[%s7461_s0 + $0x28] sm:$0xff]  ;;  %v66_v9 = vld [vmem:[%s7461_s0 + $0x30] sm:$0xff]  ;;  %v5194_v11 = vmax.f32 %v64_v2, %v4590_v5  ;;  %s5097_s21 = smov 20   ;;  %s5098_s27 = smov 24  }
   0x4   :  { %19 = vst.msk [vmem:[#allocation2 + $0x98] sm:$0x3] %vm13_vm1, %v5091_v3  ;;  %21 = vst.msk [vmem:[#allocation2 + $0x138] sm:$0x3] %vm13_vm1, %v5091_v3  ;;  %v5184_v8 = vmax.f32 %v65_v6, %v4591_v7  ;;  %v4592_v10 = vld [vmem:[%s7461_s0 + $0x38] sm:$0xff]  ;;  %128 = vrot.lane.b32.xlu0 %v5133_v4, %s5092_s25  ;;  %v67_v13 = vld [vmem:[%s7461_s0 + $0x40] sm:$0xff] }
   0x5   :  { %20 = vst.msk [vmem:[#allocation2 + $0x130] sm:$0xff] %vm11_vm0, %v5091_v3  ;;  %v5198_v12 = vmax.f32 %v66_v9, %v4592_v10  ;;  %v4593_v14 = vld [vmem:[%s7461_s0 + $0x48] sm:$0xff]  ;;  %v68_v15 = vld [vmem:[%s7461_s0 + $0x50] sm:$0xff]  ;;  %v4594_v16 = vld [vmem:[%s7461_s0 + $0x58] sm:$0xff]  ;;  %s5099_s4 = smov 28   ;;  %vm1060_vm4 = vcmask 1043456  }
   0x6   :  { %43 = vst.msk [vmem:[#allocation2 + $0x9] sm:$0x1] %vm22_vm2, %v5091_v3  ;;  %23 = vst.msk [vmem:[#allocation2] sm:$0x1] %vm22_vm2, %v5091_v3  ;;  %132 = vrot.lane.b32.xlu1 %v5184_v8, %s5092_s25  ;;  %v5214_v17 = vmax.f32 %v67_v13, %v4593_v14  ;;  %v5218_v18 = vmax.f32 %v68_v15, %v4594_v16  ;;  %v69_v19 = vld [vmem:[%s7461_s0 + $0x60] sm:$0xff]  ;;  %v4595_v20 = vld [vmem:[%s7461_s0 + $0x68] sm:$0xff] }
   0x7   :  { %24 = vst.msk [vmem:[#allocation2 + $0x10] sm:$0x1] %vm22_vm2, %v5091_v3  ;;  %25 = vst.msk [vmem:[#allocation2 + $0x20] sm:$0x1] %vm22_vm2, %v5091_v3  ;;  %v70_v21 = vld [vmem:[%s7461_s0 + $0x70] sm:$0xff]  ;;  %v4596_v22 = vld [vmem:[%s7461_s0 + $0x78] sm:$0xff]  ;;  %v5234_v23 = vmax.f32 %v69_v19, %v4595_v20 }
   0x8   :  { %26 = vst.msk [vmem:[#allocation2 + $0x30] sm:$0x1] %vm22_vm2, %v5091_v3  ;;  %27 = vst.msk [vmem:[#allocation2 + $0x40] sm:$0x1] %vm22_vm2, %v5091_v3  ;;  %130 = vrot.lane.b32.xlu0 %v5194_v11, %s5092_s25  ;;  %v5238_v24 = vmax.f32 %v70_v21, %v4596_v22  ;;  %v71_v25 = vld [vmem:[%s7461_s0 + $0x80] sm:$0xff]  ;;  %v4597_v26 = vld [vmem:[%s7461_s0 + $0x88] sm:$0xff] }
   0x9   :  { %28 = vst.msk [vmem:[#allocation2 + $0x50] sm:$0x1] %vm22_vm2, %v5091_v3  ;;  %29 = vst.msk [vmem:[#allocation2 + $0x60] sm:$0x1] %vm22_vm2, %v5091_v3  ;;  %v72_v27 = vld [vmem:[%s7461_s0 + $0x90] sm:$0xff]  ;;  %v4598_v28 = vld [vmem:[%s7461_s0 + $0x98] sm:$0xff]  ;;  %v5254_v29 = vmax.f32 %v71_v25, %v4597_v26 }
   0xa   :  { %30 = vst.msk [vmem:[#allocation2 + $0x70] sm:$0x1] %vm22_vm2, %v5091_v3  ;;  %31 = vst.msk [vmem:[#allocation2 + $0x80] sm:$0x1] %vm22_vm2, %v5091_v3  ;;  %134 = vrot.lane.b32.xlu1 %v5198_v12, %s5092_s25  ;;  %v73_v30 = vld [vmem:[%s7461_s0 + $0xa0] sm:$0xff]  ;;  %v4599_v31 = vld [vmem:[%s7461_s0 + $0xa8] sm:$0xff]  ;;  %v5264_v32 = vmax.f32 %v72_v27, %v4598_v28 }
   0xb   :  { %32 = vst.msk [vmem:[#allocation2 + $0x90] sm:$0x1] %vm22_vm2, %v5091_v3  ;;  %33 = vst.msk [vmem:[#allocation2 + $0xa0] sm:$0x1] %vm22_vm2, %v5091_v3  ;;  %v74_v33 = vld [vmem:[%s7461_s0 + $0xb0] sm:$0xff]  ;;  %v4600_v34 = vld [vmem:[%s7461_s0 + $0xb8] sm:$0xff]  ;;  %v5274_v35 = vmax.f32 %v73_v30, %v4599_v31 }
   0xc   :  { %34 = vst.msk [vmem:[#allocation2 + $0xb0] sm:$0x1] %vm22_vm2, %v5091_v3  ;;  %35 = vst.msk [vmem:[#allocation2 + $0xc0] sm:$0x1] %vm22_vm2, %v5091_v3  ;;  %136 = vrot.lane.b32.xlu0 %v5214_v17, %s5092_s25  ;;  %v75_v36 = vld [vmem:[%s7461_s0 + $0xc0] sm:$0xff]  ;;  %v4601_v37 = vld [vmem:[%s7461_s0 + $0xc8] sm:$0xff]  ;;  %v5284_v38 = vmax.f32 %v74_v33, %v4600_v34 }
   0xd   :  { %36 = vst.msk [vmem:[#allocation2 + $0xd0] sm:$0x1] %vm22_vm2, %v5091_v3  ;;  %37 = vst.msk [vmem:[#allocation2 + $0xe0] sm:$0x1] %vm22_vm2, %v5091_v3  ;;  %v76_v39 = vld [vmem:[%s7461_s0 + $0xd0] sm:$0xff]  ;;  %v4602_v40 = vld [vmem:[%s7461_s0 + $0xd8] sm:$0xff]  ;;  %v5294_v41 = vmax.f32 %v75_v36, %v4601_v37 }
   0xe   :  { %38 = vst.msk [vmem:[#allocation2 + $0xf0] sm:$0x1] %vm22_vm2, %v5091_v3  ;;  %39 = vst.msk [vmem:[#allocation2 + $0x100] sm:$0x1] %vm22_vm2, %v5091_v3  ;;  %138 = vrot.lane.b32.xlu1 %v5218_v18, %s5092_s25  ;;  %v77_v42 = vld [vmem:[%s7461_s0 + $0xe0] sm:$0xff]  ;;  %v4603_v43 = vld [vmem:[%s7461_s0 + $0xe8] sm:$0xff]  ;;  %v5304_v44 = vmax.f32 %v76_v39, %v4602_v40 }
   0xf   :  { %40 = vst.msk [vmem:[#allocation2 + $0x110] sm:$0x1] %vm22_vm2, %v5091_v3  ;;  %41 = vst.msk [vmem:[#allocation2 + $0x120] sm:$0x1] %vm22_vm2, %v5091_v3  ;;  %v78_v45 = vld [vmem:[%s7461_s0 + $0xf0] sm:$0xff]  ;;  %v4604_v46 = vld [vmem:[%s7461_s0 + $0xf8] sm:$0xff]  ;;  %v5314_v47 = vmax.f32 %v77_v42, %v4603_v43 }
  0x10   :  { %42 = vst.msk [vmem:[#allocation2 + $0x130] sm:$0x1] %vm22_vm2, %v5091_v3  ;;  %44 = vst.msk [vmem:[#allocation2 + $0x19] sm:$0x1] %vm22_vm2, %v5091_v3  ;;  %140 = vrot.lane.b32.xlu0 %v5234_v23, %s5092_s25  ;;  %v5318_v48 = vmax.f32 %v78_v45, %v4604_v46  ;;  %v227_v49 = vld [vmem:[#allocation2 + $0x1] sm:$0xff]  ;;  %s5094_s0 = smov 8  }
  0x11   :  { %45 = vst.msk [vmem:[#allocation2 + $0x29] sm:$0x1] %vm22_vm2, %v5091_v3  ;;  %46 = vst.msk [vmem:[#allocation2 + $0x39] sm:$0x1] %vm22_vm2, %v5091_v3  ;;  %v243_v50 = vld [vmem:[#allocation2 + $0x2] sm:$0xff]  ;;  %v1005_v33 = vld [vmem:[%s7462_s1 + $0x18] sm:$0xff] }
  0x12   :  { %47 = vst.msk [vmem:[#allocation2 + $0x49] sm:$0x1] %vm22_vm2, %v5091_v3  ;;  %48 = vst.msk [vmem:[#allocation2 + $0x59] sm:$0x1] %vm22_vm2, %v5091_v3  ;;  %142 = vrot.lane.b32.xlu1 %v5238_v24, %s5092_s25  ;;  %v1002_v28 = vld [vmem:[%s7462_s1] sm:$0xff]  ;;  %s5100_s7 = smov 32  }
  0x13   :  { %49 = vst.msk [vmem:[#allocation2 + $0x69] sm:$0x1] %vm22_vm2, %v5091_v3  ;;  %50 = vst.msk [vmem:[#allocation2 + $0x79] sm:$0x1] %vm22_vm2, %v5091_v3  ;;  %vm900_vm5 = vcmask 97280   ;;  %vm917_vm6 = vcmask 130048  }
  0x14   :  { %51 = vst.msk [vmem:[#allocation2 + $0x89] sm:$0x1] %vm22_vm2, %v5091_v3  ;;  %52 = vst.msk [vmem:[#allocation2 + $0x99] sm:$0x1] %vm22_vm2, %v5091_v3  ;;  %144 = vrot.lane.b32.xlu0 %v5254_v29, %s5092_s25  ;;  %vm934_vm7 = vcmask 162816   ;;  %vm951_vm8 = vcmask 195584  }
  0x15   :  { %53 = vst.msk [vmem:[#allocation2 + $0xa9] sm:$0x1] %vm22_vm2, %v5091_v3  ;;  %54 = vst.msk [vmem:[#allocation2 + $0xb9] sm:$0x1] %vm22_vm2, %v5091_v3  ;;  %vm968_vm9 = vcmask 228352   ;;  %vm985_vm10 = vcmask 261120  }
  0x16   :  { %55 = vst.msk [vmem:[#allocation2 + $0xc9] sm:$0x1] %vm22_vm2, %v5091_v3  ;;  %56 = vst.msk [vmem:[#allocation2 + $0xd9] sm:$0x1] %vm22_vm2, %v5091_v3  ;;  %146 = vrot.lane.b32.xlu1 %v5264_v32, %s5092_s25  ;;  %vm1011_vm11 = vcmask 293888   ;;  %s5104_s12 = smov 40  }
  0x17   :  { %57 = vst.msk [vmem:[#allocation2 + $0xe9] sm:$0x1] %vm22_vm2, %v5091_v3  ;;  %58 = vst.msk [vmem:[#allocation2 + $0xf9] sm:$0x1] %vm22_vm2, %v5091_v3  ;;  %vm4214_vm12 = vcmask 326656   ;;  %vm4231_vm13 = vcmask 392192  }
  0x18   :  { %59 = vst.msk [vmem:[#allocation2 + $0x109] sm:$0x1] %vm22_vm2, %v5091_v3  ;;  %60 = vst.msk [vmem:[#allocation2 + $0x119] sm:$0x1] %vm22_vm2, %v5091_v3  ;;  %148 = vrot.lane.b32.xlu0 %v5274_v35, %s5092_s25  ;;  %vm4248_vm14 = vcmask 457728   ;;  %vm4265_vm15 = vcmask 523264  }
  0x19   :  { %61 = vst.msk [vmem:[#allocation2 + $0x129] sm:$0x1] %vm22_vm2, %v5091_v3  ;;  %62 = vst.msk [vmem:[#allocation2 + $0x139] sm:$0x1] %vm22_vm2, %v5091_v3  ;;  %vm4295_vm1 = vcmask 588800  }
  0x1a   :  { %150 = vrot.lane.b32.xlu1 %v5284_v38, %s5092_s25 }
  0x1c   :  { %152 = vrot.lane.b32.xlu0 %v5294_v41, %s5092_s25 }
  0x1e   :  { %154 = vrot.lane.b32.xlu1 %v5304_v44, %s5092_s25 }
  0x20   :  { %156 = vrot.lane.b32.xlu0 %v5314_v47, %s5092_s25 }
  0x22   :  { %158 = vrot.lane.b32.xlu1 %v5318_v48, %s5092_s25  ;;  %s5095_s25 = smov 12  }
  0x24   :  { %372 = vrot.lane.b32.xlu0 %v227_v49, %s5093_s19 }
  0x28   :  { %436 = vrot.lane.b32.xlu0 %v243_v50, %s5094_s0 }
  0x76   :  { %v129_v51 = vpop.permute.xlu0 %128 }
  0x77   :  { %v5327_v52 = vmax.f32 %v5133_v4, %v129_v51 }
  0x78   :  { %v133_v53 = vpop.permute.xlu1 %132 }
  0x79   :  { %v5330_v54 = vmax.f32 %v5184_v8, %v133_v53  ;;  %194 = vst.msk [vmem:[#allocation2 + $0x11] sm:$0xff] %vm193_vm3, %v5327_v52 }
  0x7a   :  { %v131_v55 = vpop.permute.xlu0 %130 }
  0x7b   :  { %196 = vst.msk [vmem:[#allocation2 + $0x31] sm:$0xff] %vm193_vm3, %v5330_v54  ;;  %v5337_v56 = vmax.f32 %v5194_v11, %v131_v55 }
  0x7c   :  { %v135_v57 = vpop.permute.xlu1 %134 }
  0x7d   :  { %v5340_v58 = vmax.f32 %v5198_v12, %v135_v57  ;;  %195 = vst.msk [vmem:[#allocation2 + $0x21] sm:$0xff] %vm193_vm3, %v5337_v56  ;;  %v5511_v57 = vld [vmem:[#allocation2 + $0xa2] sm:$0xff] }
  0x7e   :  { %v137_v59 = vpop.permute.xlu0 %136 }
  0x7f   :  { %197 = vst.msk [vmem:[#allocation2 + $0x41] sm:$0xff] %vm193_vm3, %v5340_v58  ;;  %v5347_v60 = vmax.f32 %v5214_v17, %v137_v59 }
  0x80   :  { %v139_v61 = vpop.permute.xlu1 %138  ;;  %v5349_v62 = vld [vmem:[#allocation2 + $0x10] sm:$0xff] }
  0x81   :  { %v228_v63 = vld [vmem:[#allocation2 + $0x11] sm:$0xff]  ;;  %v5352_v0 = vmax.f32 %v5218_v18, %v139_v61  ;;  %500 = vrot.lane.b32.xlu0 %v5349_v62, %s5095_s25  ;;  %198 = vst.msk [vmem:[#allocation2 + $0x51] sm:$0xff] %vm193_vm3, %v5347_v60 }
  0x82   :  { %374 = vrot.lane.b32.xlu1 %v228_v63, %s5093_s19  ;;  %v141_v1 = vpop.permute.xlu0 %140  ;;  %v244_v4 = vld [vmem:[#allocation2 + $0x12] sm:$0xff] }
  0x83   :  { %199 = vst.msk [vmem:[#allocation2 + $0x61] sm:$0xff] %vm193_vm3, %v5352_v0  ;;  %v5362_v2 = vmax.f32 %v5234_v23, %v141_v1  ;;  %v230_v12 = vld [vmem:[#allocation2 + $0x31] sm:$0xff] }
  0x84   :  { %v143_v3 = vpop.permute.xlu1 %142  ;;  %v276_v6 = vld [vmem:[#allocation2 + $0x21] sm:$0xff]  ;;  %v246_v22 = vld [vmem:[#allocation2 + $0x32] sm:$0xff] }
  0x85   :  { %v5365_v5 = vmax.f32 %v5238_v24, %v143_v3  ;;  %564 = vrot.lane.b32.xlu0 %v228_v63, %s5096_s20  ;;  %200 = vst.msk [vmem:[#allocation2 + $0x71] sm:$0xff] %vm193_vm3, %v5362_v2  ;;  %v5371_v7 = vld [vmem:[#allocation2 + $0x20] sm:$0xff]  ;;  %v5424_v27 = vld [vmem:[#allocation2 + $0x30] sm:$0xff] }
  0x86   :  { %438 = vrot.lane.b32.xlu1 %v244_v4, %s5094_s0  ;;  %v145_v8 = vpop.permute.xlu0 %144  ;;  %v292_v20 = vld [vmem:[#allocation2 + $0x22] sm:$0xff]  ;;  %v5518_v1 = vld [vmem:[#allocation2 + $0x90] sm:$0xff] }
  0x87   :  { %201 = vst.msk [vmem:[#allocation2 + $0x81] sm:$0xff] %vm193_vm3, %v5365_v5  ;;  %v5376_v9 = vmax.f32 %v5254_v29, %v145_v8  ;;  %v1003_v29 = vld [vmem:[%s7462_s1 + $0x8] sm:$0xff]  ;;  %v5436_v31 = vld [vmem:[#allocation2 + $0x40] sm:$0xff] }
  0x88   :  { %v147_v10 = vpop.permute.xlu1 %146  ;;  %v4908_v30 = vpack.c.bf16 %v1003_v29, %v1002_v28  ;;  %v231_v36 = vld [vmem:[#allocation2 + $0x41] sm:$0xff]  ;;  %v232_v37 = vld [vmem:[#allocation2 + $0x51] sm:$0xff] }
  0x89   :  { %v5379_v11 = vmax.f32 %v5264_v32, %v147_v10  ;;  %566 = vrot.lane.b32.xlu0 %v276_v6, %s5096_s20  ;;  %202 = vst.msk [vmem:[#allocation2 + $0xb1] sm:$0xff] %vm193_vm3, %v5376_v9  ;;  %v1004_v32 = vld [vmem:[%s7462_s1 + $0x10] sm:$0xff] }
  0x8a   :  { %502 = vrot.lane.b32.xlu1 %v5371_v7, %s5095_s25  ;;  %v149_v13 = vpop.permute.xlu0 %148  ;;  %4909 = vmatprep.subr.bf16.mxu0 %v4908_v30  ;;  %v4912_v34 = vpack.c.bf16 %v1005_v33, %v1004_v32  ;;  %v248_v39 = vld [vmem:[#allocation2 + $0x52] sm:$0xff]  ;;  %v233_v42 = vld [vmem:[#allocation2 + $0x61] sm:$0xff] }
  0x8b   :  { %203 = vst.msk [vmem:[#allocation2 + $0xc1] sm:$0xff] %vm193_vm3, %v5379_v11  ;;  %v5389_v14 = vmax.f32 %v5274_v35, %v149_v13  ;;  %4911 = vmatpush3.bf16.msra.mxu0 %v4908_v30  ;;  %v1006_v35 = vld [vmem:[%s7462_s1 + $0x20] sm:$0xf]  ;;  %v5465_v40 = vld [vmem:[#allocation2 + $0x50] sm:$0xff] }
  0x8c   :  { %v151_v15 = vpop.permute.xlu1 %150  ;;  %4913 = vmatprep.subr.bf16.mxu0 %v4912_v34  ;;  %v234_v43 = vld [vmem:[#allocation2 + $0x71] sm:$0xff]  ;;  %v211_v32 = vld [vmem:[#allocation2] sm:$0xff] }
  0x8d   :  { %7469 = vst [vmem:[#allocation3_spill] sm:$0xff] %v5389_v14  ;;  %v5392_v16 = vmax.f32 %v5284_v38, %v151_v15  ;;  %378 = vrot.lane.b32.xlu0 %v230_v12, %s5093_s19  ;;  %204 = vst.msk [vmem:[#allocation2 + $0xd1] sm:$0xff] %vm193_vm3, %v5389_v14  ;;  %v294_v38 = vld [vmem:[#allocation2 + $0x42] sm:$0xff]  ;;  %v250_v45 = vld [vmem:[#allocation2 + $0x72] sm:$0xff] }
  0x8e   :  { %376 = vrot.lane.b32.xlu1 %v276_v6, %s5093_s19  ;;  %v153_v17 = vpop.permute.xlu0 %152  ;;  %v5489_v46 = vld [vmem:[#allocation2 + $0x70] sm:$0xff]  ;;  %v282_v51 = vld [vmem:[#allocation2 + $0x81] sm:$0xff] }
  0x8f   :  { %205 = vst.msk [vmem:[#allocation2 + $0xe1] sm:$0xff] %vm193_vm3, %v5392_v16  ;;  %v5401_v18 = vmax.f32 %v5294_v41, %v153_v17  ;;  %4915 = vmatpush3.bf16.msra.mxu0 %v4912_v34  ;;  %v5471_v41 = vld [vmem:[#allocation2 + $0x60] sm:$0xff]  ;;  %v5537_v13 = vld [vmem:[#allocation2 + $0x91] sm:$0xff] }
  0x90   :  { %v155_v19 = vpop.permute.xlu1 %154  ;;  %4772 = vmatprep.subr.msk.mxu0 %vm1060_vm4, %v1006_v35  ;;  %v236_v50 = vld [vmem:[#allocation2 + $0xb1] sm:$0xff]  ;;  %v298_v55 = vld [vmem:[#allocation2 + $0x82] sm:$0xff] }
  0x91   :  { %7470 = vst [vmem:[#allocation4_spill] sm:$0xff] %v5401_v18  ;;  %v5404_v21 = vmax.f32 %v5304_v44, %v155_v19  ;;  %630 = vrot.lane.b32.xlu0 %v292_v20, %s5097_s21  ;;  %206 = vst.msk [vmem:[#allocation2 + $0xf1] sm:$0xff] %vm193_vm3, %v5401_v18  ;;  %v296_v44 = vld [vmem:[#allocation2 + $0x62] sm:$0xff]  ;;  %v252_v63 = vld [vmem:[#allocation2 + $0xb2] sm:$0xff] }
  0x92   :  { %628 = vrot.lane.b32.xlu1 %v244_v4, %s5097_s21  ;;  %v157_v23 = vpop.permute.xlu0 %156  ;;  %v5529_v10 = vld [vmem:[#allocation2 + $0xb0] sm:$0xff] }
  0x93   :  { %7471 = vst [vmem:[#allocation5_spill] sm:$0xff] %v5404_v21  ;;  %207 = vst.msk [vmem:[#allocation2 + $0x101] sm:$0xff] %vm193_vm3, %v5404_v21  ;;  %v5413_v24 = vmax.f32 %v5314_v47, %v157_v23  ;;  %4773 = vmatpush3.msk.msra.mxu0 %vm1060_vm4, %v1006_v35  ;;  %v266_v47 = vld [vmem:[#allocation2 + $0x80] sm:$0xff]  ;;  %v5556_v33 = vld [vmem:[#allocation2 + $0x92] sm:$0xff] }
  0x94   :  { %v159_v25 = vpop.permute.xlu1 %158  ;;  %v238_v30 = vld [vmem:[#allocation2 + $0xd1] sm:$0xff] }
  0x95   :  { %7472 = vst [vmem:[#allocation6_spill] sm:$0xff] %v5413_v24  ;;  %v5416_v26 = vmax.f32 %v5318_v48, %v159_v25  ;;  %442 = vrot.lane.b32.xlu0 %v246_v22, %s5094_s0  ;;  %208 = vst.msk [vmem:[#allocation2 + $0x111] sm:$0xff] %vm193_vm3, %v5413_v24  ;;  %v5500_v48 = vld [vmem:[#allocation2 + $0xa1] sm:$0xff] }
  0x96   :  { %440 = vrot.lane.b32.xlu1 %v292_v20, %s5094_s0  ;;  %v373_v49 = vpop.permute.xlu0 %372 }
  0x97   :  { %7473 = vst [vmem:[#allocation7_spill] sm:$0xff] %v5416_v26  ;;  %209 = vst.msk [vmem:[#allocation2 + $0x121] sm:$0xff] %vm193_vm3, %v5416_v26 }
  0x99   :  { %694 = vrot.lane.b32.xlu0 %v5424_v27, %s5098_s27 }
  0x9a   :  { %692 = vrot.lane.b32.xlu1 %v5371_v7, %s5098_s27  ;;  %v437_v53 = vpop.permute.xlu0 %436 }
  0x9d   :  { %506 = vrot.lane.b32.xlu0 %v5436_v31, %s5095_s25 }
  0x9e   :  { %504 = vrot.lane.b32.xlu1 %v5424_v27, %s5095_s25 }
  0xa1   :  { %758 = vrot.lane.b32.xlu0 %v230_v12, %s5099_s4 }
  0xa2   :  { %756 = vrot.lane.b32.xlu1 %v276_v6, %s5099_s4 }
  0xa5   :  { %380 = vrot.lane.b32.xlu0 %v231_v36, %s5093_s19 }
  0xa6   :  { %568 = vrot.lane.b32.xlu1 %v230_v12, %s5096_s20  ;;  %v5531_v12 = vld [vmem:[#allocation2 + $0xc0] sm:$0xff] }
  0xa9   :  { %632 = vrot.lane.b32.xlu0 %v246_v22, %s5097_s21 }
  0xaa   :  { %820 = vrot.lane.b32.xlu1 %v292_v20, %s5100_s7 }
  0xad   :  { %382 = vrot.lane.b32.xlu0 %v232_v37, %s5093_s19 }
  0xae   :  { %570 = vrot.lane.b32.xlu1 %v231_v36, %s5096_s20 }
  0xb1   :  { %634 = vrot.lane.b32.xlu0 %v294_v38, %s5097_s21 }
  0xb2   :  { %822 = vrot.lane.b32.xlu1 %v246_v22, %s5100_s7  ;;  %v237_v22 = vld [vmem:[#allocation2 + $0xc1] sm:$0xff] }
  0xb5   :  { %446 = vrot.lane.b32.xlu0 %v248_v39, %s5094_s0 }
  0xb6   :  { %444 = vrot.lane.b32.xlu1 %v294_v38, %s5094_s0 }
  0xb9   :  { %698 = vrot.lane.b32.xlu0 %v5465_v40, %s5098_s27 }
  0xba   :  { %696 = vrot.lane.b32.xlu1 %v5436_v31, %s5098_s27 }
  0xbd   :  { %510 = vrot.lane.b32.xlu0 %v5471_v41, %s5095_s25 }
  0xbe   :  { %508 = vrot.lane.b32.xlu1 %v5465_v40, %s5095_s25 }
  0xc1   :  { %762 = vrot.lane.b32.xlu0 %v232_v37, %s5099_s4 }
  0xc2   :  { %760 = vrot.lane.b32.xlu1 %v231_v36, %s5099_s4  ;;  %v300_v36 = vld [vmem:[#allocation2 + $0xc2] sm:$0xff] }
  0xc5   :  { %384 = vrot.lane.b32.xlu0 %v233_v42, %s5093_s19 }
  0xc6   :  { %572 = vrot.lane.b32.xlu1 %v232_v37, %s5096_s20  ;;  %v868_v37 = vsel %vm193_vm3, %v211_v32, %v373_v49  ;;  %v5587_v32 = vld [vmem:[#allocation2 + $0xe0] sm:$0xff] }
  0xc9   :  { %636 = vrot.lane.b32.xlu0 %v248_v39, %s5097_s21 }
  0xca   :  { %824 = vrot.lane.b32.xlu1 %v294_v38, %s5100_s7 }
  0xcd   :  { %386 = vrot.lane.b32.xlu0 %v234_v43, %s5093_s19 }
  0xce   :  { %574 = vrot.lane.b32.xlu1 %v233_v42, %s5096_s20 }
  0xd1   :  { %638 = vrot.lane.b32.xlu0 %v296_v44, %s5097_s21 }
  0xd2   :  { %826 = vrot.lane.b32.xlu1 %v248_v39, %s5100_s7 }
  0xd5   :  { %450 = vrot.lane.b32.xlu0 %v250_v45, %s5094_s0 }
  0xd6   :  { %448 = vrot.lane.b32.xlu1 %v296_v44, %s5094_s0 }
  0xd9   :  { %702 = vrot.lane.b32.xlu0 %v5489_v46, %s5098_s27 }
  0xda   :  { %700 = vrot.lane.b32.xlu1 %v5471_v41, %s5098_s27 }
  0xdd   :  { %514 = vrot.lane.b32.xlu0 %v266_v47, %s5095_s25 }
  0xde   :  { %512 = vrot.lane.b32.xlu1 %v5489_v46, %s5095_s25 }
  0xe1   :  { %766 = vrot.lane.b32.xlu0 %v234_v43, %s5099_s4 }
  0xe2   :  { %764 = vrot.lane.b32.xlu1 %v233_v42, %s5099_s4  ;;  %v884_v42 = vsel %vm11_vm0, %v868_v37, %v437_v53 }
  0xe5   :  { %388 = vrot.lane.b32.xlu0 %v5500_v48, %s5093_s19 }
  0xe6   :  { %576 = vrot.lane.b32.xlu1 %v234_v43, %s5096_s20  ;;  %v254_v43 = vld [vmem:[#allocation2 + $0xd2] sm:$0xff] }
  0xe9   :  { %640 = vrot.lane.b32.xlu0 %v250_v45, %s5097_s21 }
  0xea   :  { %828 = vrot.lane.b32.xlu1 %v296_v44, %s5100_s7 }
  0xed   :  { %390 = vrot.lane.b32.xlu0 %v236_v50, %s5093_s19 }
  0xee   :  { %578 = vrot.lane.b32.xlu1 %v282_v51, %s5096_s20 }
  0xf1   :  { %642 = vrot.lane.b32.xlu0 %v298_v55, %s5097_s21 }
  0xf2   :  { %830 = vrot.lane.b32.xlu1 %v250_v45, %s5100_s7 }
  0xf3   :  { %v501_v61 = vpop.permute.xlu0 %500 }
  0xf4   :  { %v5513_v59 = vpop.permute.xlu1 %374  ;;  %v901_v44 = vsel %vm900_vm5, %v884_v42, %v501_v61 }
  0xf5   :  { %454 = vrot.lane.b32.xlu0 %v252_v63, %s5094_s0 }
  0xf6   :  { %452 = vrot.lane.b32.xlu1 %v5511_v57, %s5094_s0 }
  0xf7   :  { %v565_v4 = vpop.permute.xlu0 %564 }
  0xf8   :  { %v5520_v3 = vpop.permute.xlu1 %438  ;;  %v918_v49 = vsel %vm917_vm6, %v901_v44, %v565_v4 }
  0xf9   :  { %706 = vrot.lane.b32.xlu0 %v5518_v1, %s5098_s27 }
  0xfa   :  { %704 = vrot.lane.b32.xlu1 %v266_v47, %s5098_s27 }
  0xfb   :  { %v5527_v8 = vpop.permute.xlu0 %566 }
  0xfc   :  { %v5525_v6 = vpop.permute.xlu1 %502 }
  0xfd   :  { %518 = vrot.lane.b32.xlu0 %v5531_v12, %s5095_s25 }
  0xfe   :  { %516 = vrot.lane.b32.xlu1 %v5529_v10, %s5095_s25 }
  0xff   :  { %v5541_v17 = vpop.permute.xlu0 %378 }
 0x100   :  { %v5539_v15 = vpop.permute.xlu1 %376 }
 0x101   :  { %770 = vrot.lane.b32.xlu0 %v5537_v13, %s5099_s4 }
 0x102   :  { %768 = vrot.lane.b32.xlu1 %v282_v51, %s5099_s4 }
 0x103   :  { %v631_v20 = vpop.permute.xlu0 %630 }
 0x104   :  { %v629_v19 = vpop.permute.xlu1 %628 }
 0x105   :  { %392 = vrot.lane.b32.xlu0 %v237_v22, %s5093_s19  ;;  %v935_v51 = vsel %vm934_vm7, %v918_v49, %v629_v19 }
 0x106   :  { %580 = vrot.lane.b32.xlu1 %v236_v50, %s5096_s20  ;;  %v5573_v50 = vld [vmem:[#allocation2 + $0xd0] sm:$0xff] }
 0x107   :  { %v5550_v25 = vpop.permute.xlu0 %442 }
 0x108   :  { %v5548_v23 = vpop.permute.xlu1 %440 }
 0x109   :  { %644 = vrot.lane.b32.xlu0 %v252_v63, %s5097_s21 }
 0x10a   :  { %832 = vrot.lane.b32.xlu1 %v298_v55, %s5100_s7  ;;  %v869_v55 = vsel %vm193_vm3, %v5349_v62, %v5513_v59 }
 0x10b   :  { %v695_v29 = vpop.permute.xlu0 %694  ;;  %v885_v19 = vsel %vm11_vm0, %v869_v55, %v5520_v3 }
 0x10c   :  { %v693_v28 = vpop.permute.xlu1 %692  ;;  %v902_v42 = vsel %vm900_vm5, %v885_v19, %v5525_v6  ;;  %v256_v19 = vld [vmem:[#allocation2 + $0xf2] sm:$0xff] }
 0x10d   :  { %394 = vrot.lane.b32.xlu0 %v238_v30, %s5093_s19  ;;  %v952_v53 = vsel %vm951_vm8, %v935_v51, %v693_v28  ;;  %v919_v3 = vsel %vm917_vm6, %v902_v42, %v5527_v8 }
 0x10e   :  { %582 = vrot.lane.b32.xlu1 %v237_v22, %s5096_s20  ;;  %v936_v28 = vsel %vm934_vm7, %v919_v3, %v631_v20 }
 0x10f   :  { %v5560_v35 = vpop.permute.xlu0 %506  ;;  %v953_v6 = vsel %vm951_vm8, %v936_v28, %v695_v29 }
 0x110   :  { %v5558_v34 = vpop.permute.xlu1 %504 }
 0x111   :  { %646 = vrot.lane.b32.xlu0 %v300_v36, %s5097_s21 }
 0x112   :  { %834 = vrot.lane.b32.xlu1 %v5556_v33, %s5100_s7 }
 0x113   :  { %v759_v39 = vpop.permute.xlu0 %758 }
 0x114   :  { %v757_v38 = vpop.permute.xlu1 %756 }
 0x115   :  { %458 = vrot.lane.b32.xlu0 %v254_v43, %s5094_s0  ;;  %v969_v61 = vsel %vm968_vm9, %v952_v53, %v757_v38  ;;  %v970_v38 = vsel %vm968_vm9, %v953_v6, %v759_v39  ;;  %v239_v53 = vld [vmem:[#allocation2 + $0xe1] sm:$0xff]  ;;  %v240_v39 = vld [vmem:[#allocation2 + $0xf1] sm:$0xff] }
 0x116   :  { %456 = vrot.lane.b32.xlu1 %v300_v36, %s5094_s0 }
 0x117   :  { %v5570_v47 = vpop.permute.xlu0 %380 }
 0x118   :  { %v569_v45 = vpop.permute.xlu1 %568 }
 0x119   :  { %710 = vrot.lane.b32.xlu0 %v5573_v50, %s5098_s27 }
 0x11a   :  { %708 = vrot.lane.b32.xlu1 %v5531_v12, %s5098_s27 }
 0x11b   :  { %v633_v4 = vpop.permute.xlu0 %632 }
 0x11c   :  { %v821_v63 = vpop.permute.xlu1 %820 }
 0x11d   :  { %v986_v37 = vsel %vm985_vm10, %v969_v61, %v821_v63  ;;  %522 = vrot.lane.b32.xlu0 %v5587_v32, %s5095_s25  ;;  %v302_v61 = vld [vmem:[#allocation2 + $0xe2] sm:$0xff] }
 0x11e   :  { %520 = vrot.lane.b32.xlu1 %v5573_v50, %s5095_s25  ;;  %4774 = vmatprep.mubr.msk.f32.mxu0 %vm1011_vm11, %v986_v37  ;;  %v870_v37 = vsel %vm193_vm3, %v5371_v7, %v5539_v15 }
 0x11f   :  { %v5597_v59 = vpop.permute.xlu0 %382  ;;  %v886_v42 = vsel %vm11_vm0, %v870_v37, %v5548_v23  ;;  %v5646_v37 = vld [vmem:[#allocation2 + $0x100] sm:$0xff] }
 0x120   :  { %v571_v62 = vpop.permute.xlu1 %570  ;;  %v903_v3 = vsel %vm900_vm5, %v886_v42, %v5558_v34 }
 0x121   :  { %774 = vrot.lane.b32.xlu0 %v238_v30, %s5099_s4  ;;  %v920_v6 = vsel %vm917_vm6, %v903_v3, %v569_v45  ;;  %v871_v45 = vsel %vm193_vm3, %v5424_v27, %v5541_v17 }
 0x122   :  { %772 = vrot.lane.b32.xlu1 %v237_v22, %s5099_s4 }
 0x123   :  { %v635_v49 = vpop.permute.xlu0 %634 }
 0x124   :  { %v823_v44 = vpop.permute.xlu1 %822 }
 0x125   :  { %v987_v51 = vsel %vm985_vm10, %v970_v38, %v823_v44  ;;  %396 = vrot.lane.b32.xlu0 %v239_v53, %s5093_s19  ;;  %v5636_v38 = vld [vmem:[#allocation2 + $0xf0] sm:$0xff]  ;;  %v937_v44 = vsel %vm934_vm7, %v920_v6, %v633_v4  ;;  %v887_v4 = vsel %vm11_vm0, %v871_v45, %v5550_v25 }
 0x126   :  { %584 = vrot.lane.b32.xlu1 %v238_v30, %s5096_s20  ;;  %4775 = vmatmul.mubr.msk.f32.vlgmr.msra.gmra.mrb[0].mxu0 %vm1011_vm11, %v987_v51  ;;  %v258_v45 = vld [vmem:[#allocation2 + $0x112] sm:$0xff] }
 0x127   :  { %v5612_v20 = vpop.permute.xlu0 %446 }
 0x128   :  { %v5610_v8 = vpop.permute.xlu1 %444 }
 0x129   :  { %648 = vrot.lane.b32.xlu0 %v254_v43, %s5097_s21 }
 0x12a   :  { %836 = vrot.lane.b32.xlu1 %v300_v36, %s5100_s7 }
 0x12b   :  { %v699_v29 = vpop.permute.xlu0 %698 }
 0x12c   :  { %v697_v22 = vpop.permute.xlu1 %696 }
 0x12d   :  { %398 = vrot.lane.b32.xlu0 %v240_v39, %s5093_s19  ;;  %v954_v7 = vsel %vm951_vm8, %v937_v44, %v697_v22  ;;  %v904_v22 = vsel %vm900_vm5, %v887_v4, %v5560_v35  ;;  %v241_v35 = vld [vmem:[#allocation2 + $0x101] sm:$0xff]  ;;  %v872_v4 = vsel %vm193_vm3, %v5436_v31, %v5570_v47 }
 0x12e   :  { %586 = vrot.lane.b32.xlu1 %v239_v53, %s5096_s20  ;;  %v921_v3 = vsel %vm917_vm6, %v904_v22, %v571_v62  ;;  %v888_v22 = vsel %vm11_vm0, %v872_v4, %v5610_v8  ;;  %v274_v4 = vld [vmem:[#allocation2 + $0x120] sm:$0xff] }
 0x12f   :  { %v5620_v55 = vpop.permute.xlu0 %510  ;;  %v938_v27 = vsel %vm934_vm7, %v921_v3, %v635_v49 }
 0x130   :  { %v5618_v30 = vpop.permute.xlu1 %508  ;;  %v955_v17 = vsel %vm951_vm8, %v938_v27, %v699_v29 }
 0x131   :  { %650 = vrot.lane.b32.xlu0 %v302_v61, %s5097_s21  ;;  %v905_v3 = vsel %vm900_vm5, %v888_v22, %v5618_v30 }
 0x132   :  { %838 = vrot.lane.b32.xlu1 %v254_v43, %s5100_s7 }
 0x133   :  { %v763_v36 = vpop.permute.xlu0 %762 }
 0x134   :  { %v761_v63 = vpop.permute.xlu1 %760  ;;  %v972_v25 = vsel %vm968_vm9, %v955_v17, %v763_v36  ;;  %v242_v36 = vld [vmem:[#allocation2 + $0x111] sm:$0xff] }
 0x135   :  { %462 = vrot.lane.b32.xlu0 %v256_v19, %s5094_s0  ;;  %v971_v15 = vsel %vm968_vm9, %v954_v7, %v761_v63 }
 0x136   :  { %460 = vrot.lane.b32.xlu1 %v302_v61, %s5094_s0 }
 0x137   :  { %v5633_v28 = vpop.permute.xlu0 %384 }
 0x138   :  { %v573_v43 = vpop.permute.xlu1 %572 }
 0x139   :  { %714 = vrot.lane.b32.xlu0 %v5636_v38, %s5098_s27  ;;  %v922_v17 = vsel %vm917_vm6, %v905_v3, %v573_v43  ;;  %v873_v43 = vsel %vm193_vm3, %v5465_v40, %v5597_v59 }
 0x13a   :  { %712 = vrot.lane.b32.xlu1 %v5587_v32, %s5098_s27 }
 0x13b   :  { %v637_v34 = vpop.permute.xlu0 %636 }
 0x13c   :  { %v825_v23 = vpop.permute.xlu1 %824 }
 0x13d   :  { %v988_v51 = vsel %vm985_vm10, %v971_v15, %v825_v23  ;;  %526 = vrot.lane.b32.xlu0 %v5646_v37, %s5095_s25  ;;  %v304_v23 = vld [vmem:[#allocation2 + $0x102] sm:$0xff] }
 0x13e   :  { %524 = vrot.lane.b32.xlu1 %v5636_v38, %s5095_s25  ;;  %4777 = vmatprep.mubr.msk.f32.mxu0 %vm1011_vm11, %v988_v51 }
 0x13f   :  { %v5660_v42 = vpop.permute.xlu0 %386 }
 0x140   :  { %v575_v63 = vpop.permute.xlu1 %574 }
 0x141   :  { %778 = vrot.lane.b32.xlu0 %v240_v39, %s5099_s4 }
 0x142   :  { %776 = vrot.lane.b32.xlu1 %v239_v53, %s5099_s4 }
 0x143   :  { %v639_v44 = vpop.permute.xlu0 %638 }
 0x144   :  { %v827_v6 = vpop.permute.xlu1 %826 }
 0x145   :  { %v989_v7 = vsel %vm985_vm10, %v972_v25, %v827_v6  ;;  %400 = vrot.lane.b32.xlu0 %v241_v35, %s5093_s19  ;;  %v5698_v25 = vld [vmem:[#allocation2 + $0x110] sm:$0xff]  ;;  %v939_v6 = vsel %vm934_vm7, %v922_v17, %v637_v34  ;;  %v889_v34 = vsel %vm11_vm0, %v873_v43, %v5612_v20 }
 0x146   :  { %588 = vrot.lane.b32.xlu1 %v240_v39, %s5096_s20  ;;  %4778 = vmatmul.mubr.msk.f32.gmra.mrb[2].mxu0 %vm1011_vm11, %v989_v7 }
 0x147   :  { %v5674_v49 = vpop.permute.xlu0 %450 }
 0x148   :  { %v5672_v62 = vpop.permute.xlu1 %448 }
 0x149   :  { %652 = vrot.lane.b32.xlu0 %v256_v19, %s5097_s21 }
 0x14a   :  { %840 = vrot.lane.b32.xlu1 %v302_v61, %s5100_s7 }
 0x14b   :  { %v703_v29 = vpop.permute.xlu0 %702 }
 0x14c   :  { %v701_v53 = vpop.permute.xlu1 %700 }
 0x14d   :  { %402 = vrot.lane.b32.xlu0 %v242_v36, %s5093_s19  ;;  %v956_v31 = vsel %vm951_vm8, %v939_v6, %v701_v53  ;;  %v906_v53 = vsel %vm900_vm5, %v889_v34, %v5620_v55  ;;  %v290_v55 = vld [vmem:[#allocation2 + $0x121] sm:$0xff] }
 0x14e   :  { %590 = vrot.lane.b32.xlu1 %v241_v35, %s5096_s20  ;;  %v923_v3 = vsel %vm917_vm6, %v906_v53, %v575_v63 }
 0x14f   :  { %v5682_v15 = vpop.permute.xlu0 %514  ;;  %v940_v40 = vsel %vm934_vm7, %v923_v3, %v639_v44 }
 0x150   :  { %v5680_v39 = vpop.permute.xlu1 %512  ;;  %v957_v59 = vsel %vm951_vm8, %v940_v40, %v703_v29 }
 0x151   :  { %654 = vrot.lane.b32.xlu0 %v304_v23, %s5097_s21 }
 0x152   :  { %842 = vrot.lane.b32.xlu1 %v256_v19, %s5100_s7 }
 0x153   :  { %v767_v61 = vpop.permute.xlu0 %766 }
 0x154   :  { %v765_v51 = vpop.permute.xlu1 %764  ;;  %v974_v20 = vsel %vm968_vm9, %v957_v59, %v767_v61 }
 0x155   :  { %466 = vrot.lane.b32.xlu0 %v258_v45, %s5094_s0  ;;  %v973_v47 = vsel %vm968_vm9, %v956_v31, %v765_v51 }
 0x156   :  { %464 = vrot.lane.b32.xlu1 %v304_v23, %s5094_s0 }
 0x157   :  { %v5695_v27 = vpop.permute.xlu0 %388 }
 0x158   :  { %v577_v19 = vpop.permute.xlu1 %576 }
 0x159   :  { %718 = vrot.lane.b32.xlu0 %v5698_v25, %s5098_s27 }
 0x15a   :  { %716 = vrot.lane.b32.xlu1 %v5646_v37, %s5098_s27 }
 0x15b   :  { %v641_v30 = vpop.permute.xlu0 %640 }
 0x15c   :  { %v829_v8 = vpop.permute.xlu1 %828 }
 0x15d   :  { %v990_v7 = vsel %vm985_vm10, %v973_v47, %v829_v8  ;;  %530 = vrot.lane.b32.xlu0 %v274_v4, %s5095_s25  ;;  %v306_v47 = vld [vmem:[#allocation2 + $0x122] sm:$0xff]  ;;  %v323_v8 = vld [vmem:[#allocation2 + $0x130] sm:$0xff] }
 0x15e   :  { %528 = vrot.lane.b32.xlu1 %v5698_v25, %s5095_s25  ;;  %4780 = vmatprep.mubr.msk.f32.mxu0 %vm1011_vm11, %v990_v7 }
 0x15f   :  { %v5719_v22 = vpop.permute.xlu0 %390 }
 0x160   :  { %v579_v51 = vpop.permute.xlu1 %578 }
 0x161   :  { %782 = vrot.lane.b32.xlu0 %v242_v36, %s5099_s4 }
 0x162   :  { %780 = vrot.lane.b32.xlu1 %v241_v35, %s5099_s4 }
 0x163   :  { %v643_v6 = vpop.permute.xlu0 %642 }
 0x164   :  { %v831_v17 = vpop.permute.xlu1 %830 }
 0x165   :  { %v991_v31 = vsel %vm985_vm10, %v974_v20, %v831_v17  ;;  %594 = vrot.lane.b32.xlu0 %v290_v55, %s5096_s20 }
 0x166   :  { %592 = vrot.lane.b32.xlu1 %v242_v36, %s5096_s20  ;;  %4781 = vmatmul.mubr.msk.f32.gmra.mrb[4].mxu0 %vm1011_vm11, %v991_v31 }
 0x167   :  { %v5733_v44 = vpop.permute.xlu0 %454 }
 0x168   :  { %v5731_v63 = vpop.permute.xlu1 %452 }
 0x169   :  { %846 = vrot.lane.b32.xlu0 %v258_v45, %s5100_s7 }
 0x16a   :  { %844 = vrot.lane.b32.xlu1 %v304_v23, %s5100_s7  ;;  %v874_v23 = vsel %vm193_vm3, %v5471_v41, %v5633_v28  ;;  %v355_v28 = vld [vmem:[#allocation2 + $0x132] sm:$0xff] }
 0x16b   :  { %v707_v29 = vpop.permute.xlu0 %706 }
 0x16c   :  { %v705_v35 = vpop.permute.xlu1 %704 }
 0x16d   :  { %720 = vrot.lane.b32.xlu0 %v274_v4, %s5098_s27  ;;  %v339_v4 = vld [vmem:[#allocation2 + $0x131] sm:$0xff] }
 0x16e   :  { %656 = vrot.lane.b32.xlu1 %v258_v45, %s5097_s21  ;;  %v890_v45 = vsel %vm11_vm0, %v874_v23, %v5672_v62 }
 0x16f   :  { %v5739_v36 = vpop.permute.xlu0 %518  ;;  %v907_v34 = vsel %vm900_vm5, %v890_v45, %v5680_v39  ;;  %v875_v39 = vsel %vm193_vm3, %v5489_v46, %v5660_v42  ;;  %v1338_v45 = vld [vmem:[#allocation2 + $0x2] sm:$0xff] }
 0x170   :  { %v517_v61 = vpop.permute.xlu1 %516  ;;  %v924_v40 = vsel %vm917_vm6, %v907_v34, %v577_v19  ;;  %v891_v19 = vsel %vm11_vm0, %v875_v39, %v5674_v49  ;;  %v219_v34 = vld [vmem:[#allocation2 + $0xa0] sm:$0xff] }
 0x171   :  { %784 = vrot.lane.b32.xlu0 %v290_v55, %s5099_s4  ;;  %v941_v59 = vsel %vm934_vm7, %v924_v40, %v641_v30  ;;  %v908_v30 = vsel %vm900_vm5, %v891_v19, %v5682_v15 }
 0x172   :  { %658 = vrot.lane.b32.xlu1 %v306_v47, %s5097_s21  ;;  %v958_v41 = vsel %vm951_vm8, %v941_v59, %v705_v35 }
 0x173   :  { %v771_v43 = vpop.permute.xlu0 %770 }
 0x174   :  { %v769_v7 = vpop.permute.xlu1 %768 }
 0x175   :  { %848 = vrot.lane.b32.xlu0 %v306_v47, %s5100_s7  ;;  %v975_v20 = vsel %vm968_vm9, %v958_v41, %v769_v7  ;;  %v925_v47 = vsel %vm917_vm6, %v908_v30, %v579_v51 }
 0x176   :  { %722 = vrot.lane.b32.xlu1 %v323_v8, %s5098_s27  ;;  %v1322_v8 = vld [vmem:[#allocation2 + $0x1] sm:$0xff]  ;;  %v942_v7 = vsel %vm934_vm7, %v925_v47, %v643_v6 }
 0x177   :  { %v5752_v3 = vpop.permute.xlu0 %392  ;;  %v959_v46 = vsel %vm951_vm8, %v942_v7, %v707_v29 }
 0x178   :  { %v581_v53 = vpop.permute.xlu1 %580  ;;  %v976_v42 = vsel %vm968_vm9, %v959_v46, %v771_v43 }
 0x179   :  { %1466 = vrot.lane.b32.xlu0 %v1322_v8, %s5093_s19 }
 0x17a   :  { %786 = vrot.lane.b32.xlu1 %v339_v4, %s5099_s4 }
 0x17b   :  { %v645_v62 = vpop.permute.xlu0 %644 }
 0x17c   :  { %v833_v17 = vpop.permute.xlu1 %832 }
 0x17d   :  { %v992_v31 = vsel %vm985_vm10, %v975_v20, %v833_v17  ;;  %1530 = vrot.lane.b32.xlu0 %v1338_v45, %s5094_s0 }
 0x17e   :  { %850 = vrot.lane.b32.xlu1 %v355_v28, %s5100_s7  ;;  %4783 = vmatprep.mubr.msk.f32.mxu0 %vm1011_vm11, %v992_v31 }
 0x17f   :  { %v5769_v35 = vpop.permute.xlu0 %394 }
 0x180   :  { %v583_v55 = vpop.permute.xlu1 %582 }
 0x181   :  { %1482 = vrot.lane.b32.xlu0 %v5500_v48, %s5093_s19 }
 0x182   :  { %1546 = vrot.lane.b32.xlu1 %v5511_v57, %s5094_s0 }
 0x183   :  { %v647_v23 = vpop.permute.xlu0 %646 }
 0x184   :  { %v835_v49 = vpop.permute.xlu1 %834 }
 0x185   :  { %v993_v15 = vsel %vm985_vm10, %v976_v42, %v835_v49  ;;  %1800 = vrot.lane.b32.xlu0 %v5518_v1, %s5098_s27 }
 0x186   :  { %4784 = vmatmul.mubr.msk.f32.gmra.mrb[6].mxu0 %vm1011_vm11, %v993_v15  ;;  %1928 = vrot.lane.b32.xlu1 %v5556_v33, %s5100_s7  ;;  %v876_v33 = vsel %vm193_vm3, %v219_v34, %v5695_v27 }
 0x187   :  { %v459_v6 = vpop.permute.xlu0 %458  ;;  %v892_v41 = vsel %vm11_vm0, %v876_v33, %v5731_v63  ;;  %v877_v63 = vsel %vm193_vm3, %v5529_v10, %v5719_v22 }
 0x188   :  { %v457_v51 = vpop.permute.xlu1 %456  ;;  %v909_v48 = vsel %vm900_vm5, %v892_v41, %v517_v61  ;;  %v893_v61 = vsel %vm11_vm0, %v877_v63, %v5733_v44 }
 0x189   :  { %1864 = vrot.lane.b32.xlu0 %v5537_v13, %s5099_s4  ;;  %v926_v1 = vsel %vm917_vm6, %v909_v48, %v581_v53  ;;  %v910_v53 = vsel %vm900_vm5, %v893_v61, %v5739_v36 }
 0x18a   :  { %v943_v17 = vsel %vm934_vm7, %v926_v1, %v645_v62  ;;  %v927_v47 = vsel %vm917_vm6, %v910_v53, %v583_v55 }
 0x18b   :  { %v711_v29 = vpop.permute.xlu0 %710  ;;  %v944_v8 = vsel %vm934_vm7, %v927_v47, %v647_v23  ;;  %v878_v23 = vsel %vm193_vm3, %v5531_v12, %v5752_v3  ;;  %v879_v12 = vsel %vm193_vm3, %v5573_v50, %v5769_v35 }
 0x18c   :  { %v709_v57 = vpop.permute.xlu1 %708  ;;  %v961_v7 = vsel %vm951_vm8, %v944_v8, %v711_v29  ;;  %v894_v29 = vsel %vm11_vm0, %v878_v23, %v457_v51  ;;  %v895_v3 = vsel %vm11_vm0, %v879_v12, %v459_v6 }
 0x18d   :  { %v960_v13 = vsel %vm951_vm8, %v943_v17, %v709_v57 }
 0x18f   :  { %v523_v4 = vpop.permute.xlu0 %522 }
 0x190   :  { %v521_v43 = vpop.permute.xlu1 %520  ;;  %v912_v51 = vsel %vm900_vm5, %v895_v3, %v523_v4 }
 0x193   :  { %v775_v59 = vpop.permute.xlu0 %774 }
 0x194   :  { %v773_v40 = vpop.permute.xlu1 %772  ;;  %v978_v46 = vsel %vm968_vm9, %v961_v7, %v775_v59 }
 0x195   :  { %v977_v31 = vsel %vm968_vm9, %v960_v13, %v773_v40  ;;  %v911_v40 = vsel %vm900_vm5, %v894_v29, %v521_v43 }
 0x197   :  { %v5794_v20 = vpop.permute.xlu0 %396 }
 0x198   :  { %v585_v28 = vpop.permute.xlu1 %584 }
 0x199   :  { %v928_v41 = vsel %vm917_vm6, %v911_v40, %v585_v28 }
 0x19b   :  { %v649_v19 = vpop.permute.xlu0 %648 }
 0x19c   :  { %v837_v39 = vpop.permute.xlu1 %836  ;;  %v945_v48 = vsel %vm934_vm7, %v928_v41, %v649_v19 }
 0x19d   :  { %v994_v27 = vsel %vm985_vm10, %v977_v31, %v837_v39 }
 0x19e   :  { %4786 = vmatprep.mubr.msk.f32.mxu0 %vm1011_vm11, %v994_v27 }
 0x19f   :  { %v399_v30 = vpop.permute.xlu0 %398 }
 0x1a0   :  { %v587_v62 = vpop.permute.xlu1 %586 }
 0x1a1   :  { %v929_v19 = vsel %vm917_vm6, %v912_v51, %v587_v62 }
 0x1a3   :  { %v651_v10 = vpop.permute.xlu0 %650 }
 0x1a4   :  { %v839_v42 = vpop.permute.xlu1 %838  ;;  %v946_v27 = vsel %vm934_vm7, %v929_v19, %v651_v10  ;;  %v880_v10 = vsel %vm193_vm3, %v5587_v32, %v5794_v20 }
 0x1a5   :  { %v995_v22 = vsel %vm985_vm10, %v978_v46, %v839_v42 }
 0x1a6   :  { %4787 = vmatmul.mubr.msk.f32.gmra.mrb[8].mxu0 %vm1011_vm11, %v995_v22  ;;  %v881_v22 = vsel %vm193_vm3, %v5636_v38, %v399_v30 }
 0x1a7   :  { %v463_v49 = vpop.permute.xlu0 %462 }
 0x1a8   :  { %v461_v44 = vpop.permute.xlu1 %460 }
 0x1ab   :  { %v715_v36 = vpop.permute.xlu0 %714 }
 0x1ac   :  { %v713_v15 = vpop.permute.xlu1 %712  ;;  %v963_v63 = vsel %vm951_vm8, %v946_v27, %v715_v36  ;;  %v897_v36 = vsel %vm11_vm0, %v881_v22, %v463_v49 }
 0x1ad   :  { %v962_v1 = vsel %vm951_vm8, %v945_v48, %v713_v15  ;;  %v896_v15 = vsel %vm11_vm0, %v880_v10, %v461_v44 }
 0x1af   :  { %v527_v57 = vpop.permute.xlu0 %526 }
 0x1b0   :  { %v525_v45 = vpop.permute.xlu1 %524 }
 0x1b3   :  { %v779_v55 = vpop.permute.xlu0 %778 }
 0x1b4   :  { %v777_v34 = vpop.permute.xlu1 %776  ;;  %v980_v61 = vsel %vm968_vm9, %v963_v63, %v779_v55  ;;  %v914_v55 = vsel %vm900_vm5, %v897_v36, %v527_v57 }
 0x1b5   :  { %v979_v17 = vsel %vm968_vm9, %v962_v1, %v777_v34  ;;  %v913_v34 = vsel %vm900_vm5, %v896_v15, %v525_v45 }
 0x1b7   :  { %v401_v33 = vpop.permute.xlu0 %400 }
 0x1b8   :  { %v589_v59 = vpop.permute.xlu1 %588  ;;  %v882_v1 = vsel %vm193_vm3, %v5646_v37, %v401_v33 }
 0x1b9   :  { %v930_v40 = vsel %vm917_vm6, %v913_v34, %v589_v59 }
 0x1bb   :  { %v653_v31 = vpop.permute.xlu0 %652 }
 0x1bc   :  { %v841_v13 = vpop.permute.xlu1 %840  ;;  %v947_v48 = vsel %vm934_vm7, %v930_v40, %v653_v31 }
 0x1bd   :  { %v996_v39 = vsel %vm985_vm10, %v979_v17, %v841_v13 }
 0x1be   :  { %4789 = vmatprep.mubr.msk.f32.mxu0 %vm1011_vm11, %v996_v39 }
 0x1bf   :  { %v403_v28 = vpop.permute.xlu0 %402 }
 0x1c0   :  { %v591_v43 = vpop.permute.xlu1 %590  ;;  %v883_v33 = vsel %vm193_vm3, %v5698_v25, %v403_v28  ;;  %v5881_v25 = vld [vmem:[%s7462_s1 + $0xb4] ss:$0 sm:$0xff] }
 0x1c1   :  { %v931_v41 = vsel %vm917_vm6, %v914_v55, %v591_v43 }
 0x1c3   :  { %v655_v47 = vpop.permute.xlu0 %654 }
 0x1c4   :  { %v843_v53 = vpop.permute.xlu1 %842  ;;  %v948_v32 = vsel %vm934_vm7, %v931_v41, %v655_v47 }
 0x1c5   :  { %v997_v50 = vsel %vm985_vm10, %v980_v61, %v843_v53 }
 0x1c6   :  { %4790 = vmatmul.mubr.msk.f32.gmra.mrb[10].mxu0 %vm1011_vm11, %v997_v50 }
 0x1c7   :  { %v467_v6 = vpop.permute.xlu0 %466 }
 0x1c8   :  { %v465_v35 = vpop.permute.xlu1 %464  ;;  %v899_v53 = vsel %vm11_vm0, %v883_v33, %v467_v6 }
 0x1c9   :  { %v898_v31 = vsel %vm11_vm0, %v882_v1, %v465_v35 }
 0x1cb   :  { %v719_v4 = vpop.permute.xlu0 %718 }
 0x1cc   :  { %v717_v8 = vpop.permute.xlu1 %716  ;;  %v965_v20 = vsel %vm951_vm8, %v948_v32, %v719_v4 }
 0x1cd   :  { %v964_v38 = vsel %vm951_vm8, %v947_v48, %v717_v8 }
 0x1cf   :  { %v531_v46 = vpop.permute.xlu0 %530 }
 0x1d0   :  { %v529_v7 = vpop.permute.xlu1 %528  ;;  %v916_v47 = vsel %vm900_vm5, %v899_v53, %v531_v46 }
 0x1d1   :  { %v915_v39 = vsel %vm900_vm5, %v898_v31, %v529_v7 }
 0x1d3   :  { %v783_v62 = vpop.permute.xlu0 %782 }
 0x1d4   :  { %v781_v42 = vpop.permute.xlu1 %780  ;;  %v982_v44 = vsel %vm968_vm9, %v965_v20, %v783_v62 }
 0x1d5   :  { %v981_v30 = vsel %vm968_vm9, %v964_v38, %v781_v42 }
 0x1d7   :  { %v595_v29 = vpop.permute.xlu0 %594 }
 0x1d8   :  { %v593_v23 = vpop.permute.xlu1 %592  ;;  %v933_v35 = vsel %vm917_vm6, %v916_v47, %v595_v29 }
 0x1d9   :  { %v932_v12 = vsel %vm917_vm6, %v915_v39, %v593_v23 }
 0x1db   :  { %v847_v45 = vpop.permute.xlu0 %846 }
 0x1dc   :  { %v845_v49 = vpop.permute.xlu1 %844  ;;  %v999_v59 = vsel %vm985_vm10, %v982_v44, %v847_v45 }
 0x1dd   :  { %v998_v57 = vsel %vm985_vm10, %v981_v30, %v845_v49 }
 0x1de   :  { %4792 = vmatprep.mubr.msk.f32.mxu0 %vm1011_vm11, %v998_v57 }
 0x1df   :  { %4793 = vmatmul.mubr.msk.f32.gmra.mrb[12].mxu0 %vm1011_vm11, %v999_v59  ;;  %v721_v13 = vpop.permute.xlu0 %720 }
 0x1e0   :  { %v657_v17 = vpop.permute.xlu1 %656 }
 0x1e1   :  { %v949_v3 = vsel %vm934_vm7, %v932_v12, %v657_v17 }
 0x1e2   :  { %v966_v19 = vsel %vm951_vm8, %v949_v3, %v721_v13 }
 0x1e3   :  { %v785_v43 = vpop.permute.xlu0 %784 }
 0x1e4   :  { %v659_v51 = vpop.permute.xlu1 %658  ;;  %v983_v27 = vsel %vm968_vm9, %v966_v19, %v785_v43 }
 0x1e5   :  { %v950_v8 = vsel %vm934_vm7, %v933_v35, %v659_v51 }
 0x1e7   :  { %v849_v61 = vpop.permute.xlu0 %848 }
 0x1e8   :  { %v723_v63 = vpop.permute.xlu1 %722  ;;  %v1000_v37 = vsel %vm985_vm10, %v983_v27, %v849_v61 }
 0x1e9   :  { %4795 = vmatprep.mubr.msk.f32.mxu0 %vm1011_vm11, %v1000_v37  ;;  %v967_v4 = vsel %vm951_vm8, %v950_v8, %v723_v63  ;;  %v2090_v8 = vld [vmem:[%s7462_s1 + $0x24] sm:$0xff] }
 0x1ec   :  { %v787_v50 = vpop.permute.xlu1 %786 }
 0x1ed   :  { %v984_v7 = vsel %vm968_vm9, %v967_v4, %v787_v50  ;;  %v2091_v4 = vld [vmem:[%s7462_s1 + $0x2c] sm:$0xff] }
 0x1f0   :  { %v851_v42 = vpop.permute.xlu1 %850 }
 0x1f1   :  { %v1001_v62 = vsel %vm985_vm10, %v984_v7, %v851_v42  ;;  %v4916_v42 = vpack.c.bf16 %v2091_v4, %v2090_v8 }
 0x1f2   :  { %4796 = vmatmul.mubr.msk.f32.gmra.mrb[14].mxu0 %vm1011_vm11, %v1001_v62 }
 0x1f3   :  { %4917 = vmatprep.subr.bf16.mxu1 %v4916_v42 }
 0x1f4   :  { %4919 = vmatpush3.bf16.msra.mxu1 %v4916_v42 }
 0x1f9   :  { %v4776_v28 = vpop.f32.mrb[0].mxu0 }
 0x1fa   :  { %v1136_v6 = vadd.f32 %v4776_v28, %v5881_v25  ;;  %v1130_v46 = vpop.f32.mrb[1].mxu0  ;;  %v2092_v28 = vld [vmem:[%s7462_s1 + $0x34] sm:$0xff] }
 0x1fb   :  { %v1131_v10 = vadd.f32 %v5881_v25, %v1130_v46 }
 0x1fc   :  { %v1226_v22 = vmul.f32 0.70710677, %v1136_v6  ;;  %v1210_v55 = vmul.f32 0.5, %v1136_v6  ;;  %v2093_v6 = vld [vmem:[%s7462_s1 + $0x3c] sm:$0xff] }
 0x1fd   :  { %v1225_v15 = vmul.f32 0.70710677, %v1131_v10  ;;  %v1209_v29 = vmul.f32 0.5, %v1131_v10  ;;  %v4920_v46 = vpack.c.bf16 %v2093_v6, %v2092_v28  ;;  %v5993_v28 = vpop.permute.xlu1 %1546 }
 0x1fe   :  { %4962 = verf.f32 %v1226_v22  ;;  %v2094_v22 = vld [vmem:[%s7462_s1 + $0x44] sm:$0xf] }
 0x1ff   :  { %4964 = verf.f32 %v1225_v15  ;;  %4921 = vmatprep.subr.bf16.mxu1 %v4920_v46 }
 0x200   :  { %4923 = vmatpush3.bf16.msra.mxu1 %v4920_v46 }
 0x201   :  { %4806 = vmatprep.subr.msk.mxu1 %vm1060_vm4, %v2094_v22 }
 0x204   :  { %4807 = vmatpush3.msk.msra.mxu1 %vm1060_vm4, %v2094_v22 }
 0x208   :  { %v4963_v36 = vpop.eup %4962 }
 0x209   :  { %v4965_v34 = vpop.eup %4964  ;;  %v1258_v23 = vadd.f32 1.0, %v4963_v36 }
 0x20a   :  { %v1257_v40 = vadd.f32 1.0, %v4965_v34 }
 0x20b   :  { %v1274_v41 = vmul.f32 %v1258_v23, %v1210_v55 }
 0x20c   :  { %v1273_v48 = vmul.f32 %v1257_v40, %v1209_v29 }
 0x20d   :  { %1290 = vst.msk [vmem:[#allocation2 + $0x21] sm:$0xff] %vm193_vm3, %v1274_v41 }
 0x20e   :  { %1289 = vst.msk [vmem:[#allocation2 + $0x11] sm:$0xff] %vm193_vm3, %v1273_v48 }
 0x214   :  { %v5887_v32 = vld [vmem:[#allocation2 + $0x20] sm:$0xff] }
 0x215   :  { %v1371_v38 = vld [vmem:[#allocation2 + $0x21] sm:$0xff]  ;;  %1596 = vrot.lane.b32.xlu1 %v5887_v32, %s5095_s25  ;;  %v5896_v59 = vld [vmem:[#allocation2 + $0x10] sm:$0xff] }
 0x216   :  { %1660 = vrot.lane.b32.xlu0 %v1371_v38, %s5096_s20  ;;  %v1387_v20 = vld [vmem:[#allocation2 + $0x22] sm:$0xff]  ;;  %v1370_v17 = vld [vmem:[#allocation2 + $0x11] sm:$0xff] }
 0x217   :  { %v1339_v27 = vld [vmem:[#allocation2 + $0x12] sm:$0xff] }
 0x219   :  { %1470 = vrot.lane.b32.xlu1 %v1371_v38, %s5093_s19  ;;  %v4779_v30 = vpop.f32.mrb[2].mxu0 }
 0x21a   :  { %1724 = vrot.lane.b32.xlu0 %v1387_v20, %s5097_s21  ;;  %v1146_v44 = vadd.f32 %v4779_v30, %v5881_v25  ;;  %v1140_v49 = vpop.f32.mrb[3].mxu0 }
 0x21b   :  { %v1141_v45 = vadd.f32 %v5881_v25, %v1140_v49 }
 0x21c   :  { %v1228_v57 = vmul.f32 0.70710677, %v1146_v44  ;;  %v1212_v39 = vmul.f32 0.5, %v1146_v44 }
 0x21d   :  { %v1227_v1 = vmul.f32 0.70710677, %v1141_v45  ;;  %1534 = vrot.lane.b32.xlu1 %v1387_v20, %s5094_s0  ;;  %v1211_v3 = vmul.f32 0.5, %v1141_v45 }
 0x21e   :  { %1594 = vrot.lane.b32.xlu0 %v5896_v59, %s5095_s25  ;;  %4966 = verf.f32 %v1228_v57 }
 0x21f   :  { %4968 = verf.f32 %v1227_v1 }
 0x221   :  { %1786 = vrot.lane.b32.xlu1 %v5887_v32, %s5098_s27 }
 0x222   :  { %1658 = vrot.lane.b32.xlu0 %v1370_v17, %s5096_s20 }
 0x225   :  { %1850 = vrot.lane.b32.xlu1 %v1371_v38, %s5099_s4 }
 0x228   :  { %v4967_v13 = vpop.eup %4966 }
 0x229   :  { %v4969_v31 = vpop.eup %4968  ;;  %v1260_v12 = vadd.f32 1.0, %v4967_v13  ;;  %1914 = vrot.lane.b32.xlu1 %v1387_v20, %s5100_s7 }
 0x22a   :  { %v1259_v51 = vadd.f32 1.0, %v4969_v31 }
 0x22b   :  { %v1276_v43 = vmul.f32 %v1260_v12, %v1212_v39 }
 0x22c   :  { %v1275_v19 = vmul.f32 %v1259_v51, %v1211_v3 }
 0x22d   :  { %1292 = vst.msk [vmem:[#allocation2 + $0x41] sm:$0xff] %vm193_vm3, %v1276_v43  ;;  %1468 = vrot.lane.b32.xlu1 %v1370_v17, %s5093_s19 }
 0x22e   :  { %1291 = vst.msk [vmem:[#allocation2 + $0x31] sm:$0xff] %vm193_vm3, %v1275_v19 }
 0x231   :  { %1532 = vrot.lane.b32.xlu1 %v1339_v27, %s5094_s0 }
 0x234   :  { %v5910_v63 = vld [vmem:[#allocation2 + $0x40] sm:$0xff] }
 0x235   :  { %1722 = vrot.lane.b32.xlu1 %v1339_v27, %s5097_s21  ;;  %1600 = vrot.lane.b32.xlu0 %v5910_v63, %s5095_s25  ;;  %v1373_v61 = vld [vmem:[#allocation2 + $0x41] sm:$0xff]  ;;  %v1325_v62 = vld [vmem:[#allocation2 + $0x31] sm:$0xff] }
 0x236   :  { %v1342_v35 = vld [vmem:[#allocation2 + $0x42] sm:$0xff]  ;;  %v1341_v10 = vld [vmem:[#allocation2 + $0x32] sm:$0xff] }
 0x237   :  { %v5942_v36 = vld [vmem:[#allocation2 + $0x30] sm:$0xff] }
 0x239   :  { %1664 = vrot.lane.b32.xlu1 %v1373_v61, %s5096_s20  ;;  %1474 = vrot.lane.b32.xlu0 %v1373_v61, %s5093_s19  ;;  %v4782_v37 = vpop.f32.mrb[4].mxu0 }
 0x23a   :  { %v1156_v33 = vadd.f32 %v4782_v37, %v5881_v25  ;;  %v1150_v53 = vpop.f32.mrb[5].mxu0 }
 0x23b   :  { %v1151_v47 = vadd.f32 %v5881_v25, %v1150_v53 }
 0x23c   :  { %v1230_v50 = vmul.f32 0.70710677, %v1156_v33  ;;  %v1214_v55 = vmul.f32 0.5, %v1156_v33  ;;  %v5983_v33 = vpop.permute.xlu0 %1466 }
 0x23d   :  { %v1229_v7 = vmul.f32 0.70710677, %v1151_v47  ;;  %1538 = vrot.lane.b32.xlu1 %v1342_v35, %s5094_s0  ;;  %1728 = vrot.lane.b32.xlu0 %v1342_v35, %s5097_s21  ;;  %v1213_v29 = vmul.f32 0.5, %v1151_v47 }
 0x23e   :  { %4970 = verf.f32 %v1230_v50 }
 0x23f   :  { %4972 = verf.f32 %v1229_v7 }
 0x240   :  { %v5987_v8 = vpop.permute.xlu0 %1530 }
 0x241   :  { %1790 = vrot.lane.b32.xlu1 %v5910_v63, %s5098_s27  ;;  %1472 = vrot.lane.b32.xlu0 %v1325_v62, %s5093_s19 }
 0x245   :  { %1854 = vrot.lane.b32.xlu1 %v1373_v61, %s5099_s4  ;;  %1536 = vrot.lane.b32.xlu0 %v1341_v10, %s5094_s0 }
 0x248   :  { %v4971_v15 = vpop.eup %4970 }
 0x249   :  { %v4973_v34 = vpop.eup %4972  ;;  %v1262_v23 = vadd.f32 1.0, %v4971_v15  ;;  %1918 = vrot.lane.b32.xlu1 %v1342_v35, %s5100_s7  ;;  %1788 = vrot.lane.b32.xlu0 %v5942_v36, %s5098_s27  ;;  %v6001_v15 = vpop.permute.xlu1 %1928 }
 0x24a   :  { %v1261_v40 = vadd.f32 1.0, %v4973_v34 }
 0x24b   :  { %v1278_v41 = vmul.f32 %v1262_v23, %v1214_v55 }
 0x24c   :  { %v1277_v48 = vmul.f32 %v1261_v40, %v1213_v29 }
 0x24d   :  { %1294 = vst.msk [vmem:[#allocation2 + $0x61] sm:$0xff] %vm193_vm3, %v1278_v41  ;;  %1598 = vrot.lane.b32.xlu1 %v5942_v36, %s5095_s25  ;;  %1852 = vrot.lane.b32.xlu0 %v1325_v62, %s5099_s4 }
 0x24e   :  { %1293 = vst.msk [vmem:[#allocation2 + $0x51] sm:$0xff] %vm193_vm3, %v1277_v48 }
 0x251   :  { %1662 = vrot.lane.b32.xlu1 %v1325_v62, %s5096_s20  ;;  %1726 = vrot.lane.b32.xlu0 %v1341_v10, %s5097_s21 }
 0x254   :  { %v5955_v38 = vld [vmem:[#allocation2 + $0x60] sm:$0xff] }
 0x255   :  { %1916 = vrot.lane.b32.xlu1 %v1341_v10, %s5100_s7  ;;  %1604 = vrot.lane.b32.xlu0 %v5955_v38, %s5095_s25  ;;  %v1375_v20 = vld [vmem:[#allocation2 + $0x61] sm:$0xff]  ;;  %v1327_v13 = vld [vmem:[#allocation2 + $0x51] sm:$0xff]  ;;  %v5997_v10 = vpop.permute.xlu0 %1482 }
 0x256   :  { %v1344_v17 = vld [vmem:[#allocation2 + $0x62] sm:$0xff]  ;;  %v1343_v31 = vld [vmem:[#allocation2 + $0x52] sm:$0xff] }
 0x257   :  { %v5971_v43 = vld [vmem:[#allocation2 + $0x50] sm:$0xff] }
 0x259   :  { %v4785_v30 = vpop.f32.mrb[6].mxu0  ;;  %1668 = vrot.lane.b32.xlu1 %v1375_v20, %s5096_s20  ;;  %1478 = vrot.lane.b32.xlu0 %v1375_v20, %s5093_s19  ;;  %v6005_v55 = vpop.permute.xlu0 %1800 }
 0x25a   :  { %v1166_v44 = vadd.f32 %v4785_v30, %v5881_v25  ;;  %v1160_v49 = vpop.f32.mrb[7].mxu0 }
 0x25b   :  { %v1161_v45 = vadd.f32 %v5881_v25, %v1160_v49 }
 0x25c   :  { %v1232_v57 = vmul.f32 0.70710677, %v1166_v44  ;;  %v1216_v3 = vmul.f32 0.5, %v1166_v44 }
 0x25d   :  { %v1231_v1 = vmul.f32 0.70710677, %v1161_v45  ;;  %1542 = vrot.lane.b32.xlu1 %v1344_v17, %s5094_s0  ;;  %1732 = vrot.lane.b32.xlu0 %v1344_v17, %s5097_s21  ;;  %v1215_v19 = vmul.f32 0.5, %v1161_v45  ;;  %v6015_v45 = vpop.permute.xlu0 %1864 }
 0x25e   :  { %4974 = verf.f32 %v1232_v57 }
 0x25f   :  { %4976 = verf.f32 %v1231_v1 }
 0x261   :  { %1794 = vrot.lane.b32.xlu1 %v5955_v38, %s5098_s27  ;;  %1476 = vrot.lane.b32.xlu0 %v1327_v13, %s5093_s19 }
 0x265   :  { %1858 = vrot.lane.b32.xlu1 %v1375_v20, %s5099_s4  ;;  %1540 = vrot.lane.b32.xlu0 %v1343_v31, %s5094_s0 }
 0x268   :  { %v4975_v39 = vpop.eup %4974 }
 0x269   :  { %v4977_v12 = vpop.eup %4976  ;;  %v1264_v51 = vadd.f32 1.0, %v4975_v39  ;;  %1922 = vrot.lane.b32.xlu1 %v1344_v17, %s5100_s7  ;;  %1792 = vrot.lane.b32.xlu0 %v5971_v43, %s5098_s27 }
 0x26a   :  { %v1263_v27 = vadd.f32 1.0, %v4977_v12 }
 0x26b   :  { %v1280_v61 = vmul.f32 %v1264_v51, %v1216_v3 }
 0x26c   :  { %v1279_v37 = vmul.f32 %v1263_v27, %v1215_v19 }
 0x26d   :  { %1296 = vst.msk [vmem:[#allocation2 + $0x81] sm:$0xff] %vm193_vm3, %v1280_v61  ;;  %1602 = vrot.lane.b32.xlu1 %v5971_v43, %s5095_s25  ;;  %1856 = vrot.lane.b32.xlu0 %v1327_v13, %s5099_s4 }
 0x26e   :  { %1295 = vst.msk [vmem:[#allocation2 + $0x71] sm:$0xff] %vm193_vm3, %v1279_v37 }
 0x271   :  { %1666 = vrot.lane.b32.xlu1 %v1327_v13, %s5096_s20  ;;  %1730 = vrot.lane.b32.xlu0 %v1343_v31, %s5097_s21 }
 0x274   :  { %v1361_v53 = vld [vmem:[#allocation2 + $0x80] sm:$0xff] }
 0x275   :  { %1920 = vrot.lane.b32.xlu1 %v1343_v31, %s5100_s7  ;;  %1608 = vrot.lane.b32.xlu0 %v1361_v53, %s5095_s25  ;;  %v1377_v47 = vld [vmem:[#allocation2 + $0x81] sm:$0xff]  ;;  %v1329_v46 = vld [vmem:[#allocation2 + $0x71] sm:$0xff] }
 0x276   :  { %v1393_v50 = vld [vmem:[#allocation2 + $0x82] sm:$0xff]  ;;  %v1345_v22 = vld [vmem:[#allocation2 + $0x72] sm:$0xff] }
 0x277   :  { %v6003_v34 = vld [vmem:[#allocation2 + $0x70] sm:$0xff] }
 0x279   :  { %v4788_v35 = vpop.f32.mrb[8].mxu0  ;;  %1672 = vrot.lane.b32.xlu1 %v1377_v47, %s5096_s20  ;;  %1736 = vrot.lane.b32.xlu0 %v1393_v50, %s5097_s21 }
 0x27a   :  { %v1176_v4 = vadd.f32 %v4788_v35, %v5881_v25  ;;  %v1170_v7 = vpop.f32.mrb[9].mxu0  ;;  %v1306_v35 = vld [vmem:[#allocation2] sm:$0xff] }
 0x27b   :  { %v1171_v42 = vadd.f32 %v5881_v25, %v1170_v7 }
 0x27c   :  { %v1234_v62 = vmul.f32 0.70710677, %v1176_v4  ;;  %v1218_v41 = vmul.f32 0.5, %v1176_v4 }
 0x27d   :  { %v1233_v6 = vmul.f32 0.70710677, %v1171_v42  ;;  %1798 = vrot.lane.b32.xlu1 %v1361_v53, %s5098_s27  ;;  %1480 = vrot.lane.b32.xlu0 %v1329_v46, %s5093_s19  ;;  %v1217_v20 = vmul.f32 0.5, %v1171_v42 }
 0x27e   :  { %4978 = verf.f32 %v1234_v62  ;;  %v1962_v62 = vsel %vm193_vm3, %v1306_v35, %v5983_v33 }
 0x27f   :  { %4980 = verf.f32 %v1233_v6  ;;  %v1978_v6 = vsel %vm11_vm0, %v1962_v62, %v5987_v8 }
 0x281   :  { %1862 = vrot.lane.b32.xlu1 %v1377_v47, %s5099_s4  ;;  %1544 = vrot.lane.b32.xlu0 %v1345_v22, %s5094_s0 }
 0x285   :  { %1926 = vrot.lane.b32.xlu1 %v1393_v50, %s5100_s7  ;;  %1796 = vrot.lane.b32.xlu0 %v6003_v34, %s5098_s27 }
 0x287   :  { %v6010_v29 = vpop.permute.xlu1 %1596 }
 0x288   :  { %v4979_v23 = vpop.eup %4978  ;;  %v6025_v17 = vpop.permute.xlu0 %1660 }
 0x289   :  { %v4981_v40 = vpop.eup %4980  ;;  %v1266_v48 = vadd.f32 1.0, %v4979_v23  ;;  %1606 = vrot.lane.b32.xlu1 %v6003_v34, %s5095_s25  ;;  %1860 = vrot.lane.b32.xlu0 %v1329_v46, %s5099_s4 }
 0x28a   :  { %v1265_v30 = vadd.f32 1.0, %v4981_v40 }
 0x28b   :  { %v1282_v44 = vmul.f32 %v1266_v48, %v1218_v41  ;;  %v6017_v57 = vpop.permute.xlu1 %1470 }
 0x28c   :  { %v1281_v49 = vmul.f32 %v1265_v30, %v1217_v20  ;;  %v6033_v12 = vpop.permute.xlu0 %1724 }
 0x28d   :  { %1298 = vst.msk [vmem:[#allocation2 + $0xc1] sm:$0xff] %vm193_vm3, %v1282_v44  ;;  %1670 = vrot.lane.b32.xlu1 %v1329_v46, %s5096_s20  ;;  %1734 = vrot.lane.b32.xlu0 %v1345_v22, %s5097_s21 }
 0x28e   :  { %1297 = vst.msk [vmem:[#allocation2 + $0xb1] sm:$0xff] %vm193_vm3, %v1281_v49 }
 0x28f   :  { %v6023_v1 = vpop.permute.xlu1 %1534 }
 0x290   :  { %v1595_v4 = vpop.permute.xlu0 %1594 }
 0x291   :  { %1924 = vrot.lane.b32.xlu1 %v1345_v22, %s5100_s7  ;;  %v1994_v40 = vsel %vm900_vm5, %v1978_v6, %v1595_v4 }
 0x293   :  { %v1787_v13 = vpop.permute.xlu1 %1786 }
 0x294   :  { %v1379_v31 = vld [vmem:[#allocation2 + $0xc1] sm:$0xff]  ;;  %v1659_v46 = vpop.permute.xlu0 %1658 }
 0x295   :  { %v6028_v39 = vld [vmem:[#allocation2 + $0xc0] sm:$0xff]  ;;  %1676 = vrot.lane.b32.xlu1 %v1379_v31, %s5096_s20  ;;  %v1331_v42 = vld [vmem:[#allocation2 + $0xb1] sm:$0xff]  ;;  %v2010_v48 = vsel %vm917_vm6, %v1994_v40, %v1659_v46 }
 0x296   :  { %1612 = vrot.lane.b32.xlu0 %v6028_v39, %s5095_s25  ;;  %v1348_v51 = vld [vmem:[#allocation2 + $0xc2] sm:$0xff]  ;;  %v1347_v23 = vld [vmem:[#allocation2 + $0xb2] sm:$0xff] }
 0x297   :  { %v1851_v3 = vpop.permute.xlu1 %1850 }
 0x299   :  { %v4791_v19 = vpop.f32.mrb[10].mxu0  ;;  %1550 = vrot.lane.b32.xlu1 %v1348_v51, %s5094_s0 }
 0x29a   :  { %1486 = vrot.lane.b32.xlu0 %v1379_v31, %s5093_s19  ;;  %v1186_v27 = vadd.f32 %v4791_v19, %v5881_v25  ;;  %v1180_v61 = vpop.f32.mrb[11].mxu0 }
 0x29b   :  { %v1181_v37 = vadd.f32 %v5881_v25, %v1180_v61  ;;  %v1915_v47 = vpop.permute.xlu1 %1914 }
 0x29c   :  { %v1236_v53 = vmul.f32 0.70710677, %v1186_v27  ;;  %v1220_v44 = vmul.f32 0.5, %v1186_v27 }
 0x29d   :  { %v1235_v50 = vmul.f32 0.70710677, %v1181_v37  ;;  %1802 = vrot.lane.b32.xlu1 %v6028_v39, %s5098_s27  ;;  %v1219_v19 = vmul.f32 0.5, %v1181_v37 }
 0x29e   :  { %1740 = vrot.lane.b32.xlu0 %v1348_v51, %s5097_s21  ;;  %4982 = verf.f32 %v1236_v53 }
 0x29f   :  { %4984 = verf.f32 %v1235_v50  ;;  %v1469_v7 = vpop.permute.xlu1 %1468 }
 0x2a1   :  { %1866 = vrot.lane.b32.xlu1 %v1379_v31, %s5099_s4  ;;  %v6055_v31 = vld [vmem:[#allocation2 + $0xb0] sm:$0xff] }
 0x2a2   :  { %1484 = vrot.lane.b32.xlu0 %v1331_v42, %s5093_s19 }
 0x2a3   :  { %v1533_v22 = vpop.permute.xlu1 %1532 }
 0x2a5   :  { %1930 = vrot.lane.b32.xlu1 %v1348_v51, %s5100_s7 }
 0x2a6   :  { %1548 = vrot.lane.b32.xlu0 %v1347_v23, %s5094_s0 }
 0x2a7   :  { %v1723_v33 = vpop.permute.xlu1 %1722  ;;  %v6052_v20 = vpop.permute.xlu0 %1600 }
 0x2a8   :  { %v4983_v41 = vpop.eup %4982  ;;  %v2026_v8 = vsel %vm934_vm7, %v2010_v48, %v1723_v33 }
 0x2a9   :  { %v4985_v30 = vpop.eup %4984  ;;  %v1268_v49 = vadd.f32 1.0, %v4983_v41  ;;  %v2042_v51 = vsel %vm951_vm8, %v2026_v8, %v1787_v13  ;;  %1610 = vrot.lane.b32.xlu1 %v6055_v31, %s5095_s25  ;;  %v1963_v8 = vsel %vm193_vm3, %v5896_v59, %v1469_v7  ;;  %v1964_v7 = vsel %vm193_vm3, %v5887_v32, %v6017_v57 }
 0x2aa   :  { %1738 = vrot.lane.b32.xlu0 %v1347_v23, %s5097_s21  ;;  %v1267_v61 = vadd.f32 1.0, %v4985_v30  ;;  %v2058_v50 = vsel %vm968_vm9, %v2042_v51, %v1851_v3  ;;  %v1979_v51 = vsel %vm11_vm0, %v1963_v8, %v1533_v22 }
 0x2ab   :  { %v1284_v53 = vmul.f32 %v1268_v49, %v1220_v44  ;;  %v6062_v4 = vpop.permute.xlu1 %1664  ;;  %v6064_v27 = vpop.permute.xlu0 %1474  ;;  %v2074_v62 = vsel %vm985_vm10, %v2058_v50, %v1915_v47 }
 0x2ac   :  { %v1283_v35 = vmul.f32 %v1267_v61, %v1219_v19  ;;  %4808 = vmatprep.mubr.msk.f32.mxu1 %vm1011_vm11, %v2074_v62 }
 0x2ad   :  { %1300 = vst.msk [vmem:[#allocation2 + $0xe1] sm:$0xff] %vm193_vm3, %v1284_v53  ;;  %1674 = vrot.lane.b32.xlu1 %v1331_v42, %s5096_s20  ;;  %v1995_v53 = vsel %vm900_vm5, %v1979_v51, %v6010_v29 }
 0x2ae   :  { %1299 = vst.msk [vmem:[#allocation2 + $0xd1] sm:$0xff] %vm193_vm3, %v1283_v35  ;;  %v2011_v8 = vsel %vm917_vm6, %v1995_v53, %v6025_v17 }
 0x2af   :  { %v6071_v13 = vpop.permute.xlu1 %1538  ;;  %v6073_v37 = vpop.permute.xlu0 %1728  ;;  %v2027_v57 = vsel %vm934_vm7, %v2011_v8, %v6033_v12 }
 0x2b2   :  { %v4794_v3 = vpop.f32.mrb[12].mxu0 }
 0x2b3   :  { %v1196_v6 = vadd.f32 %v4794_v3, %v5881_v25  ;;  %v1190_v46 = vpop.f32.mrb[13].mxu0  ;;  %v1791_v23 = vpop.permute.xlu1 %1790 }
 0x2b4   :  { %v1191_v40 = vadd.f32 %v5881_v25, %v1190_v46  ;;  %v6077_v47 = vpop.permute.xlu0 %1472  ;;  %v1381_v41 = vld [vmem:[#allocation2 + $0xe1] sm:$0xff] }
 0x2b5   :  { %v6079_v48 = vld [vmem:[#allocation2 + $0xe0] sm:$0xff]  ;;  %v1238_v33 = vmul.f32 0.70710677, %v1196_v6  ;;  %1680 = vrot.lane.b32.xlu1 %v1381_v41, %s5096_s20  ;;  %v1333_v62 = vld [vmem:[#allocation2 + $0xd1] sm:$0xff]  ;;  %v1222_v22 = vmul.f32 0.5, %v1196_v6 }
 0x2b6   :  { %1616 = vrot.lane.b32.xlu0 %v6079_v48, %s5095_s25  ;;  %v1237_v42 = vmul.f32 0.70710677, %v1191_v40  ;;  %v1350_v49 = vld [vmem:[#allocation2 + $0xe2] sm:$0xff]  ;;  %v1349_v18 = vld [vmem:[#allocation2 + $0xd2] sm:$0xff] }
 0x2b7   :  { %4986 = verf.f32 %v1238_v33  ;;  %v1855_v30 = vpop.permute.xlu1 %1854  ;;  %v1980_v33 = vsel %vm11_vm0, %v1964_v7, %v6023_v1  ;;  %v6121_v12 = vld [vmem:[#allocation2 + $0xd0] sm:$0xff] }
 0x2b8   :  { %4988 = verf.f32 %v1237_v42  ;;  %v6084_v44 = vpop.permute.xlu0 %1536  ;;  %v1221_v42 = vmul.f32 0.5, %v1191_v40 }
 0x2b9   :  { %1554 = vrot.lane.b32.xlu1 %v1350_v49, %s5094_s0 }
 0x2ba   :  { %1490 = vrot.lane.b32.xlu0 %v1381_v41, %s5093_s19 }
 0x2bb   :  { %v1919_v19 = vpop.permute.xlu1 %1918 }
 0x2bc   :  { %v1789_v61 = vpop.permute.xlu0 %1788 }
 0x2bd   :  { %1806 = vrot.lane.b32.xlu1 %v6079_v48, %s5098_s27  ;;  %v2043_v40 = vsel %vm951_vm8, %v2027_v57, %v1789_v61 }
 0x2be   :  { %1744 = vrot.lane.b32.xlu0 %v1350_v49, %s5097_s21 }
 0x2bf   :  { %v1599_v50 = vpop.permute.xlu1 %1598 }
 0x2c0   :  { %v1853_v35 = vpop.permute.xlu0 %1852 }
 0x2c1   :  { %v4987_v3 = vpop.eup %4986  ;;  %1870 = vrot.lane.b32.xlu1 %v1381_v41, %s5099_s4  ;;  %v1996_v41 = vsel %vm900_vm5, %v1980_v33, %v1599_v50  ;;  %v2059_v53 = vsel %vm968_vm9, %v2043_v40, %v1853_v35 }
 0x2c2   :  { %1488 = vrot.lane.b32.xlu0 %v1333_v62, %s5093_s19  ;;  %v4989_v59 = vpop.eup %4988  ;;  %v1270_v46 = vadd.f32 1.0, %v4987_v3 }
 0x2c3   :  { %v1269_v29 = vadd.f32 1.0, %v4989_v59  ;;  %v1663_v24 = vpop.permute.xlu1 %1662 }
 0x2c4   :  { %v1286_v51 = vmul.f32 %v1270_v46, %v1222_v22  ;;  %v1727_v26 = vpop.permute.xlu0 %1726  ;;  %v2012_v14 = vsel %vm917_vm6, %v1996_v41, %v1663_v24 }
 0x2c5   :  { %v1285_v21 = vmul.f32 %v1269_v29, %v1221_v42  ;;  %1934 = vrot.lane.b32.xlu1 %v1350_v49, %s5100_s7  ;;  %v4797_v32 = vpop.f32.mrb[14].mxu0  ;;  %v2028_v1 = vsel %vm934_vm7, %v2012_v14, %v1727_v26 }
 0x2c6   :  { %1552 = vrot.lane.b32.xlu0 %v1349_v18, %s5094_s0  ;;  %1302 = vst.msk [vmem:[#allocation2 + $0x101] sm:$0xff] %vm193_vm3, %v1286_v51  ;;  %v1206_v17 = vadd.f32 %v4797_v32, %v5881_v25  ;;  %v1200_v6 = vpop.f32.mrb[15].mxu0  ;;  %v2044_v24 = vsel %vm951_vm8, %v2028_v1, %v1791_v23 }
 0x2c7   :  { %1301 = vst.msk [vmem:[#allocation2 + $0xf1] sm:$0xff] %vm193_vm3, %v1285_v21  ;;  %v1201_v49 = vadd.f32 %v5881_v25, %v1200_v6  ;;  %v1917_v3 = vpop.permute.xlu1 %1916  ;;  %v2060_v14 = vsel %vm968_vm9, %v2044_v24, %v1855_v30 }
 0x2c8   :  { %v1240_v50 = vmul.f32 0.70710677, %v1206_v17  ;;  %v6119_v59 = vpop.permute.xlu0 %1604  ;;  %v2075_v7 = vsel %vm985_vm10, %v2059_v53, %v1917_v3  ;;  %v2076_v21 = vsel %vm985_vm10, %v2060_v14, %v1919_v19  ;;  %v1224_v29 = vmul.f32 0.5, %v1206_v17 }
 0x2c9   :  { %v1239_v26 = vmul.f32 0.70710677, %v1201_v49  ;;  %1614 = vrot.lane.b32.xlu1 %v6121_v12, %s5095_s25  ;;  %4809 = vmatmul.mubr.msk.f32.vlgmr.msra.gmra.mrb[0].mxu1 %vm1011_vm11, %v2075_v7  ;;  %v1965_v17 = vsel %vm193_vm3, %v5942_v36, %v6077_v47  ;;  %v1966_v36 = vsel %vm193_vm3, %v5910_v63, %v6064_v27 }
 0x2ca   :  { %1804 = vrot.lane.b32.xlu0 %v6121_v12, %s5098_s27  ;;  %4990 = verf.f32 %v1240_v50  ;;  %4811 = vmatprep.mubr.msk.f32.mxu1 %vm1011_vm11, %v2076_v21  ;;  %v1981_v24 = vsel %vm11_vm0, %v1965_v17, %v6084_v44  ;;  %v1982_v47 = vsel %vm11_vm0, %v1966_v36, %v6071_v13 }
 0x2cb   :  { %4992 = verf.f32 %v1239_v26  ;;  %v6132_v25 = vpop.permute.xlu1 %1668 }
 0x2cc   :  { %v6134_v23 = vpop.permute.xlu0 %1478 }
 0x2cd   :  { %1678 = vrot.lane.b32.xlu1 %v1333_v62, %s5096_s20  ;;  %v1383_v46 = vld [vmem:[#allocation2 + $0x101] sm:$0xff] }
 0x2ce   :  { %1868 = vrot.lane.b32.xlu0 %v1333_v62, %s5099_s4  ;;  %v6146_v33 = vld [vmem:[#allocation2 + $0x100] sm:$0xff]  ;;  %v1223_v62 = vmul.f32 0.5, %v1201_v49  ;;  %v1997_v49 = vsel %vm900_vm5, %v1981_v24, %v6052_v20  ;;  %v1335_v3 = vld [vmem:[#allocation2 + $0xf1] sm:$0xff] }
 0x2cf   :  { %v6138_v30 = vpop.permute.xlu1 %1542  ;;  %v1352_v1 = vld [vmem:[#allocation2 + $0x102] sm:$0xff]  ;;  %v2013_v44 = vsel %vm917_vm6, %v1997_v49, %v6062_v4  ;;  %v1351_v7 = vld [vmem:[#allocation2 + $0xf2] sm:$0xff] }
 0x2d0   :  { %v6140_v61 = vpop.permute.xlu0 %1732  ;;  %v2029_v63 = vsel %vm934_vm7, %v2013_v44, %v6073_v37 }
 0x2d1   :  { %1932 = vrot.lane.b32.xlu1 %v1349_v18, %s5100_s7 }
 0x2d2   :  { %1742 = vrot.lane.b32.xlu0 %v1349_v18, %s5097_s21 }
 0x2d3   :  { %v1795_v35 = vpop.permute.xlu1 %1794 }
 0x2d4   :  { %v4991_v19 = vpop.eup %4990  ;;  %v6144_v22 = vpop.permute.xlu0 %1476 }
 0x2d5   :  { %v4993_v42 = vpop.eup %4992  ;;  %v1272_v8 = vadd.f32 1.0, %v4991_v19  ;;  %1684 = vrot.lane.b32.xlu1 %v1383_v46, %s5096_s20  ;;  %v1967_v49 = vsel %vm193_vm3, %v5971_v43, %v6144_v22  ;;  %v1968_v22 = vsel %vm193_vm3, %v5955_v38, %v6134_v23 }
 0x2d6   :  { %1620 = vrot.lane.b32.xlu0 %v6146_v33, %s5095_s25  ;;  %v1271_v51 = vadd.f32 1.0, %v4993_v42 }
 0x2d7   :  { %v1288_v41 = vmul.f32 %v1272_v8, %v1224_v29  ;;  %v1859_v18 = vpop.permute.xlu1 %1858  ;;  %v6186_v29 = vld [vmem:[#allocation2 + $0xf0] sm:$0xff] }
 0x2d8   :  { %v1287_v32 = vmul.f32 %v1271_v51, %v1223_v62  ;;  %v6151_v57 = vpop.permute.xlu0 %1540 }
 0x2d9   :  { %1304 = vst.msk [vmem:[#allocation2 + $0x121] sm:$0xff] %vm193_vm3, %v1288_v41  ;;  %1558 = vrot.lane.b32.xlu1 %v1352_v1, %s5094_s0  ;;  %v1983_v36 = vsel %vm11_vm0, %v1967_v49, %v6151_v57  ;;  %v1984_v57 = vsel %vm11_vm0, %v1968_v22, %v6138_v30 }
 0x2da   :  { %1494 = vrot.lane.b32.xlu0 %v1383_v46, %s5093_s19  ;;  %1303 = vst.msk [vmem:[#allocation2 + $0x111] sm:$0xff] %vm193_vm3, %v1287_v32 }
 0x2db   :  { %v1923_v6 = vpop.permute.xlu1 %1922 }
 0x2dc   :  { %v1793_v40 = vpop.permute.xlu0 %1792 }
 0x2dd   :  { %1810 = vrot.lane.b32.xlu1 %v6146_v33, %s5098_s27  ;;  %v2045_v13 = vsel %vm951_vm8, %v2029_v63, %v1793_v40 }
 0x2de   :  { %1748 = vrot.lane.b32.xlu0 %v1352_v1, %s5097_s21 }
 0x2df   :  { %v1603_v53 = vpop.permute.xlu1 %1602 }
 0x2e0   :  { %v1857_v50 = vpop.permute.xlu0 %1856  ;;  %v1998_v14 = vsel %vm900_vm5, %v1982_v47, %v1603_v53 }
 0x2e1   :  { %1874 = vrot.lane.b32.xlu1 %v1383_v46, %s5099_s4  ;;  %v2061_v19 = vsel %vm968_vm9, %v2045_v13, %v1857_v50  ;;  %v6201_v17 = vld [vmem:[#allocation2 + $0x110] sm:$0xff] }
 0x2e2   :  { %1492 = vrot.lane.b32.xlu0 %v1335_v3, %s5093_s19 }
 0x2e3   :  { %v1667_v20 = vpop.permute.xlu1 %1666 }
 0x2e4   :  { %v1731_v26 = vpop.permute.xlu0 %1730  ;;  %v2014_v21 = vsel %vm917_vm6, %v1998_v14, %v1667_v20  ;;  %v1400_v20 = vld [vmem:[#allocation2 + $0x112] sm:$0xff] }
 0x2e5   :  { %1938 = vrot.lane.b32.xlu1 %v1352_v1, %s5100_s7  ;;  %v2030_v27 = vsel %vm934_vm7, %v2014_v21, %v1731_v26 }
 0x2e6   :  { %1556 = vrot.lane.b32.xlu0 %v1351_v7, %s5094_s0  ;;  %v2046_v4 = vsel %vm951_vm8, %v2030_v27, %v1795_v35  ;;  %v1401_v27 = vld [vmem:[#allocation2 + $0x122] sm:$0xff] }
 0x2e7   :  { %v1921_v46 = vpop.permute.xlu1 %1920  ;;  %v2062_v8 = vsel %vm968_vm9, %v2046_v4, %v1859_v18 }
 0x2e8   :  { %v1609_v42 = vpop.permute.xlu0 %1608  ;;  %v2077_v62 = vsel %vm985_vm10, %v2061_v19, %v1921_v46  ;;  %v2078_v37 = vsel %vm985_vm10, %v2062_v8, %v1923_v6  ;;  %v1369_v6 = vld [vmem:[#allocation2 + $0x120] sm:$0xff] }
 0x2e9   :  { %1618 = vrot.lane.b32.xlu1 %v6186_v29, %s5095_s25  ;;  %4812 = vmatmul.mubr.msk.f32.gmra.mrb[2].mxu1 %vm1011_vm11, %v2077_v62 }
 0x2ea   :  { %1808 = vrot.lane.b32.xlu0 %v6186_v29, %s5098_s27  ;;  %4814 = vmatprep.mubr.msk.f32.mxu1 %vm1011_vm11, %v2078_v37  ;;  %v1433_v37 = vld [vmem:[#allocation2 + $0x131] sm:$0xff] }
 0x2eb   :  { %v1673_v35 = vpop.permute.xlu1 %1672 }
 0x2ec   :  { %v1737_v51 = vpop.permute.xlu0 %1736 }
 0x2ed   :  { %1682 = vrot.lane.b32.xlu1 %v1335_v3, %s5096_s20 }
 0x2ee   :  { %1872 = vrot.lane.b32.xlu0 %v1335_v3, %s5099_s4  ;;  %v1384_v3 = vld [vmem:[#allocation2 + $0x111] sm:$0xff] }
 0x2ef   :  { %v1799_v41 = vpop.permute.xlu1 %1798 }
 0x2f0   :  { %v1481_v32 = vpop.permute.xlu0 %1480 }
 0x2f1   :  { %1936 = vrot.lane.b32.xlu1 %v1351_v7, %s5100_s7  ;;  %v1969_v40 = vsel %vm193_vm3, %v6003_v34, %v1481_v32  ;;  %v1999_v34 = vsel %vm900_vm5, %v1983_v36, %v6119_v59 }
 0x2f2   :  { %1746 = vrot.lane.b32.xlu0 %v1351_v7, %s5097_s21  ;;  %v2015_v26 = vsel %vm917_vm6, %v1999_v34, %v6132_v25  ;;  %v6238_v25 = vld [vmem:[#allocation2 + $0x130] sm:$0xff] }
 0x2f3   :  { %v1863_v18 = vpop.permute.xlu1 %1862  ;;  %v2031_v38 = vsel %vm934_vm7, %v2015_v26, %v6140_v61 }
 0x2f4   :  { %v1545_v1 = vpop.permute.xlu0 %1544 }
 0x2f5   :  { %1622 = vrot.lane.b32.xlu1 %v6201_v17, %s5095_s25  ;;  %v1985_v24 = vsel %vm11_vm0, %v1969_v40, %v1545_v1 }
 0x2f6   :  { %1624 = vrot.lane.b32.xlu0 %v1369_v6, %s5095_s25  ;;  %v2001_v47 = vsel %vm900_vm5, %v1985_v24, %v1609_v42 }
 0x2f7   :  { %v1927_v53 = vpop.permute.xlu1 %1926  ;;  %v2017_v43 = vsel %vm917_vm6, %v2001_v47, %v1673_v35 }
 0x2f8   :  { %v1797_v50 = vpop.permute.xlu0 %1796  ;;  %v2033_v59 = vsel %vm934_vm7, %v2017_v43, %v1737_v51 }
 0x2f9   :  { %1686 = vrot.lane.b32.xlu1 %v1384_v3, %s5096_s20  ;;  %v2047_v30 = vsel %vm951_vm8, %v2031_v38, %v1797_v50  ;;  %v2049_v19 = vsel %vm951_vm8, %v2033_v59, %v6005_v55  ;;  %v2424_v59 = vld [vmem:[#allocation2 + $0x1] sm:$0xff]  ;;  %v2543_v38 = vld [vmem:[#allocation2 + $0x92] sm:$0xff] }
 0x2fa   :  { %1496 = vrot.lane.b32.xlu0 %v1384_v3, %s5093_s19  ;;  %v2065_v55 = vsel %vm968_vm9, %v2049_v19, %v6015_v45 }
 0x2fb   :  { %v1607_v44 = vpop.permute.xlu1 %1606  ;;  %v2081_v32 = vsel %vm985_vm10, %v2065_v55, %v6001_v15 }
 0x2fc   :  { %v1861_v14 = vpop.permute.xlu0 %1860  ;;  %v2000_v7 = vsel %vm900_vm5, %v1984_v57, %v1607_v44 }
 0x2fd   :  { %1750 = vrot.lane.b32.xlu1 %v1400_v20, %s5097_s21  ;;  %v2063_v46 = vsel %vm968_vm9, %v2047_v30, %v1861_v14 }
 0x2fe   :  { %1560 = vrot.lane.b32.xlu0 %v1400_v20, %s5094_s0 }
 0x2ff   :  { %v1671_v21 = vpop.permute.xlu1 %1670 }
 0x300   :  { %v1735_v63 = vpop.permute.xlu0 %1734  ;;  %v2016_v13 = vsel %vm917_vm6, %v2000_v7, %v1671_v21  ;;  %v2440_v7 = vld [vmem:[#allocation2 + $0x2] sm:$0xff] }
 0x301   :  { %1752 = vrot.lane.b32.xlu1 %v1401_v27, %s5097_s21  ;;  %v2032_v23 = vsel %vm934_vm7, %v2016_v13, %v1735_v63  ;;  %v2448_v21 = vld [vmem:[#allocation2 + $0xa2] sm:$0xff] }
 0x302   :  { %1812 = vrot.lane.b32.xlu0 %v6201_v17, %s5098_s27  ;;  %v2048_v4 = vsel %vm951_vm8, %v2032_v23, %v1799_v41  ;;  %v1385_v41 = vld [vmem:[#allocation2 + $0x121] sm:$0xff] }
 0x303   :  { %v1925_v42 = vpop.permute.xlu1 %1924  ;;  %v2064_v8 = vsel %vm968_vm9, %v2048_v4, %v1863_v18  ;;  %v1449_v18 = vld [vmem:[#allocation2 + $0x132] sm:$0xff]  ;;  %v2432_v13 = vld [vmem:[#allocation2 + $0xa1] sm:$0xff] }
 0x304   :  { %v2079_v62 = vsel %vm985_vm10, %v2063_v46, %v1925_v42  ;;  %v2080_v61 = vsel %vm985_vm10, %v2064_v8, %v1927_v53  ;;  %v2511_v4 = vld [vmem:[#allocation2 + $0x90] sm:$0xff] }
 0x305   :  { %1816 = vrot.lane.b32.xlu1 %v6238_v25, %s5098_s27  ;;  %4815 = vmatmul.mubr.msk.f32.gmra.mrb[4].mxu1 %vm1011_vm11, %v2079_v62  ;;  %v2527_v42 = vld [vmem:[#allocation2 + $0x91] sm:$0xff] }
 0x306   :  { %1876 = vrot.lane.b32.xlu0 %v1384_v3, %s5099_s4  ;;  %4817 = vmatprep.mubr.msk.f32.mxu1 %vm1011_vm11, %v2080_v61  ;;  %v5090_v3 = vld [vmem:[#allocation2 + $0xa0] sm:$0xff] }
 0x307   :  { %v6257_v51 = vpop.permute.xlu1 %1676  ;;  %v1970_v36 = vsel %vm193_vm3, %v5090_v3, %v5997_v10 }
 0x308   :  { %v6255_v35 = vpop.permute.xlu0 %1612  ;;  %v1986_v34 = vsel %vm11_vm0, %v1970_v36, %v5993_v28 }
 0x309   :  { %1880 = vrot.lane.b32.xlu1 %v1433_v37, %s5099_s4  ;;  %4818 = vmatmul.mubr.msk.f32.gmra.mrb[6].mxu1 %vm1011_vm11, %v2081_v32 }
 0x30a   :  { %1688 = vrot.lane.b32.xlu0 %v1385_v41, %s5096_s20 }
 0x30b   :  { %v1551_v40 = vpop.permute.xlu1 %1550 }
 0x30c   :  { %v1487_v1 = vpop.permute.xlu0 %1486 }
 0x30d   :  { %1944 = vrot.lane.b32.xlu1 %v1449_v18, %s5100_s7 }
 0x30e   :  { %1940 = vrot.lane.b32.xlu0 %v1400_v20, %s5100_s7 }
 0x30f   :  { %v1803_v24 = vpop.permute.xlu1 %1802 }
 0x310   :  { %v1741_v45 = vpop.permute.xlu0 %1740 }
 0x311   :  { %2648 = vrot.lane.b32.xlu1 %v2448_v21, %s5094_s0 }
 0x312   :  { %1814 = vrot.lane.b32.xlu0 %v1369_v6, %s5098_s27 }
 0x313   :  { %v1867_v49 = vpop.permute.xlu1 %1866 }
 0x314   :  { %v1485_v53 = vpop.permute.xlu0 %1484 }
 0x315   :  { %3030 = vrot.lane.b32.xlu1 %v2543_v38, %s5100_s7  ;;  %v1971_v8 = vsel %vm193_vm3, %v6055_v31, %v1485_v53 }
 0x316   :  { %1878 = vrot.lane.b32.xlu0 %v1385_v41, %s5099_s4 }
 0x317   :  { %v1931_v50 = vpop.permute.xlu1 %1930 }
 0x318   :  { %v1549_v15 = vpop.permute.xlu0 %1548 }
 0x319   :  { %2918 = vrot.lane.b32.xlu1 %v6238_v25, %s5098_s27  ;;  %v1987_v55 = vsel %vm11_vm0, %v1971_v8, %v1549_v15  ;;  %v1972_v25 = vsel %vm193_vm3, %v6028_v39, %v1487_v1 }
 0x31a   :  { %1942 = vrot.lane.b32.xlu0 %v1401_v27, %s5100_s7  ;;  %v2003_v41 = vsel %vm900_vm5, %v1987_v55, %v6255_v35  ;;  %v1988_v53 = vsel %vm11_vm0, %v1972_v25, %v1551_v40 }
 0x31b   :  { %v1611_v47 = vpop.permute.xlu1 %1610 }
 0x31c   :  { %v2002_v44 = vsel %vm900_vm5, %v1986_v34, %v1611_v47  ;;  %v1739_v6 = vpop.permute.xlu0 %1738 }
 0x31d   :  { %2982 = vrot.lane.b32.xlu1 %v1433_v37, %s5099_s4 }
 0x31e   :  { %2568 = vrot.lane.b32.xlu0 %v2424_v59, %s5093_s19 }
 0x31f   :  { %v1675_v14 = vpop.permute.xlu1 %1674 }
 0x320   :  { %v2018_v20 = vsel %vm917_vm6, %v2002_v44, %v1675_v14 }
 0x321   :  { %v2034_v43 = vsel %vm934_vm7, %v2018_v20, %v1739_v6 }
 0x322   :  { %v2050_v22 = vsel %vm951_vm8, %v2034_v43, %v1803_v24  ;;  %2632 = vrot.lane.b32.xlu0 %v2440_v7, %s5094_s0  ;;  %v2019_v24 = vsel %vm917_vm6, %v2003_v41, %v6257_v51 }
 0x323   :  { %v2066_v57 = vsel %vm968_vm9, %v2050_v22, %v1867_v49  ;;  %v2035_v37 = vsel %vm934_vm7, %v2019_v24, %v1741_v45 }
 0x324   :  { %v2082_v26 = vsel %vm985_vm10, %v2066_v57, %v1931_v50 }
 0x325   :  { %4820 = vmatprep.mubr.msk.f32.mxu1 %vm1011_vm11, %v2082_v26 }
 0x326   :  { %2584 = vrot.lane.b32.xlu0 %v2432_v13, %s5093_s19 }
 0x327   :  { %v6281_v28 = vpop.permute.xlu1 %1680 }
 0x328   :  { %v1617_v10 = vpop.permute.xlu0 %1616 }
 0x32a   :  { %2902 = vrot.lane.b32.xlu0 %v2511_v4, %s5098_s27 }
 0x32b   :  { %v6284_v63 = vpop.permute.xlu1 %1554 }
 0x32c   :  { %v1491_v27 = vpop.permute.xlu0 %1490 }
 0x32d   :  { %v1974_v4 = vsel %vm193_vm3, %v6079_v48, %v1491_v27 }
 0x32e   :  { %2966 = vrot.lane.b32.xlu0 %v2527_v42, %s5099_s4 }
 0x32f   :  { %v1807_v23 = vpop.permute.xlu1 %1806 }
 0x330   :  { %v1745_v30 = vpop.permute.xlu0 %1744 }
 0x333   :  { %v1871_v19 = vpop.permute.xlu1 %1870 }
 0x334   :  { %v1489_v46 = vpop.permute.xlu0 %1488 }
 0x335   :  { %v1973_v26 = vsel %vm193_vm3, %v6121_v12, %v1489_v46 }
 0x337   :  { %v1935_v62 = vpop.permute.xlu1 %1934 }
 0x338   :  { %v1553_v61 = vpop.permute.xlu0 %1552 }
 0x339   :  { %v1989_v21 = vsel %vm11_vm0, %v1973_v26, %v1553_v61 }
 0x33a   :  { %v2005_v13 = vsel %vm900_vm5, %v1989_v21, %v1617_v10 }
 0x33b   :  { %v1615_v32 = vpop.permute.xlu1 %1614 }
 0x33c   :  { %v1805_v18 = vpop.permute.xlu0 %1804  ;;  %v2004_v50 = vsel %vm900_vm5, %v1988_v53, %v1615_v32 }
 0x33d   :  { %v2051_v15 = vsel %vm951_vm8, %v2035_v37, %v1805_v18 }
 0x33f   :  { %v1679_v31 = vpop.permute.xlu1 %1678 }
 0x340   :  { %v1869_v49 = vpop.permute.xlu0 %1868  ;;  %v2020_v35 = vsel %vm917_vm6, %v2004_v50, %v1679_v31 }
 0x341   :  { %v2067_v3 = vsel %vm968_vm9, %v2051_v15, %v1869_v49 }
 0x343   :  { %v1933_v36 = vpop.permute.xlu1 %1932 }
 0x344   :  { %v1743_v47 = vpop.permute.xlu0 %1742  ;;  %v2083_v39 = vsel %vm985_vm10, %v2067_v3, %v1933_v36 }
 0x345   :  { %v2036_v51 = vsel %vm934_vm7, %v2020_v35, %v1743_v47  ;;  %4821 = vmatmul.mubr.msk.f32.gmra.mrb[8].mxu1 %vm1011_vm11, %v2083_v39 }
 0x346   :  { %v2052_v1 = vsel %vm951_vm8, %v2036_v51, %v1807_v23 }
 0x347   :  { %v2068_v40 = vsel %vm968_vm9, %v2052_v1, %v1871_v19  ;;  %v1685_v45 = vpop.permute.xlu1 %1684  ;;  %v2021_v19 = vsel %vm917_vm6, %v2005_v13, %v6281_v28 }
 0x348   :  { %v1621_v34 = vpop.permute.xlu0 %1620  ;;  %v2084_v44 = vsel %vm985_vm10, %v2068_v40, %v1935_v62  ;;  %v1990_v62 = vsel %vm11_vm0, %v1974_v4, %v6284_v63  ;;  %v2037_v12 = vsel %vm934_vm7, %v2021_v19, %v1745_v30 }
 0x349   :  { %4823 = vmatprep.mubr.msk.f32.mxu1 %vm1011_vm11, %v2084_v44 }
 0x34b   :  { %v1559_v14 = vpop.permute.xlu1 %1558 }
 0x34c   :  { %v1495_v6 = vpop.permute.xlu0 %1494 }
 0x34f   :  { %v1811_v20 = vpop.permute.xlu1 %1810 }
 0x350   :  { %v1749_v43 = vpop.permute.xlu0 %1748 }
 0x353   :  { %v1875_v22 = vpop.permute.xlu1 %1874 }
 0x354   :  { %v1493_v57 = vpop.permute.xlu0 %1492 }
 0x355   :  { %v1975_v37 = vsel %vm193_vm3, %v6186_v29, %v1493_v57 }
 0x357   :  { %v1939_v59 = vpop.permute.xlu1 %1938 }
 0x358   :  { %v1557_v7 = vpop.permute.xlu0 %1556 }
 0x359   :  { %v1991_v15 = vsel %vm11_vm0, %v1975_v37, %v1557_v7 }
 0x35a   :  { %v2007_v35 = vsel %vm900_vm5, %v1991_v15, %v1621_v34 }
 0x35b   :  { %v1619_v38 = vpop.permute.xlu1 %1618  ;;  %v2023_v47 = vsel %vm917_vm6, %v2007_v35, %v1685_v45 }
 0x35c   :  { %v1809_v23 = vpop.permute.xlu0 %1808  ;;  %v2006_v46 = vsel %vm900_vm5, %v1990_v62, %v1619_v38  ;;  %v2039_v40 = vsel %vm934_vm7, %v2023_v47, %v1749_v43 }
 0x35d   :  { %v2053_v61 = vsel %vm951_vm8, %v2037_v12, %v1809_v23  ;;  %v6371_v12 = vld [vmem:[%s7462_s1 + $0xb5] ss:$0 sm:$0xff] }
 0x35f   :  { %v1683_v42 = vpop.permute.xlu1 %1682 }
 0x360   :  { %v1873_v8 = vpop.permute.xlu0 %1872  ;;  %v2022_v10 = vsel %vm917_vm6, %v2006_v46, %v1683_v42 }
 0x361   :  { %v2069_v55 = vsel %vm968_vm9, %v2053_v61, %v1873_v8 }
 0x363   :  { %v1937_v41 = vpop.permute.xlu1 %1936 }
 0x364   :  { %v1747_v48 = vpop.permute.xlu0 %1746  ;;  %v2085_v27 = vsel %vm985_vm10, %v2069_v55, %v1937_v41 }
 0x365   :  { %v2038_v28 = vsel %vm934_vm7, %v2022_v10, %v1747_v48  ;;  %4824 = vmatmul.mubr.msk.f32.gmra.mrb[10].mxu1 %vm1011_vm11, %v2085_v27 }
 0x366   :  { %v2054_v32 = vsel %vm951_vm8, %v2038_v28, %v1811_v20 }
 0x367   :  { %v2070_v63 = vsel %vm968_vm9, %v2054_v32, %v1875_v22  ;;  %v1623_v30 = vpop.permute.xlu1 %1622 }
 0x368   :  { %v1625_v18 = vpop.permute.xlu0 %1624  ;;  %v2086_v25 = vsel %vm985_vm10, %v2070_v63, %v1939_v59 }
 0x369   :  { %4826 = vmatprep.mubr.msk.f32.mxu1 %vm1011_vm11, %v2086_v25 }
 0x36b   :  { %v1687_v31 = vpop.permute.xlu1 %1686 }
 0x36c   :  { %v1497_v24 = vpop.permute.xlu0 %1496 }
 0x36d   :  { %v1977_v51 = vsel %vm193_vm3, %v6201_v17, %v1497_v24  ;;  %v1976_v17 = vsel %vm193_vm3, %v6146_v33, %v1495_v6 }
 0x36e   :  { %v1992_v7 = vsel %vm11_vm0, %v1976_v17, %v1559_v14 }
 0x36f   :  { %v1751_v53 = vpop.permute.xlu1 %1750  ;;  %v2008_v21 = vsel %vm900_vm5, %v1992_v7, %v1623_v30 }
 0x370   :  { %v1561_v49 = vpop.permute.xlu0 %1560  ;;  %v2024_v23 = vsel %vm917_vm6, %v2008_v21, %v1687_v31 }
 0x371   :  { %v1993_v1 = vsel %vm11_vm0, %v1977_v51, %v1561_v49  ;;  %v2040_v4 = vsel %vm934_vm7, %v2024_v23, %v1751_v53 }
 0x372   :  { %v2009_v34 = vsel %vm900_vm5, %v1993_v1, %v1625_v18 }
 0x373   :  { %v1753_v36 = vpop.permute.xlu1 %1752 }
 0x374   :  { %v1813_v50 = vpop.permute.xlu0 %1812 }
 0x375   :  { %v2055_v44 = vsel %vm951_vm8, %v2039_v40, %v1813_v50 }
 0x377   :  { %v1817_v29 = vpop.permute.xlu1 %1816 }
 0x378   :  { %v1877_v3 = vpop.permute.xlu0 %1876 }
 0x379   :  { %v2071_v20 = vsel %vm968_vm9, %v2055_v44, %v1877_v3 }
 0x37b   :  { %v1881_v59 = vpop.permute.xlu1 %1880 }
 0x37c   :  { %v1689_v39 = vpop.permute.xlu0 %1688 }
 0x37d   :  { %v2025_v45 = vsel %vm917_vm6, %v2009_v34, %v1689_v39 }
 0x37e   :  { %v2041_v43 = vsel %vm934_vm7, %v2025_v45, %v1753_v36 }
 0x37f   :  { %v2057_v13 = vsel %vm951_vm8, %v2041_v43, %v1817_v29  ;;  %v1945_v19 = vpop.permute.xlu1 %1944 }
 0x380   :  { %v1941_v22 = vpop.permute.xlu0 %1940  ;;  %v2073_v42 = vsel %vm968_vm9, %v2057_v13, %v1881_v59 }
 0x381   :  { %v2087_v57 = vsel %vm985_vm10, %v2071_v20, %v1941_v22  ;;  %v2089_v14 = vsel %vm985_vm10, %v2073_v42, %v1945_v19 }
 0x382   :  { %4827 = vmatmul.mubr.msk.f32.gmra.mrb[12].mxu1 %vm1011_vm11, %v2087_v57 }
 0x384   :  { %v1815_v26 = vpop.permute.xlu0 %1814 }
 0x385   :  { %v2056_v33 = vsel %vm951_vm8, %v2040_v4, %v1815_v26 }
 0x388   :  { %v1879_v38 = vpop.permute.xlu0 %1878 }
 0x389   :  { %v2072_v6 = vsel %vm968_vm9, %v2056_v33, %v1879_v38 }
 0x38c   :  { %v1943_v8 = vpop.permute.xlu0 %1942 }
 0x38d   :  { %v2088_v62 = vsel %vm985_vm10, %v2072_v6, %v1943_v8 }
 0x38e   :  { %4829 = vmatprep.mubr.msk.f32.mxu1 %vm1011_vm11, %v2088_v62  ;;  %v3192_v62 = vld [vmem:[%s7462_s1 + $0x48] sm:$0xff] }
 0x38f   :  { %4830 = vmatmul.mubr.msk.f32.gmra.mrb[14].mxu1 %vm1011_vm11, %v2089_v14  ;;  %v3193_v14 = vld [vmem:[%s7462_s1 + $0x50] sm:$0xff] }
 0x39c   :  { %v4810_v46 = vpop.f32.mrb[0].mxu1 }
 0x39d   :  { %v2222_v61 = vadd.f32 %v4810_v46, %v6371_v12  ;;  %v2216_v10 = vpop.f32.mrb[1].mxu1 }
 0x39e   :  { %v2217_v55 = vadd.f32 %v6371_v12, %v2216_v10  ;;  %v3195_v10 = vld [vmem:[%s7462_s1 + $0x60] sm:$0xff] }
 0x39f   :  { %v2296_v41 = vadd.f32 %v2222_v61, %v5337_v56  ;;  %v4924_v61 = vpack.c.bf16 %v3193_v14, %v3192_v62 }
 0x3a0   :  { %v2295_v48 = vadd.f32 %v2217_v55, %v5327_v52 }
 0x3a1   :  { %v2328_v27 = vmul.f32 0.70710677, %v2296_v41  ;;  %v2312_v30 = vmul.f32 0.5, %v2296_v41  ;;  %4925 = vmatprep.subr.bf16.mxu0 %v4924_v61 }
 0x3a2   :  { %v2327_v28 = vmul.f32 0.70710677, %v2295_v48  ;;  %v2311_v25 = vmul.f32 0.5, %v2295_v48  ;;  %4927 = vmatpush3.bf16.msra.mxu0 %v4924_v61 }
 0x3a3   :  { %4994 = verf.f32 %v2328_v27 }
 0x3a4   :  { %4996 = verf.f32 %v2327_v28 }
 0x3ad   :  { %v4995_v32 = vpop.eup %4994 }
 0x3ae   :  { %v4997_v63 = vpop.eup %4996  ;;  %v2360_v18 = vadd.f32 1.0, %v4995_v32 }
 0x3af   :  { %v2359_v24 = vadd.f32 1.0, %v4997_v63 }
 0x3b0   :  { %v2376_v31 = vmul.f32 %v2360_v18, %v2312_v30  ;;  %v3196_v18 = vld [vmem:[%s7462_s1 + $0x68] sm:$0xf] }
 0x3b1   :  { %v2375_v49 = vmul.f32 %v2359_v24, %v2311_v25 }
 0x3b2   :  { %2392 = vst.msk [vmem:[#allocation2 + $0x21] sm:$0xff] %vm193_vm3, %v2376_v31 }
 0x3b3   :  { %2391 = vst.msk [vmem:[#allocation2 + $0x11] sm:$0xff] %vm193_vm3, %v2375_v49 }
 0x3b9   :  { %v6379_v53 = vld [vmem:[#allocation2 + $0x20] sm:$0xff] }
 0x3ba   :  { %v2473_v56 = vld [vmem:[#allocation2 + $0x21] sm:$0xff]  ;;  %2698 = vrot.lane.b32.xlu1 %v6379_v53, %s5095_s25  ;;  %v6390_v39 = vld [vmem:[#allocation2 + $0x10] sm:$0xff] }
 0x3bb   :  { %2762 = vrot.lane.b32.xlu0 %v2473_v56, %s5096_s20  ;;  %v2489_v15 = vld [vmem:[#allocation2 + $0x22] sm:$0xff]  ;;  %v2472_v1 = vld [vmem:[#allocation2 + $0x11] sm:$0xff] }
 0x3bc   :  { %v4813_v52 = vpop.f32.mrb[2].mxu1  ;;  %v2441_v57 = vld [vmem:[#allocation2 + $0x12] sm:$0xff] }
 0x3bd   :  { %v2232_v37 = vadd.f32 %v4813_v52, %v6371_v12  ;;  %v2226_v50 = vpop.f32.mrb[3].mxu1 }
 0x3be   :  { %v2227_v35 = vadd.f32 %v6371_v12, %v2226_v50  ;;  %2572 = vrot.lane.b32.xlu1 %v2473_v56, %s5093_s19 }
 0x3bf   :  { %2826 = vrot.lane.b32.xlu0 %v2489_v15, %s5097_s21  ;;  %v2298_v3 = vadd.f32 %v2232_v37, %v5340_v58 }
 0x3c0   :  { %v2297_v36 = vadd.f32 %v2227_v35, %v5330_v54 }
 0x3c1   :  { %v2330_v47 = vmul.f32 0.70710677, %v2298_v3  ;;  %v2314_v40 = vmul.f32 0.5, %v2298_v3 }
 0x3c2   :  { %v2329_v51 = vmul.f32 0.70710677, %v2297_v36  ;;  %2636 = vrot.lane.b32.xlu1 %v2489_v15, %s5094_s0  ;;  %v2313_v29 = vmul.f32 0.5, %v2297_v36 }
 0x3c3   :  { %2696 = vrot.lane.b32.xlu0 %v6390_v39, %s5095_s25  ;;  %4998 = verf.f32 %v2330_v47 }
 0x3c4   :  { %5000 = verf.f32 %v2329_v51 }
 0x3c6   :  { %2888 = vrot.lane.b32.xlu1 %v6379_v53, %s5098_s27 }
 0x3c7   :  { %2760 = vrot.lane.b32.xlu0 %v2472_v1, %s5096_s20 }
 0x3ca   :  { %2952 = vrot.lane.b32.xlu1 %v2473_v56, %s5099_s4 }
 0x3cd   :  { %v4999_v54 = vpop.eup %4998 }
 0x3ce   :  { %v5001_v58 = vpop.eup %5000  ;;  %v2362_v44 = vadd.f32 1.0, %v4999_v54  ;;  %3016 = vrot.lane.b32.xlu1 %v2489_v15, %s5100_s7 }
 0x3cf   :  { %v2361_v20 = vadd.f32 1.0, %v5001_v58 }
 0x3d0   :  { %v2378_v22 = vmul.f32 %v2362_v44, %v2314_v40  ;;  %v6479_v40 = vpop.permute.xlu1 %2648 }
 0x3d1   :  { %v2377_v34 = vmul.f32 %v2361_v20, %v2313_v29  ;;  %v6483_v29 = vpop.permute.xlu0 %2568 }
 0x3d2   :  { %2394 = vst.msk [vmem:[#allocation2 + $0x41] sm:$0xff] %vm193_vm3, %v2378_v22  ;;  %2570 = vrot.lane.b32.xlu1 %v2472_v1, %s5093_s19 }
 0x3d3   :  { %2393 = vst.msk [vmem:[#allocation2 + $0x31] sm:$0xff] %vm193_vm3, %v2377_v34 }
 0x3d6   :  { %2634 = vrot.lane.b32.xlu1 %v2441_v57, %s5094_s0 }
 0x3d8   :  { %v4816_v45 = vpop.f32.mrb[4].mxu1 }
 0x3d9   :  { %v2242_v17 = vadd.f32 %v4816_v45, %v6371_v12  ;;  %v2236_v26 = vpop.f32.mrb[5].mxu1  ;;  %v6405_v59 = vld [vmem:[#allocation2 + $0x40] sm:$0xff] }
 0x3da   :  { %v2237_v43 = vadd.f32 %v6371_v12, %v2236_v26  ;;  %2824 = vrot.lane.b32.xlu1 %v2441_v57, %s5097_s21  ;;  %2702 = vrot.lane.b32.xlu0 %v6405_v59, %s5095_s25  ;;  %v2475_v19 = vld [vmem:[#allocation2 + $0x41] sm:$0xff]  ;;  %v2443_v48 = vld [vmem:[#allocation2 + $0x32] sm:$0xff] }
 0x3db   :  { %v2300_v7 = vadd.f32 %v2242_v17, %v5352_v0  ;;  %v2444_v8 = vld [vmem:[#allocation2 + $0x42] sm:$0xff]  ;;  %v6442_v49 = vld [vmem:[#allocation2 + $0x30] sm:$0xff]  ;;  %v6490_v17 = vpop.permute.xlu1 %3030 }
 0x3dc   :  { %v2299_v21 = vadd.f32 %v2237_v43, %v5347_v60  ;;  %v4819_v13 = vpop.f32.mrb[6].mxu1 }
 0x3dd   :  { %v2332_v38 = vmul.f32 0.70710677, %v2300_v7  ;;  %v2252_v23 = vadd.f32 %v4819_v13, %v6371_v12  ;;  %v2246_v4 = vpop.f32.mrb[7].mxu1  ;;  %v2316_v28 = vmul.f32 0.5, %v2300_v7 }
 0x3de   :  { %v2331_v42 = vmul.f32 0.70710677, %v2299_v21  ;;  %v2247_v33 = vadd.f32 %v6371_v12, %v2246_v4  ;;  %2766 = vrot.lane.b32.xlu1 %v2475_v19, %s5096_s20  ;;  %2576 = vrot.lane.b32.xlu0 %v2475_v19, %s5093_s19  ;;  %v2315_v63 = vmul.f32 0.5, %v2299_v21 }
 0x3df   :  { %5002 = verf.f32 %v2332_v38  ;;  %v2302_v6 = vadd.f32 %v2252_v23, %v5365_v5  ;;  %v3194_v5 = vld [vmem:[%s7462_s1 + $0x58] sm:$0xff]  ;;  %v6493_v38 = vpop.permute.xlu0 %2632 }
 0x3e0   :  { %5004 = verf.f32 %v2331_v42  ;;  %v2301_v0 = vadd.f32 %v2247_v33, %v5362_v2  ;;  %v2427_v2 = vld [vmem:[#allocation2 + $0x31] sm:$0xff]  ;;  %v4928_v55 = vpack.c.bf16 %v3195_v10, %v3194_v5 }
 0x3e1   :  { %v2334_v60 = vmul.f32 0.70710677, %v2302_v6  ;;  %v2318_v52 = vmul.f32 0.5, %v2302_v6 }
 0x3e2   :  { %v2333_v46 = vmul.f32 0.70710677, %v2301_v0  ;;  %2640 = vrot.lane.b32.xlu1 %v2444_v8, %s5094_s0  ;;  %2830 = vrot.lane.b32.xlu0 %v2444_v8, %s5097_s21  ;;  %v2317_v50 = vmul.f32 0.5, %v2301_v0 }
 0x3e3   :  { %5006 = verf.f32 %v2334_v60  ;;  %4929 = vmatprep.subr.bf16.mxu0 %v4928_v55 }
 0x3e4   :  { %5008 = verf.f32 %v2333_v46  ;;  %4931 = vmatpush3.bf16.msra.mxu0 %v4928_v55 }
 0x3e5   :  { %4840 = vmatprep.subr.msk.mxu0 %vm1060_vm4, %v3196_v18 }
 0x3e6   :  { %2892 = vrot.lane.b32.xlu1 %v6405_v59, %s5098_s27  ;;  %2574 = vrot.lane.b32.xlu0 %v2427_v2, %s5093_s19 }
 0x3e8   :  { %4841 = vmatpush3.msk.msra.mxu0 %vm1060_vm4, %v3196_v18 }
 0x3e9   :  { %v5003_v41 = vpop.eup %5002 }
 0x3ea   :  { %v5005_v27 = vpop.eup %5004  ;;  %v2364_v32 = vadd.f32 1.0, %v5003_v41  ;;  %2956 = vrot.lane.b32.xlu1 %v2475_v19, %s5099_s4  ;;  %2638 = vrot.lane.b32.xlu0 %v2443_v48, %s5094_s0 }
 0x3eb   :  { %v2363_v30 = vadd.f32 1.0, %v5005_v27 }
 0x3ec   :  { %v2380_v25 = vmul.f32 %v2364_v32, %v2316_v28 }
 0x3ed   :  { %v5007_v24 = vpop.eup %5006  ;;  %v2379_v31 = vmul.f32 %v2363_v30, %v2315_v63 }
 0x3ee   :  { %v5009_v56 = vpop.eup %5008  ;;  %2396 = vst.msk [vmem:[#allocation2 + $0x61] sm:$0xff] %vm193_vm3, %v2380_v25  ;;  %v2366_v37 = vadd.f32 1.0, %v5007_v24  ;;  %3020 = vrot.lane.b32.xlu1 %v2444_v8, %s5100_s7  ;;  %2890 = vrot.lane.b32.xlu0 %v6442_v49, %s5098_s27 }
 0x3ef   :  { %2395 = vst.msk [vmem:[#allocation2 + $0x51] sm:$0xff] %vm193_vm3, %v2379_v31  ;;  %v2365_v15 = vadd.f32 1.0, %v5009_v56  ;;  %v7474_v56 = vld [vmem:[#allocation3_spill] sm:$0xff] }
 0x3f0   :  { %v2382_v35 = vmul.f32 %v2366_v37, %v2318_v52 }
 0x3f1   :  { %v2381_v3 = vmul.f32 %v2365_v15, %v2317_v50 }
 0x3f2   :  { %2398 = vst.msk [vmem:[#allocation2 + $0x81] sm:$0xff] %vm193_vm3, %v2382_v35  ;;  %2700 = vrot.lane.b32.xlu1 %v6442_v49, %s5095_s25  ;;  %2954 = vrot.lane.b32.xlu0 %v2427_v2, %s5099_s4 }
 0x3f3   :  { %2397 = vst.msk [vmem:[#allocation2 + $0x71] sm:$0xff] %vm193_vm3, %v2381_v3 }
 0x3f5   :  { %v6457_v36 = vld [vmem:[#allocation2 + $0x60] sm:$0xff] }
 0x3f6   :  { %2764 = vrot.lane.b32.xlu1 %v2427_v2, %s5096_s20  ;;  %2828 = vrot.lane.b32.xlu0 %v2443_v48, %s5097_s21  ;;  %v2477_v47 = vld [vmem:[#allocation2 + $0x61] sm:$0xff]  ;;  %v2429_v1 = vld [vmem:[#allocation2 + $0x51] sm:$0xff] }
 0x3f7   :  { %v2446_v51 = vld [vmem:[#allocation2 + $0x62] sm:$0xff]  ;;  %v2445_v54 = vld [vmem:[#allocation2 + $0x52] sm:$0xff] }
 0x3f8   :  { %v6471_v58 = vld [vmem:[#allocation2 + $0x50] sm:$0xff] }
 0x3f9   :  { %v2463_v57 = vld [vmem:[#allocation2 + $0x80] sm:$0xff] }
 0x3fa   :  { %3018 = vrot.lane.b32.xlu1 %v2443_v48, %s5100_s7  ;;  %2706 = vrot.lane.b32.xlu0 %v6457_v36, %s5095_s25  ;;  %v2479_v21 = vld [vmem:[#allocation2 + $0x81] sm:$0xff]  ;;  %v2431_v23 = vld [vmem:[#allocation2 + $0x71] sm:$0xff] }
 0x3fb   :  { %v2495_v13 = vld [vmem:[#allocation2 + $0x82] sm:$0xff]  ;;  %v2447_v4 = vld [vmem:[#allocation2 + $0x72] sm:$0xff] }
 0x3fc   :  { %v6507_v60 = vld [vmem:[#allocation2 + $0x70] sm:$0xff] }
 0x3fe   :  { %2770 = vrot.lane.b32.xlu1 %v2477_v47, %s5096_s20  ;;  %2580 = vrot.lane.b32.xlu0 %v2477_v47, %s5093_s19 }
 0x402   :  { %2644 = vrot.lane.b32.xlu1 %v2446_v51, %s5094_s0  ;;  %2834 = vrot.lane.b32.xlu0 %v2446_v51, %s5097_s21 }
 0x406   :  { %2896 = vrot.lane.b32.xlu1 %v6457_v36, %s5098_s27  ;;  %2578 = vrot.lane.b32.xlu0 %v2429_v1, %s5093_s19 }
 0x40a   :  { %2960 = vrot.lane.b32.xlu1 %v2477_v47, %s5099_s4  ;;  %2642 = vrot.lane.b32.xlu0 %v2445_v54, %s5094_s0  ;;  %v2408_v47 = vld [vmem:[#allocation2] sm:$0xff] }
 0x40e   :  { %3024 = vrot.lane.b32.xlu1 %v2446_v51, %s5100_s7  ;;  %2894 = vrot.lane.b32.xlu0 %v6471_v58, %s5098_s27 }
 0x412   :  { %2704 = vrot.lane.b32.xlu1 %v6471_v58, %s5095_s25  ;;  %2958 = vrot.lane.b32.xlu0 %v2429_v1, %s5099_s4 }
 0x416   :  { %2768 = vrot.lane.b32.xlu1 %v2429_v1, %s5096_s20  ;;  %2832 = vrot.lane.b32.xlu0 %v2445_v54, %s5097_s21 }
 0x418   :  { %v4822_v44 = vpop.f32.mrb[8].mxu1 }
 0x419   :  { %v2262_v20 = vadd.f32 %v4822_v44, %v6371_v12  ;;  %v2256_v22 = vpop.f32.mrb[9].mxu1 }
 0x41a   :  { %v2257_v34 = vadd.f32 %v6371_v12, %v2256_v22  ;;  %3022 = vrot.lane.b32.xlu1 %v2445_v54, %s5100_s7  ;;  %2710 = vrot.lane.b32.xlu0 %v2463_v57, %s5095_s25  ;;  %v3064_v54 = vsel %vm193_vm3, %v2408_v47, %v6483_v29 }
 0x41b   :  { %v2304_v45 = vadd.f32 %v2262_v20, %v5379_v11  ;;  %v6497_v11 = vpop.permute.xlu1 %2918 }
 0x41c   :  { %v2303_v26 = vadd.f32 %v2257_v34, %v5376_v9  ;;  %v6501_v9 = vpop.permute.xlu0 %2584 }
 0x41d   :  { %v2336_v43 = vmul.f32 0.70710677, %v2304_v45  ;;  %v2320_v6 = vmul.f32 0.5, %v2304_v45 }
 0x41e   :  { %v2335_v7 = vmul.f32 0.70710677, %v2303_v26  ;;  %2774 = vrot.lane.b32.xlu1 %v2479_v21, %s5096_s20  ;;  %2838 = vrot.lane.b32.xlu0 %v2495_v13, %s5097_s21  ;;  %v2319_v8 = vmul.f32 0.5, %v2303_v26  ;;  %v3080_v26 = vsel %vm11_vm0, %v3064_v54, %v6493_v38 }
 0x41f   :  { %5010 = verf.f32 %v2336_v43  ;;  %v6505_v19 = vpop.permute.xlu1 %2982 }
 0x420   :  { %5012 = verf.f32 %v2335_v7  ;;  %v6509_v14 = vpop.permute.xlu0 %2902 }
 0x422   :  { %2900 = vrot.lane.b32.xlu1 %v2463_v57, %s5098_s27  ;;  %2582 = vrot.lane.b32.xlu0 %v2431_v23, %s5093_s19 }
 0x424   :  { %v6521_v5 = vpop.permute.xlu0 %2966 }
 0x426   :  { %2964 = vrot.lane.b32.xlu1 %v2479_v21, %s5099_s4  ;;  %2646 = vrot.lane.b32.xlu0 %v2447_v4, %s5094_s0 }
 0x429   :  { %v5011_v42 = vpop.eup %5010 }
 0x42a   :  { %v5013_v33 = vpop.eup %5012  ;;  %v2368_v0 = vadd.f32 1.0, %v5011_v42  ;;  %3028 = vrot.lane.b32.xlu1 %v2495_v13, %s5100_s7  ;;  %2898 = vrot.lane.b32.xlu0 %v6507_v60, %s5098_s27 }
 0x42b   :  { %v2367_v62 = vadd.f32 1.0, %v5013_v33 }
 0x42c   :  { %v2384_v46 = vmul.f32 %v2368_v0, %v2320_v6  ;;  %v6514_v2 = vpop.permute.xlu1 %2698 }
 0x42d   :  { %v2383_v61 = vmul.f32 %v2367_v62, %v2319_v8  ;;  %v6531_v48 = vpop.permute.xlu0 %2762 }
 0x42e   :  { %2400 = vst.msk [vmem:[#allocation2 + $0xc1] sm:$0xff] %vm193_vm3, %v2384_v46  ;;  %2708 = vrot.lane.b32.xlu1 %v6507_v60, %s5095_s25  ;;  %2962 = vrot.lane.b32.xlu0 %v2431_v23, %s5099_s4 }
 0x42f   :  { %2399 = vst.msk [vmem:[#allocation2 + $0xb1] sm:$0xff] %vm193_vm3, %v2383_v61 }
 0x430   :  { %v6523_v10 = vpop.permute.xlu1 %2572 }
 0x431   :  { %v6541_v24 = vpop.permute.xlu0 %2826 }
 0x432   :  { %2772 = vrot.lane.b32.xlu1 %v2431_v23, %s5096_s20  ;;  %2836 = vrot.lane.b32.xlu0 %v2447_v4, %s5097_s21 }
 0x434   :  { %v6527_v55 = vpop.permute.xlu1 %2636 }
 0x435   :  { %v6529_v41 = vld [vmem:[#allocation2 + $0xc0] sm:$0xff]  ;;  %v2697_v3 = vpop.permute.xlu0 %2696 }
 0x436   :  { %3026 = vrot.lane.b32.xlu1 %v2447_v4, %s5100_s7  ;;  %2714 = vrot.lane.b32.xlu0 %v6529_v41, %s5095_s25  ;;  %v2481_v30 = vld [vmem:[#allocation2 + $0xc1] sm:$0xff]  ;;  %v2433_v35 = vld [vmem:[#allocation2 + $0xb1] sm:$0xff]  ;;  %v3096_v43 = vsel %vm900_vm5, %v3080_v26, %v2697_v3 }
 0x437   :  { %v2450_v50 = vld [vmem:[#allocation2 + $0xc2] sm:$0xff]  ;;  %v2449_v1 = vld [vmem:[#allocation2 + $0xb2] sm:$0xff] }
 0x438   :  { %v4825_v27 = vpop.f32.mrb[10].mxu1  ;;  %v2889_v28 = vpop.permute.xlu1 %2888  ;;  %v6563_v38 = vld [vmem:[#allocation2 + $0xb0] sm:$0xff] }
 0x439   :  { %v2272_v32 = vadd.f32 %v4825_v27, %v6371_v12  ;;  %v2266_v63 = vpop.f32.mrb[11].mxu1  ;;  %v2761_v20 = vpop.permute.xlu0 %2760 }
 0x43a   :  { %v2267_v25 = vadd.f32 %v6371_v12, %v2266_v63  ;;  %2778 = vrot.lane.b32.xlu1 %v2481_v30, %s5096_s20  ;;  %2588 = vrot.lane.b32.xlu0 %v2481_v30, %s5093_s19  ;;  %v3112_v29 = vsel %vm917_vm6, %v3096_v43, %v2761_v20 }
 0x43b   :  { %v2306_v18 = vadd.f32 %v2272_v32, %v5392_v16 }
 0x43c   :  { %v2305_v52 = vadd.f32 %v2267_v25, %v7474_v56  ;;  %v2953_v37 = vpop.permute.xlu1 %2952  ;;  %v7475_v25 = vld [vmem:[#allocation5_spill] sm:$0xff] }
 0x43d   :  { %v2338_v31 = vmul.f32 0.70710677, %v2306_v18  ;;  %v2322_v34 = vmul.f32 0.5, %v2306_v18 }
 0x43e   :  { %v2337_v15 = vmul.f32 0.70710677, %v2305_v52  ;;  %2652 = vrot.lane.b32.xlu1 %v2450_v50, %s5094_s0  ;;  %2842 = vrot.lane.b32.xlu0 %v2450_v50, %s5097_s21  ;;  %v2321_v21 = vmul.f32 0.5, %v2305_v52 }
 0x43f   :  { %5014 = verf.f32 %v2338_v31 }
 0x440   :  { %5016 = verf.f32 %v2337_v15  ;;  %v3017_v16 = vpop.permute.xlu1 %3016 }
 0x442   :  { %2904 = vrot.lane.b32.xlu1 %v6529_v41, %s5098_s27  ;;  %2586 = vrot.lane.b32.xlu0 %v2433_v35, %s5093_s19 }
 0x444   :  { %v2571_v51 = vpop.permute.xlu1 %2570 }
 0x445   :  { %v3065_v54 = vsel %vm193_vm3, %v6390_v39, %v2571_v51  ;;  %v7477_v39 = vld [vmem:[#allocation7_spill] sm:$0xff] }
 0x446   :  { %2968 = vrot.lane.b32.xlu1 %v2481_v30, %s5099_s4  ;;  %2650 = vrot.lane.b32.xlu0 %v2449_v1, %s5094_s0 }
 0x448   :  { %v2635_v22 = vpop.permute.xlu1 %2634 }
 0x449   :  { %v5015_v44 = vpop.eup %5014 }
 0x44a   :  { %v2370_v57 = vadd.f32 1.0, %v5015_v44  ;;  %v5017_v45 = vpop.eup %5016  ;;  %3032 = vrot.lane.b32.xlu1 %v2450_v50, %s5100_s7  ;;  %2840 = vrot.lane.b32.xlu0 %v2449_v1, %s5097_s21  ;;  %v3081_v44 = vsel %vm11_vm0, %v3065_v54, %v2635_v22 }
 0x44b   :  { %v2369_v13 = vadd.f32 1.0, %v5017_v45 }
 0x44c   :  { %v2386_v7 = vmul.f32 %v2370_v57, %v2322_v34  ;;  %v2825_v23 = vpop.permute.xlu1 %2824  ;;  %v6559_v4 = vpop.permute.xlu0 %2702 }
 0x44d   :  { %v2385_v42 = vmul.f32 %v2369_v13, %v2321_v21  ;;  %v3128_v33 = vsel %vm934_vm7, %v3112_v29, %v2825_v23 }
 0x44e   :  { %2402 = vst.msk [vmem:[#allocation2 + $0xe1] sm:$0xff] %vm193_vm3, %v2386_v7  ;;  %v3144_v6 = vsel %vm951_vm8, %v3128_v33, %v2889_v28  ;;  %2712 = vrot.lane.b32.xlu1 %v6563_v38, %s5095_s25  ;;  %v3097_v7 = vsel %vm900_vm5, %v3081_v44, %v6514_v2 }
 0x44f   :  { %2401 = vst.msk [vmem:[#allocation2 + $0xd1] sm:$0xff] %vm193_vm3, %v2385_v42  ;;  %v3160_v0 = vsel %vm968_vm9, %v3144_v6, %v2953_v37  ;;  %v7476_v37 = vld [vmem:[#allocation4_spill] sm:$0xff]  ;;  %v3066_v42 = vsel %vm193_vm3, %v6379_v53, %v6523_v10  ;;  %v3113_v2 = vsel %vm917_vm6, %v3097_v7, %v6531_v48 }
 0x450   :  { %v6570_v8 = vpop.permute.xlu1 %2766  ;;  %v6572_v62 = vpop.permute.xlu0 %2576  ;;  %v3176_v46 = vsel %vm985_vm10, %v3160_v0, %v3017_v16  ;;  %v7478_v0 = vld [vmem:[#allocation6_spill] sm:$0xff] }
 0x451   :  { %4842 = vmatprep.mubr.msk.f32.mxu0 %vm1011_vm11, %v3176_v46 }
 0x452   :  { %2776 = vrot.lane.b32.xlu1 %v2433_v35, %s5096_s20 }
 0x454   :  { %v6577_v27 = vpop.permute.xlu1 %2640  ;;  %v6580_v32 = vpop.permute.xlu0 %2830 }
 0x455   :  { %v4828_v61 = vpop.f32.mrb[12].mxu1  ;;  %v2483_v63 = vld [vmem:[#allocation2 + $0xe1] sm:$0xff] }
 0x456   :  { %v2282_v28 = vadd.f32 %v4828_v61, %v6371_v12  ;;  %v6582_v30 = vld [vmem:[#allocation2 + $0xe0] sm:$0xff]  ;;  %v2276_v18 = vpop.f32.mrb[13].mxu1  ;;  %2782 = vrot.lane.b32.xlu1 %v2483_v63, %s5096_s20  ;;  %v2435_v57 = vld [vmem:[#allocation2 + $0xd1] sm:$0xff] }
 0x457   :  { %2718 = vrot.lane.b32.xlu0 %v6582_v30, %s5095_s25  ;;  %v2277_v56 = vadd.f32 %v6371_v12, %v2276_v18  ;;  %v2452_v35 = vld [vmem:[#allocation2 + $0xe2] sm:$0xff]  ;;  %v2451_v23 = vld [vmem:[#allocation2 + $0xd2] sm:$0xff] }
 0x458   :  { %v2308_v31 = vadd.f32 %v2282_v28, %v7475_v25  ;;  %v2893_v15 = vpop.permute.xlu1 %2892  ;;  %v6590_v16 = vpop.permute.xlu0 %2574 }
 0x459   :  { %v2307_v50 = vadd.f32 %v2277_v56, %v7476_v37  ;;  %v3129_v37 = vsel %vm934_vm7, %v3113_v2, %v6541_v24 }
 0x45a   :  { %v2340_v52 = vmul.f32 0.70710677, %v2308_v31  ;;  %2656 = vrot.lane.b32.xlu1 %v2452_v35, %s5094_s0  ;;  %v2324_v33 = vmul.f32 0.5, %v2308_v31 }
 0x45b   :  { %2592 = vrot.lane.b32.xlu0 %v2483_v63, %s5093_s19  ;;  %v2339_v3 = vmul.f32 0.70710677, %v2307_v50  ;;  %v2323_v18 = vmul.f32 0.5, %v2307_v50 }
 0x45c   :  { %5018 = verf.f32 %v2340_v52  ;;  %v2957_v47 = vpop.permute.xlu1 %2956  ;;  %v6594_v1 = vpop.permute.xlu0 %2638  ;;  %v6620_v52 = vld [vmem:[#allocation2 + $0xd0] sm:$0xff] }
 0x45d   :  { %5020 = verf.f32 %v2339_v3 }
 0x45e   :  { %2908 = vrot.lane.b32.xlu1 %v6582_v30, %s5098_s27 }
 0x45f   :  { %2846 = vrot.lane.b32.xlu0 %v2452_v35, %s5097_s21 }
 0x460   :  { %v3021_v20 = vpop.permute.xlu1 %3020  ;;  %v2891_v34 = vpop.permute.xlu0 %2890 }
 0x462   :  { %v4831_v45 = vpop.f32.mrb[14].mxu1  ;;  %2972 = vrot.lane.b32.xlu1 %v2483_v63, %s5099_s4 }
 0x463   :  { %2590 = vrot.lane.b32.xlu0 %v2435_v57, %s5093_s19  ;;  %v2292_v26 = vadd.f32 %v4831_v45, %v6371_v12  ;;  %v2286_v43 = vpop.f32.mrb[15].mxu1 }
 0x464   :  { %v2287_v21 = vadd.f32 %v6371_v12, %v2286_v43  ;;  %v2701_v22 = vpop.permute.xlu1 %2700  ;;  %v2955_v29 = vpop.permute.xlu0 %2954  ;;  %v3082_v12 = vsel %vm11_vm0, %v3066_v42, %v6527_v55 }
 0x465   :  { %v2310_v51 = vadd.f32 %v2292_v26, %v7477_v39  ;;  %v3098_v10 = vsel %vm900_vm5, %v3082_v12, %v2701_v22  ;;  %v3067_v12 = vsel %vm193_vm3, %v6442_v49, %v6590_v16  ;;  %v3068_v49 = vsel %vm193_vm3, %v6405_v59, %v6572_v62 }
 0x466   :  { %v5019_v13 = vpop.eup %5018  ;;  %v2309_v46 = vadd.f32 %v2287_v21, %v7478_v0  ;;  %3036 = vrot.lane.b32.xlu1 %v2452_v35, %s5100_s7  ;;  %v3145_v35 = vsel %vm951_vm8, %v3129_v37, %v2891_v34  ;;  %v3084_v16 = vsel %vm11_vm0, %v3068_v49, %v6577_v27 }
 0x467   :  { %v2372_v6 = vadd.f32 1.0, %v5019_v13  ;;  %2654 = vrot.lane.b32.xlu0 %v2451_v23, %s5094_s0  ;;  %v5021_v61 = vpop.eup %5020  ;;  %v2342_v28 = vmul.f32 0.70710677, %v2310_v51  ;;  %v3161_v54 = vsel %vm968_vm9, %v3145_v35, %v2955_v29  ;;  %v2326_v21 = vmul.f32 0.5, %v2310_v51 }
 0x468   :  { %v2371_v25 = vadd.f32 1.0, %v5021_v61  ;;  %v2341_v53 = vmul.f32 0.70710677, %v2309_v46  ;;  %v2765_v31 = vpop.permute.xlu1 %2764  ;;  %v2829_v56 = vpop.permute.xlu0 %2828  ;;  %v2325_v39 = vmul.f32 0.5, %v2309_v46 }
 0x469   :  { %v2388_v63 = vmul.f32 %v2372_v6, %v2324_v33  ;;  %5022 = verf.f32 %v2342_v28  ;;  %v3114_v48 = vsel %vm917_vm6, %v3098_v10, %v2765_v31 }
 0x46a   :  { %v2387_v55 = vmul.f32 %v2371_v25, %v2323_v18  ;;  %5024 = verf.f32 %v2341_v53  ;;  %v3130_v50 = vsel %vm934_vm7, %v3114_v48, %v2829_v56  ;;  %2716 = vrot.lane.b32.xlu1 %v6620_v52, %s5095_s25  ;;  %v3083_v18 = vsel %vm11_vm0, %v3067_v12, %v6594_v1 }
 0x46b   :  { %2404 = vst.msk [vmem:[#allocation2 + $0x101] sm:$0xff] %vm193_vm3, %v2388_v63  ;;  %2906 = vrot.lane.b32.xlu0 %v6620_v52, %s5098_s27  ;;  %v3146_v3 = vsel %vm951_vm8, %v3130_v50, %v2893_v15  ;;  %v3099_v25 = vsel %vm900_vm5, %v3083_v18, %v6559_v4 }
 0x46c   :  { %2403 = vst.msk [vmem:[#allocation2 + $0xf1] sm:$0xff] %vm193_vm3, %v2387_v55  ;;  %v3019_v44 = vpop.permute.xlu1 %3018  ;;  %v6635_v45 = vpop.permute.xlu0 %2706  ;;  %v3162_v26 = vsel %vm968_vm9, %v3146_v3, %v2957_v47  ;;  %v3115_v1 = vsel %vm917_vm6, %v3099_v25, %v6570_v8 }
 0x46d   :  { %v3177_v24 = vsel %vm985_vm10, %v3161_v54, %v3019_v44  ;;  %v3178_v43 = vsel %vm985_vm10, %v3162_v26, %v3021_v20  ;;  %v3131_v59 = vsel %vm934_vm7, %v3115_v1, %v6580_v32 }
 0x46e   :  { %2780 = vrot.lane.b32.xlu1 %v2435_v57, %s5096_s20  ;;  %4843 = vmatmul.mubr.msk.f32.vlgmr.msra.gmra.mrb[16].mxu0 %vm1011_vm11, %v3177_v24 }
 0x46f   :  { %2970 = vrot.lane.b32.xlu0 %v2435_v57, %s5099_s4  ;;  %4845 = vmatprep.mubr.msk.f32.mxu0 %vm1011_vm11, %v3178_v43 }
 0x470   :  { %v6644_v15 = vpop.permute.xlu1 %2770  ;;  %v6646_v34 = vpop.permute.xlu0 %2580 }
 0x472   :  { %3034 = vrot.lane.b32.xlu1 %v2451_v23, %s5100_s7  ;;  %v6654_v29 = vld [vmem:[#allocation2 + $0x100] sm:$0xff] }
 0x473   :  { %2844 = vrot.lane.b32.xlu0 %v2451_v23, %s5097_s21  ;;  %v5023_v7 = vpop.eup %5022  ;;  %v2485_v33 = vld [vmem:[#allocation2 + $0x101] sm:$0xff]  ;;  %v2437_v63 = vld [vmem:[#allocation2 + $0xf1] sm:$0xff] }
 0x474   :  { %v5025_v47 = vpop.eup %5024  ;;  %v2374_v13 = vadd.f32 1.0, %v5023_v7  ;;  %v6650_v22 = vpop.permute.xlu1 %2644  ;;  %v2454_v0 = vld [vmem:[#allocation2 + $0x102] sm:$0xff]  ;;  %v2453_v31 = vld [vmem:[#allocation2 + $0xf2] sm:$0xff] }
 0x475   :  { %v2373_v20 = vadd.f32 1.0, %v5025_v47  ;;  %v6652_v57 = vpop.permute.xlu0 %2834  ;;  %v6687_v48 = vld [vmem:[#allocation2 + $0xf0] sm:$0xff] }
 0x476   :  { %v2390_v42 = vmul.f32 %v2374_v13, %v2326_v21  ;;  %2786 = vrot.lane.b32.xlu1 %v2485_v33, %s5096_s20 }
 0x477   :  { %2722 = vrot.lane.b32.xlu0 %v6654_v29, %s5095_s25  ;;  %v2389_v6 = vmul.f32 %v2373_v20, %v2325_v39 }
 0x478   :  { %2406 = vst.msk [vmem:[#allocation2 + $0x121] sm:$0xff] %vm193_vm3, %v2390_v42  ;;  %v2897_v51 = vpop.permute.xlu1 %2896 }
 0x479   :  { %2405 = vst.msk [vmem:[#allocation2 + $0x111] sm:$0xff] %vm193_vm3, %v2389_v6  ;;  %v6661_v23 = vpop.permute.xlu0 %2578 }
 0x47a   :  { %2660 = vrot.lane.b32.xlu1 %v2454_v0, %s5094_s0 }
 0x47b   :  { %2596 = vrot.lane.b32.xlu0 %v2485_v33, %s5093_s19 }
 0x47c   :  { %v2961_v46 = vpop.permute.xlu1 %2960 }
 0x47d   :  { %v2643_v61 = vpop.permute.xlu0 %2642 }
 0x47e   :  { %2912 = vrot.lane.b32.xlu1 %v6654_v29, %s5098_s27 }
 0x47f   :  { %2850 = vrot.lane.b32.xlu0 %v2454_v0, %s5097_s21  ;;  %v2471_v47 = vld [vmem:[#allocation2 + $0x120] sm:$0xff] }
 0x480   :  { %v3025_v2 = vpop.permute.xlu1 %3024  ;;  %v6709_v21 = vld [vmem:[#allocation2 + $0x122] sm:$0xff]  ;;  %v6714_v42 = vld [vmem:[#allocation2 + $0x110] sm:$0xff] }
 0x481   :  { %v2895_v28 = vpop.permute.xlu0 %2894  ;;  %v2487_v20 = vld [vmem:[#allocation2 + $0x121] sm:$0xff] }
 0x482   :  { %2976 = vrot.lane.b32.xlu1 %v2485_v33, %s5099_s4  ;;  %v3147_v8 = vsel %vm951_vm8, %v3131_v59, %v2895_v28 }
 0x483   :  { %2594 = vrot.lane.b32.xlu0 %v2437_v63, %s5093_s19 }
 0x484   :  { %v2705_v53 = vpop.permute.xlu1 %2704 }
 0x485   :  { %v2959_v10 = vpop.permute.xlu0 %2958  ;;  %v3100_v56 = vsel %vm900_vm5, %v3084_v16, %v2705_v53  ;;  %v2502_v53 = vld [vmem:[#allocation2 + $0x112] sm:$0xff] }
 0x486   :  { %3040 = vrot.lane.b32.xlu1 %v2454_v0, %s5100_s7  ;;  %v3163_v50 = vsel %vm968_vm9, %v3147_v8, %v2959_v10 }
 0x487   :  { %2658 = vrot.lane.b32.xlu0 %v2453_v31, %s5094_s0 }
 0x488   :  { %v2769_v4 = vpop.permute.xlu1 %2768 }
 0x489   :  { %v2833_v55 = vpop.permute.xlu0 %2832  ;;  %v3116_v37 = vsel %vm917_vm6, %v3100_v56, %v2769_v4 }
 0x48a   :  { %v3132_v62 = vsel %vm934_vm7, %v3116_v37, %v2833_v55  ;;  %2720 = vrot.lane.b32.xlu1 %v6687_v48, %s5095_s25 }
 0x48b   :  { %2910 = vrot.lane.b32.xlu0 %v6687_v48, %s5098_s27  ;;  %v3148_v27 = vsel %vm951_vm8, %v3132_v62, %v2897_v51  ;;  %v3069_v51 = vsel %vm193_vm3, %v6471_v58, %v6661_v23  ;;  %v3070_v58 = vsel %vm193_vm3, %v6457_v36, %v6646_v34 }
 0x48c   :  { %v3023_v35 = vpop.permute.xlu1 %3022  ;;  %v3164_v54 = vsel %vm968_vm9, %v3148_v27, %v2961_v46  ;;  %v3085_v12 = vsel %vm11_vm0, %v3069_v51, %v2643_v61  ;;  %v3086_v23 = vsel %vm11_vm0, %v3070_v58, %v6650_v22 }
 0x48d   :  { %v2711_v3 = vpop.permute.xlu0 %2710  ;;  %v3179_v44 = vsel %vm985_vm10, %v3163_v50, %v3023_v35  ;;  %v3180_v32 = vsel %vm985_vm10, %v3164_v54, %v3025_v2  ;;  %v2486_v2 = vld [vmem:[#allocation2 + $0x111] sm:$0xff] }
 0x48e   :  { %2784 = vrot.lane.b32.xlu1 %v2437_v63, %s5096_s20  ;;  %4846 = vmatmul.mubr.msk.f32.gmra.mrb[18].mxu0 %vm1011_vm11, %v3179_v44 }
 0x48f   :  { %2974 = vrot.lane.b32.xlu0 %v2437_v63, %s5099_s4  ;;  %4848 = vmatprep.mubr.msk.f32.mxu0 %vm1011_vm11, %v3180_v32 }
 0x490   :  { %v2775_v26 = vpop.permute.xlu1 %2774 }
 0x491   :  { %v2839_v24 = vpop.permute.xlu0 %2838 }
 0x492   :  { %3038 = vrot.lane.b32.xlu1 %v2453_v31, %s5100_s7 }
 0x493   :  { %2848 = vrot.lane.b32.xlu0 %v2453_v31, %s5097_s21 }
 0x494   :  { %v2901_v43 = vpop.permute.xlu1 %2900 }
 0x495   :  { %v2583_v7 = vpop.permute.xlu0 %2582 }
 0x496   :  { %2854 = vrot.lane.b32.xlu1 %v6709_v21, %s5097_s21  ;;  %v3071_v33 = vsel %vm193_vm3, %v6507_v60, %v2583_v7  ;;  %v3101_v60 = vsel %vm900_vm5, %v3085_v12, %v6635_v45  ;;  %v2551_v45 = vld [vmem:[#allocation2 + $0x132] sm:$0xff] }
 0x497   :  { %2726 = vrot.lane.b32.xlu0 %v2471_v47, %s5095_s25  ;;  %v3117_v61 = vsel %vm917_vm6, %v3101_v60, %v6644_v15 }
 0x498   :  { %v2965_v13 = vpop.permute.xlu1 %2964  ;;  %v3133_v36 = vsel %vm934_vm7, %v3117_v61, %v6652_v57  ;;  %v3597_v61 = vld [vmem:[#allocation2 + $0x90] sm:$0xff] }
 0x499   :  { %v2647_v39 = vpop.permute.xlu0 %2646 }
 0x49a   :  { %2724 = vrot.lane.b32.xlu1 %v6714_v42, %s5095_s25  ;;  %v3087_v6 = vsel %vm11_vm0, %v3071_v33, %v2647_v39  ;;  %s5102_s25 = smov 48  }
 0x49b   :  { %2790 = vrot.lane.b32.xlu0 %v2487_v20, %s5096_s20  ;;  %v3103_v28 = vsel %vm900_vm5, %v3087_v6, %v2711_v3 }
 0x49c   :  { %v3029_v0 = vpop.permute.xlu1 %3028  ;;  %v3119_v25 = vsel %vm917_vm6, %v3103_v28, %v2775_v26  ;;  %v2416_v26 = vld [vmem:[#allocation2 + $0xa0] sm:$0xff] }
 0x49d   :  { %v2899_v46 = vpop.permute.xlu0 %2898  ;;  %v3135_v10 = vsel %vm934_vm7, %v3119_v25, %v2839_v24  ;;  %v3526_v28 = vld [vmem:[#allocation2 + $0x2] sm:$0xff] }
 0x49e   :  { %2788 = vrot.lane.b32.xlu1 %v2486_v2, %s5096_s20  ;;  %v3149_v15 = vsel %vm951_vm8, %v3133_v36, %v2899_v46  ;;  %v3151_v56 = vsel %vm951_vm8, %v3135_v10, %v6509_v14  ;;  %v3518_v25 = vld [vmem:[#allocation2 + $0xa1] sm:$0xff]  ;;  %v3613_v10 = vld [vmem:[#allocation2 + $0x91] sm:$0xff] }
 0x49f   :  { %2916 = vrot.lane.b32.xlu0 %v2471_v47, %s5098_s27  ;;  %v3167_v8 = vsel %vm968_vm9, %v3151_v56, %v6521_v5 }
 0x4a0   :  { %v2709_v63 = vpop.permute.xlu1 %2708  ;;  %v3183_v50 = vsel %vm985_vm10, %v3167_v8, %v6490_v17  ;;  %v3072_v17 = vsel %vm193_vm3, %v2416_v26, %v6501_v9 }
 0x4a1   :  { %v2963_v18 = vpop.permute.xlu0 %2962  ;;  %v3102_v31 = vsel %vm900_vm5, %v3086_v23, %v2709_v63  ;;  %v3088_v47 = vsel %vm11_vm0, %v3072_v17, %v6479_v40  ;;  %v3605_v23 = vld [vmem:[#allocation2 + $0x130] sm:$0xff] }
 0x4a2   :  { %2852 = vrot.lane.b32.xlu1 %v2502_v53, %s5097_s21  ;;  %v3165_v4 = vsel %vm968_vm9, %v3149_v15, %v2963_v18  ;;  %v3629_v18 = vld [vmem:[#allocation2 + $0x92] sm:$0xff]  ;;  %s5103_s21 = smov 56  }
 0x4a3   :  { %2980 = vrot.lane.b32.xlu0 %v2487_v20, %s5099_s4 }
 0x4a4   :  { %v2773_v49 = vpop.permute.xlu1 %2772 }
 0x4a5   :  { %v2837_v16 = vpop.permute.xlu0 %2836  ;;  %v3118_v1 = vsel %vm917_vm6, %v3102_v31, %v2773_v49 }
 0x4a6   :  { %v3134_v34 = vsel %vm934_vm7, %v3118_v1, %v2837_v16  ;;  %3046 = vrot.lane.b32.xlu1 %v2551_v45, %s5100_s7  ;;  %v3621_v45 = vld [vmem:[#allocation2 + $0x131] sm:$0xff] }
 0x4a7   :  { %2598 = vrot.lane.b32.xlu0 %v2486_v2, %s5093_s19  ;;  %v3150_v22 = vsel %vm951_vm8, %v3134_v34, %v2901_v43  ;;  %s5101_s19 = smov 64  }
 0x4a8   :  { %v3027_v55 = vpop.permute.xlu1 %3026  ;;  %v3166_v59 = vsel %vm968_vm9, %v3150_v22, %v2965_v13 }
 0x4a9   :  { %v6754_v37 = vpop.permute.xlu0 %2714  ;;  %v3181_v57 = vsel %vm985_vm10, %v3165_v4, %v3027_v55  ;;  %v3182_v62 = vsel %vm985_vm10, %v3166_v59, %v3029_v0  ;;  %v3510_v0 = vld [vmem:[#allocation2 + $0x1] sm:$0xff] }
 0x4aa   :  { %4849 = vmatmul.mubr.msk.f32.gmra.mrb[20].mxu0 %vm1011_vm11, %v3181_v57 }
 0x4ab   :  { %2662 = vrot.lane.b32.xlu0 %v2502_v53, %s5094_s0  ;;  %4851 = vmatprep.mubr.msk.f32.mxu0 %vm1011_vm11, %v3182_v62 }
 0x4ac   :  { %v6764_v14 = vpop.permute.xlu1 %2778 }
 0x4ad   :  { %v6766_v27 = vpop.permute.xlu0 %2588 }
 0x4ae   :  { %4852 = vmatmul.mubr.msk.f32.gmra.mrb[22].mxu0 %vm1011_vm11, %v3183_v50 }
 0x4af   :  { %2914 = vrot.lane.b32.xlu0 %v6714_v42, %s5098_s27 }
 0x4b0   :  { %v6773_v35 = vpop.permute.xlu1 %2652 }
 0x4b1   :  { %v6775_v3 = vpop.permute.xlu0 %2842 }
 0x4b3   :  { %2978 = vrot.lane.b32.xlu0 %v2486_v2, %s5099_s4  ;;  %v3534_v2 = vld [vmem:[#allocation2 + $0xa2] sm:$0xff] }
 0x4b4   :  { %v2905_v5 = vpop.permute.xlu1 %2904  ;;  %3734 = vrot.lane.b32.xlu1 %v3534_v2, %s5096_s20 }
 0x4b5   :  { %v2587_v54 = vpop.permute.xlu0 %2586 }
 0x4b6   :  { %v3073_v49 = vsel %vm193_vm3, %v6563_v38, %v2587_v54  ;;  %v3074_v38 = vsel %vm193_vm3, %v6529_v41, %v6766_v27 }
 0x4b7   :  { %3042 = vrot.lane.b32.xlu0 %v2502_v53, %s5100_s7  ;;  %v3090_v55 = vsel %vm11_vm0, %v3074_v38, %v6773_v35 }
 0x4b8   :  { %v2969_v44 = vpop.permute.xlu1 %2968  ;;  %4116 = vrot.lane.b32.xlu1 %v3629_v18, %s5101_s19 }
 0x4b9   :  { %v2651_v24 = vpop.permute.xlu0 %2650 }
 0x4ba   :  { %v3089_v1 = vsel %vm11_vm0, %v3073_v49, %v2651_v24 }
 0x4bb   :  { %3044 = vrot.lane.b32.xlu0 %v6709_v21, %s5100_s7  ;;  %v3105_v34 = vsel %vm900_vm5, %v3089_v1, %v6754_v37 }
 0x4bc   :  { %v3033_v32 = vpop.permute.xlu1 %3032  ;;  %4004 = vrot.lane.b32.xlu1 %v3605_v23, %s5102_s25  ;;  %v3121_v22 = vsel %vm917_vm6, %v3105_v34, %v6764_v14 }
 0x4bd   :  { %v2841_v7 = vpop.permute.xlu0 %2840  ;;  %v3137_v57 = vsel %vm934_vm7, %v3121_v22, %v6775_v3 }
 0x4bf   :  { %3654 = vrot.lane.b32.xlu0 %v3510_v0, %s5094_s0 }
 0x4c0   :  { %v2713_v43 = vpop.permute.xlu1 %2712  ;;  %4068 = vrot.lane.b32.xlu1 %v3621_v45, %s5103_s21 }
 0x4c1   :  { %v3104_v13 = vsel %vm900_vm5, %v3088_v47, %v2713_v43 }
 0x4c3   :  { %3718 = vrot.lane.b32.xlu0 %v3526_v28, %s5096_s20 }
 0x4c4   :  { %v2777_v39 = vpop.permute.xlu1 %2776 }
 0x4c5   :  { %v3120_v20 = vsel %vm917_vm6, %v3104_v13, %v2777_v39 }
 0x4c6   :  { %v3136_v33 = vsel %vm934_vm7, %v3120_v20, %v2841_v7 }
 0x4c7   :  { %v3152_v21 = vsel %vm951_vm8, %v3136_v33, %v2905_v5  ;;  %3670 = vrot.lane.b32.xlu0 %v3518_v25, %s5094_s0 }
 0x4c8   :  { %v6791_v51 = vpop.permute.xlu1 %2782  ;;  %v3168_v9 = vsel %vm968_vm9, %v3152_v21, %v2969_v44 }
 0x4c9   :  { %v6789_v6 = vpop.permute.xlu0 %2718  ;;  %v3184_v46 = vsel %vm985_vm10, %v3168_v9, %v3033_v32 }
 0x4ca   :  { %4854 = vmatprep.mubr.msk.f32.mxu0 %vm1011_vm11, %v3184_v46 }
 0x4cb   :  { %3988 = vrot.lane.b32.xlu0 %v3597_v61, %s5102_s25 }
 0x4cc   :  { %v6799_v12 = vpop.permute.xlu1 %2656 }
 0x4cd   :  { %v6797_v40 = vpop.permute.xlu0 %2592 }
 0x4ce   :  { %v3076_v0 = vsel %vm193_vm3, %v6582_v30, %v6797_v40 }
 0x4cf   :  { %4052 = vrot.lane.b32.xlu0 %v3613_v10, %s5103_s21 }
 0x4d0   :  { %v2909_v63 = vpop.permute.xlu1 %2908 }
 0x4d1   :  { %v6803_v60 = vpop.permute.xlu0 %2846 }
 0x4d4   :  { %v2973_v58 = vpop.permute.xlu1 %2972 }
 0x4d5   :  { %v2591_v53 = vpop.permute.xlu0 %2590 }
 0x4d6   :  { %v3075_v13 = vsel %vm193_vm3, %v6620_v52, %v2591_v53  ;;  %v3092_v52 = vsel %vm11_vm0, %v3076_v0, %v6799_v12 }
 0x4d8   :  { %v3037_v16 = vpop.permute.xlu1 %3036 }
 0x4d9   :  { %v2655_v31 = vpop.permute.xlu0 %2654 }
 0x4da   :  { %v3091_v20 = vsel %vm11_vm0, %v3075_v13, %v2655_v31 }
 0x4db   :  { %v3107_v21 = vsel %vm900_vm5, %v3091_v20, %v6789_v6 }
 0x4dc   :  { %v2717_v15 = vpop.permute.xlu1 %2716  ;;  %v3123_v46 = vsel %vm917_vm6, %v3107_v21, %v6791_v51 }
 0x4dd   :  { %v2907_v36 = vpop.permute.xlu0 %2906  ;;  %v3106_v59 = vsel %vm900_vm5, %v3090_v55, %v2717_v15  ;;  %v3139_v18 = vsel %vm934_vm7, %v3123_v46, %v6803_v60 }
 0x4de   :  { %v3153_v37 = vsel %vm951_vm8, %v3137_v57, %v2907_v36 }
 0x4e0   :  { %v2781_v4 = vpop.permute.xlu1 %2780 }
 0x4e1   :  { %v2971_v56 = vpop.permute.xlu0 %2970  ;;  %v3122_v62 = vsel %vm917_vm6, %v3106_v59, %v2781_v4 }
 0x4e2   :  { %v3169_v14 = vsel %vm968_vm9, %v3153_v37, %v2971_v56 }
 0x4e4   :  { %v3035_v50 = vpop.permute.xlu1 %3034 }
 0x4e5   :  { %v2845_v8 = vpop.permute.xlu0 %2844  ;;  %v3185_v41 = vsel %vm985_vm10, %v3169_v14, %v3035_v50 }
 0x4e6   :  { %v3138_v5 = vsel %vm934_vm7, %v3122_v62, %v2845_v8  ;;  %4855 = vmatmul.mubr.msk.f32.gmra.mrb[24].mxu0 %vm1011_vm11, %v3185_v41 }
 0x4e7   :  { %v3154_v27 = vsel %vm951_vm8, %v3138_v5, %v2909_v63 }
 0x4e8   :  { %v3170_v35 = vsel %vm968_vm9, %v3154_v27, %v2973_v58  ;;  %v2787_v44 = vpop.permute.xlu1 %2786 }
 0x4e9   :  { %v2723_v54 = vpop.permute.xlu0 %2722  ;;  %v3186_v3 = vsel %vm985_vm10, %v3170_v35, %v3037_v16 }
 0x4ea   :  { %4857 = vmatprep.mubr.msk.f32.mxu0 %vm1011_vm11, %v3186_v3 }
 0x4ec   :  { %v2661_v26 = vpop.permute.xlu1 %2660 }
 0x4ed   :  { %v2597_v32 = vpop.permute.xlu0 %2596 }
 0x4ee   :  { %v3078_v55 = vsel %vm193_vm3, %v6654_v29, %v2597_v32 }
 0x4f0   :  { %v2913_v17 = vpop.permute.xlu1 %2912 }
 0x4f1   :  { %v2851_v24 = vpop.permute.xlu0 %2850 }
 0x4f4   :  { %v2977_v7 = vpop.permute.xlu1 %2976 }
 0x4f5   :  { %v2595_v43 = vpop.permute.xlu0 %2594 }
 0x4f6   :  { %v3077_v36 = vsel %vm193_vm3, %v6687_v48, %v2595_v43  ;;  %v3094_v48 = vsel %vm11_vm0, %v3078_v55, %v2661_v26  ;;  %v4282_v55 = vld [vmem:[%s7462_s1 + $0x6c] sm:$0xff] }
 0x4f8   :  { %v3041_v39 = vpop.permute.xlu1 %3040 }
 0x4f9   :  { %v2659_v47 = vpop.permute.xlu0 %2658 }
 0x4fa   :  { %v3093_v22 = vsel %vm11_vm0, %v3077_v36, %v2659_v47  ;;  %v6896_v47 = vld [vmem:[%s7462_s1 + $0xb6] ss:$0 sm:$0xff] }
 0x4fb   :  { %v3109_v59 = vsel %vm900_vm5, %v3093_v22, %v2723_v54 }
 0x4fc   :  { %v2721_v9 = vpop.permute.xlu1 %2720 }
 0x4fd   :  { %v2911_v33 = vpop.permute.xlu0 %2910  ;;  %v3108_v63 = vsel %vm900_vm5, %v3092_v52, %v2721_v9 }
 0x4fe   :  { %v3155_v6 = vsel %vm951_vm8, %v3139_v18, %v2911_v33 }
 0x500   :  { %v2785_v28 = vpop.permute.xlu1 %2784 }
 0x501   :  { %v2975_v2 = vpop.permute.xlu0 %2974  ;;  %v3124_v25 = vsel %vm917_vm6, %v3108_v63, %v2785_v28 }
 0x502   :  { %v3171_v30 = vsel %vm968_vm9, %v3155_v6, %v2975_v2 }
 0x504   :  { %v3039_v40 = vpop.permute.xlu1 %3038 }
 0x505   :  { %v2849_v53 = vpop.permute.xlu0 %2848  ;;  %v3187_v58 = vsel %vm985_vm10, %v3171_v30, %v3039_v40 }
 0x506   :  { %v3140_v51 = vsel %vm934_vm7, %v3124_v25, %v2849_v53  ;;  %4858 = vmatmul.mubr.msk.f32.gmra.mrb[26].mxu0 %vm1011_vm11, %v3187_v58 }
 0x507   :  { %v3156_v23 = vsel %vm951_vm8, %v3140_v51, %v2913_v17 }
 0x508   :  { %v3172_v12 = vsel %vm968_vm9, %v3156_v23, %v2977_v7  ;;  %v2855_v31 = vpop.permute.xlu1 %2854 }
 0x509   :  { %v2727_v61 = vpop.permute.xlu0 %2726  ;;  %v3188_v60 = vsel %vm985_vm10, %v3172_v12, %v3041_v39 }
 0x50a   :  { %4860 = vmatprep.mubr.msk.f32.mxu0 %vm1011_vm11, %v3188_v60 }
 0x50c   :  { %v2725_v16 = vpop.permute.xlu1 %2724 }
 0x50d   :  { %v2791_v45 = vpop.permute.xlu0 %2790  ;;  %v3110_v8 = vsel %vm900_vm5, %v3094_v48, %v2725_v16 }
 0x510   :  { %v2789_v56 = vpop.permute.xlu1 %2788 }
 0x511   :  { %v2917_v10 = vpop.permute.xlu0 %2916  ;;  %v3126_v50 = vsel %vm917_vm6, %v3110_v8, %v2789_v56  ;;  %v4285_v8 = vld [vmem:[%s7462_s1 + $0x84] sm:$0xff] }
 0x514   :  { %v2853_v62 = vpop.permute.xlu1 %2852 }
 0x515   :  { %v2981_v49 = vpop.permute.xlu0 %2980  ;;  %v3142_v41 = vsel %vm934_vm7, %v3126_v50, %v2853_v62 }
 0x518   :  { %v3047_v26 = vpop.permute.xlu1 %3046 }
 0x519   :  { %v2599_v1 = vpop.permute.xlu0 %2598 }
 0x51a   :  { %v3079_v34 = vsel %vm193_vm3, %v6714_v42, %v2599_v1  ;;  %v3125_v42 = vsel %vm917_vm6, %v3109_v59, %v2787_v44  ;;  %v3158_v44 = vsel %vm951_vm8, %v3142_v41, %v2917_v10  ;;  %v4283_v59 = vld [vmem:[%s7462_s1 + $0x74] sm:$0xff] }
 0x51b   :  { %v3141_v29 = vsel %vm934_vm7, %v3125_v42, %v2851_v24  ;;  %v3174_v24 = vsel %vm968_vm9, %v3158_v44, %v2981_v49  ;;  %v4284_v42 = vld [vmem:[%s7462_s1 + $0x7c] sm:$0xff]  ;;  %v4287_v44 = vld [vmem:[%s7462_s1 + $0x94] sm:$0xff] }
 0x51d   :  { %v2663_v15 = vpop.permute.xlu0 %2662 }
 0x51e   :  { %v3095_v38 = vsel %vm11_vm0, %v3079_v34, %v2663_v15 }
 0x51f   :  { %v3111_v4 = vsel %vm900_vm5, %v3095_v38, %v2727_v61 }
 0x520   :  { %v3127_v37 = vsel %vm917_vm6, %v3111_v4, %v2791_v45 }
 0x521   :  { %v2915_v57 = vpop.permute.xlu0 %2914  ;;  %v3143_v5 = vsel %vm934_vm7, %v3127_v37, %v2855_v31  ;;  %v4932_v37 = vpack.c.bf16 %v4283_v59, %v4282_v55 }
 0x522   :  { %v3157_v27 = vsel %vm951_vm8, %v3141_v29, %v2915_v57  ;;  %v3159_v35 = vsel %vm951_vm8, %v3143_v5, %v6497_v11  ;;  %v4936_v5 = vpack.c.bf16 %v4285_v8, %v4284_v42 }
 0x523   :  { %v3175_v17 = vsel %vm968_vm9, %v3159_v35, %v6505_v19  ;;  %4933 = vmatprep.subr.bf16.mxu1 %v4932_v37 }
 0x524   :  { %v3191_v11 = vsel %vm985_vm10, %v3175_v17, %v3047_v26  ;;  %4935 = vmatpush3.bf16.msra.mxu1 %v4932_v37 }
 0x525   :  { %v2979_v14 = vpop.permute.xlu0 %2978  ;;  %4937 = vmatprep.subr.bf16.mxu1 %v4936_v5 }
 0x526   :  { %v3173_v54 = vsel %vm968_vm9, %v3157_v27, %v2979_v14 }
 0x528   :  { %4939 = vmatpush3.bf16.msra.mxu1 %v4936_v5 }
 0x529   :  { %v3043_v3 = vpop.permute.xlu0 %3042 }
 0x52a   :  { %v3189_v32 = vsel %vm985_vm10, %v3173_v54, %v3043_v3  ;;  %v4286_v3 = vld [vmem:[%s7462_s1 + $0x8c] sm:$0xff] }
 0x52b   :  { %4861 = vmatmul.mubr.msk.f32.gmra.mrb[28].mxu0 %vm1011_vm11, %v3189_v32  ;;  %v4940_v26 = vpack.c.bf16 %v4287_v44, %v4286_v3 }
 0x52d   :  { %v3045_v43 = vpop.permute.xlu0 %3044  ;;  %4941 = vmatprep.subr.bf16.mxu1 %v4940_v26 }
 0x52e   :  { %v3190_v7 = vsel %vm985_vm10, %v3174_v24, %v3045_v43  ;;  %v4288_v24 = vld [vmem:[%s7462_s1 + $0x9c] sm:$0xff]  ;;  %v4289_v43 = vld [vmem:[%s7462_s1 + $0xa4] sm:$0xff]  ;;  %4943 = vmatpush3.bf16.msra.mxu1 %v4940_v26 }
 0x52f   :  { %4863 = vmatprep.mubr.msk.f32.mxu0 %vm1011_vm11, %v3190_v7  ;;  %v4944_v7 = vpack.c.bf16 %v4289_v43, %v4288_v24 }
 0x530   :  { %4864 = vmatmul.mubr.msk.f32.gmra.mrb[30].mxu0 %vm1011_vm11, %v3191_v11 }
 0x531   :  { %4945 = vmatprep.subr.bf16.mxu1 %v4944_v7 }
 0x532   :  { %4947 = vmatpush3.bf16.msra.mxu1 %v4944_v7 }
 0x541   :  { %v4844_v13 = vpop.f32.mrb[16].mxu0 }
 0x542   :  { %v3324_v39 = vadd.f32 %v4844_v13, %v6896_v47  ;;  %v3318_v19 = vpop.f32.mrb[17].mxu0 }
 0x543   :  { %v3319_v20 = vadd.f32 %v6896_v47, %v3318_v19 }
 0x544   :  { %v3414_v33 = vmul.f32 0.70710677, %v3324_v39  ;;  %v3398_v46 = vmul.f32 0.5, %v3324_v39 }
 0x545   :  { %v3413_v21 = vmul.f32 0.70710677, %v3319_v20  ;;  %v3397_v28 = vmul.f32 0.5, %v3319_v20 }
 0x546   :  { %5026 = verf.f32 %v3414_v33 }
 0x547   :  { %5028 = verf.f32 %v3413_v21 }
 0x550   :  { %v5027_v9 = vpop.eup %5026 }
 0x551   :  { %v5029_v0 = vpop.eup %5028  ;;  %v3446_v2 = vadd.f32 1.0, %v5027_v9  ;;  %v4290_v9 = vld [vmem:[%s7462_s1 + $0xac] sm:$0xff] }
 0x552   :  { %v3445_v52 = vadd.f32 1.0, %v5029_v0  ;;  %4882 = vmatprep.subr.mxu1 %v4290_v9 }
 0x553   :  { %v3462_v63 = vmul.f32 %v3446_v2, %v3398_v46  ;;  %4883 = vmatpush3.msra.mxu1 %v4290_v9 }
 0x554   :  { %v3461_v18 = vmul.f32 %v3445_v52, %v3397_v28 }
 0x555   :  { %3478 = vst.msk [vmem:[#allocation2 + $0x21] sm:$0xff] %vm11_vm0, %v3462_v63 }
 0x556   :  { %3477 = vst.msk [vmem:[#allocation2 + $0x11] sm:$0xff] %vm11_vm0, %v3461_v18 }
 0x55c   :  { %v6902_v6 = vld [vmem:[#allocation2 + $0x20] sm:$0xff] }
 0x55d   :  { %v3559_v25 = vld [vmem:[#allocation2 + $0x21] sm:$0xff]  ;;  %3784 = vrot.lane.b32.xlu1 %v6902_v6, %s5098_s27  ;;  %v6911_v12 = vld [vmem:[#allocation2 + $0x10] sm:$0xff] }
 0x55e   :  { %3848 = vrot.lane.b32.xlu0 %v3559_v25, %s5100_s7  ;;  %v3575_v53 = vld [vmem:[#allocation2 + $0x22] sm:$0xff]  ;;  %v3558_v60 = vld [vmem:[#allocation2 + $0x11] sm:$0xff] }
 0x55f   :  { %v3527_v15 = vld [vmem:[#allocation2 + $0x12] sm:$0xff] }
 0x561   :  { %3658 = vrot.lane.b32.xlu1 %v3559_v25, %s5094_s0  ;;  %v4847_v30 = vpop.f32.mrb[18].mxu0 }
 0x562   :  { %3912 = vrot.lane.b32.xlu0 %v3575_v53, %s5104_s12  ;;  %v3334_v40 = vadd.f32 %v4847_v30, %v6896_v47  ;;  %v3328_v51 = vpop.f32.mrb[19].mxu0 }
 0x563   :  { %v3329_v58 = vadd.f32 %v6896_v47, %v3328_v51 }
 0x564   :  { %v3416_v23 = vmul.f32 0.70710677, %v3334_v40  ;;  %v3400_v31 = vmul.f32 0.5, %v3334_v40 }
 0x565   :  { %v3415_v61 = vmul.f32 0.70710677, %v3329_v58  ;;  %3722 = vrot.lane.b32.xlu1 %v3575_v53, %s5096_s20  ;;  %v3399_v16 = vmul.f32 0.5, %v3329_v58 }
 0x566   :  { %3782 = vrot.lane.b32.xlu0 %v6911_v12, %s5098_s27  ;;  %5030 = verf.f32 %v3416_v23 }
 0x567   :  { %5032 = verf.f32 %v3415_v61 }
 0x569   :  { %3974 = vrot.lane.b32.xlu1 %v6902_v6, %s5102_s25 }
 0x56a   :  { %3846 = vrot.lane.b32.xlu0 %v3558_v60, %s5100_s7 }
 0x56d   :  { %4038 = vrot.lane.b32.xlu1 %v3559_v25, %s5103_s21 }
 0x570   :  { %v5031_v45 = vpop.eup %5030 }
 0x571   :  { %v5033_v10 = vpop.eup %5032  ;;  %v3448_v49 = vadd.f32 1.0, %v5031_v45  ;;  %4102 = vrot.lane.b32.xlu1 %v3575_v53, %s5101_s19 }
 0x572   :  { %v3447_v1 = vadd.f32 1.0, %v5033_v10  ;;  %v7006_v10 = vpop.permute.xlu1 %3734 }
 0x573   :  { %v3464_v36 = vmul.f32 %v3448_v49, %v3400_v31 }
 0x574   :  { %v3463_v34 = vmul.f32 %v3447_v1, %v3399_v16 }
 0x575   :  { %3480 = vst.msk [vmem:[#allocation2 + $0x41] sm:$0xff] %vm11_vm0, %v3464_v36  ;;  %3656 = vrot.lane.b32.xlu1 %v3558_v60, %s5094_s0  ;;  %v7012_v36 = vpop.permute.xlu0 %3654 }
 0x576   :  { %3479 = vst.msk [vmem:[#allocation2 + $0x31] sm:$0xff] %vm11_vm0, %v3463_v34 }
 0x579   :  { %3720 = vrot.lane.b32.xlu1 %v3527_v15, %s5096_s20  ;;  %v7018_v59 = vpop.permute.xlu0 %3718 }
 0x57c   :  { %v6925_v22 = vld [vmem:[#allocation2 + $0x40] sm:$0xff] }
 0x57d   :  { %3910 = vrot.lane.b32.xlu1 %v3527_v15, %s5104_s12  ;;  %3788 = vrot.lane.b32.xlu0 %v6925_v22, %s5098_s27  ;;  %v4850_v56 = vpop.f32.mrb[20].mxu0  ;;  %v3561_v62 = vld [vmem:[#allocation2 + $0x41] sm:$0xff]  ;;  %v3513_v17 = vld [vmem:[#allocation2 + $0x31] sm:$0xff] }
 0x57e   :  { %v3344_v38 = vadd.f32 %v4850_v56, %v6896_v47  ;;  %v3338_v4 = vpop.f32.mrb[21].mxu0  ;;  %v3530_v54 = vld [vmem:[#allocation2 + $0x42] sm:$0xff]  ;;  %v3529_v13 = vld [vmem:[#allocation2 + $0x32] sm:$0xff] }
 0x57f   :  { %v3339_v57 = vadd.f32 %v6896_v47, %v3338_v4  ;;  %v6970_v28 = vld [vmem:[#allocation2 + $0x30] sm:$0xff] }
 0x580   :  { %v3418_v48 = vmul.f32 0.70710677, %v3344_v38  ;;  %v3402_v19 = vmul.f32 0.5, %v3344_v38  ;;  %v7016_v38 = vpop.permute.xlu1 %4116 }
 0x581   :  { %v3417_v14 = vmul.f32 0.70710677, %v3339_v57  ;;  %3852 = vrot.lane.b32.xlu1 %v3561_v62, %s5100_s7  ;;  %3662 = vrot.lane.b32.xlu0 %v3561_v62, %s5094_s0  ;;  %v4853_v50 = vpop.f32.mrb[22].mxu0  ;;  %v3401_v33 = vmul.f32 0.5, %v3339_v57 }
 0x582   :  { %5034 = verf.f32 %v3418_v48  ;;  %v3354_v41 = vadd.f32 %v4853_v50, %v6896_v47  ;;  %v3348_v29 = vpop.f32.mrb[23].mxu0  ;;  %v7026_v48 = vpop.permute.xlu0 %3670 }
 0x583   :  { %5036 = verf.f32 %v3417_v14  ;;  %v3349_v27 = vadd.f32 %v6896_v47, %v3348_v29 }
 0x584   :  { %v3420_v35 = vmul.f32 0.70710677, %v3354_v41  ;;  %v3404_v63 = vmul.f32 0.5, %v3354_v41  ;;  %v7022_v57 = vpop.permute.xlu1 %4004 }
 0x585   :  { %v3419_v32 = vmul.f32 0.70710677, %v3349_v27  ;;  %3726 = vrot.lane.b32.xlu1 %v3530_v54, %s5096_s20  ;;  %3916 = vrot.lane.b32.xlu0 %v3530_v54, %s5104_s12  ;;  %v3403_v25 = vmul.f32 0.5, %v3349_v27 }
 0x586   :  { %5038 = verf.f32 %v3420_v35  ;;  %v7035_v3 = vpop.permute.xlu0 %3988 }
 0x587   :  { %5040 = verf.f32 %v3419_v32 }
 0x588   :  { %v7030_v5 = vpop.permute.xlu1 %4068 }
 0x589   :  { %3978 = vrot.lane.b32.xlu1 %v6925_v22, %s5102_s25  ;;  %3660 = vrot.lane.b32.xlu0 %v3513_v17, %s5094_s0 }
 0x58a   :  { %v7046_v32 = vpop.permute.xlu0 %4052 }
 0x58c   :  { %v5035_v11 = vpop.eup %5034 }
 0x58d   :  { %v5037_v39 = vpop.eup %5036  ;;  %v3450_v20 = vadd.f32 1.0, %v5035_v11  ;;  %4042 = vrot.lane.b32.xlu1 %v3561_v62, %s5103_s21  ;;  %3724 = vrot.lane.b32.xlu0 %v3529_v13, %s5096_s20 }
 0x58e   :  { %v3449_v21 = vadd.f32 1.0, %v5037_v39 }
 0x58f   :  { %v3466_v0 = vmul.f32 %v3450_v20, %v3402_v19 }
 0x590   :  { %v5039_v46 = vpop.eup %5038  ;;  %v3465_v2 = vmul.f32 %v3449_v21, %v3401_v33 }
 0x591   :  { %v5041_v52 = vpop.eup %5040  ;;  %3482 = vst.msk [vmem:[#allocation2 + $0x61] sm:$0xff] %vm11_vm0, %v3466_v0  ;;  %v3452_v18 = vadd.f32 1.0, %v5039_v46  ;;  %4106 = vrot.lane.b32.xlu1 %v3530_v54, %s5101_s19  ;;  %3976 = vrot.lane.b32.xlu0 %v6970_v28, %s5102_s25 }
 0x592   :  { %3481 = vst.msk [vmem:[#allocation2 + $0x51] sm:$0xff] %vm11_vm0, %v3465_v2  ;;  %v3451_v53 = vadd.f32 1.0, %v5041_v52 }
 0x593   :  { %v3468_v30 = vmul.f32 %v3452_v18, %v3404_v63  ;;  %v3494_v18 = vld [vmem:[#allocation2] sm:$0xff] }
 0x594   :  { %v3467_v40 = vmul.f32 %v3451_v53, %v3403_v25 }
 0x595   :  { %3484 = vst.msk [vmem:[#allocation2 + $0x81] sm:$0xff] %vm11_vm0, %v3468_v30  ;;  %3786 = vrot.lane.b32.xlu1 %v6970_v28, %s5098_s27  ;;  %4040 = vrot.lane.b32.xlu0 %v3513_v17, %s5103_s21 }
 0x596   :  { %3483 = vst.msk [vmem:[#allocation2 + $0x71] sm:$0xff] %vm11_vm0, %v3467_v40 }
 0x598   :  { %v6984_v51 = vld [vmem:[#allocation2 + $0x60] sm:$0xff] }
 0x599   :  { %3850 = vrot.lane.b32.xlu1 %v3513_v17, %s5100_s7  ;;  %3914 = vrot.lane.b32.xlu0 %v3529_v13, %s5104_s12  ;;  %v3563_v58 = vld [vmem:[#allocation2 + $0x61] sm:$0xff]  ;;  %v3515_v61 = vld [vmem:[#allocation2 + $0x51] sm:$0xff] }
 0x59a   :  { %v3532_v23 = vld [vmem:[#allocation2 + $0x62] sm:$0xff]  ;;  %v3531_v60 = vld [vmem:[#allocation2 + $0x52] sm:$0xff] }
 0x59b   :  { %v6998_v45 = vld [vmem:[#allocation2 + $0x50] sm:$0xff] }
 0x59c   :  { %v3549_v15 = vld [vmem:[#allocation2 + $0x80] sm:$0xff] }
 0x59d   :  { %4104 = vrot.lane.b32.xlu1 %v3529_v13, %s5101_s19  ;;  %3792 = vrot.lane.b32.xlu0 %v6984_v51, %s5098_s27  ;;  %v3565_v4 = vld [vmem:[#allocation2 + $0x81] sm:$0xff]  ;;  %v3517_v37 = vld [vmem:[#allocation2 + $0x71] sm:$0xff] }
 0x59e   :  { %v3581_v55 = vld [vmem:[#allocation2 + $0x82] sm:$0xff]  ;;  %v3533_v42 = vld [vmem:[#allocation2 + $0x72] sm:$0xff] }
 0x59f   :  { %v7032_v54 = vld [vmem:[#allocation2 + $0x70] sm:$0xff] }
 0x5a1   :  { %3856 = vrot.lane.b32.xlu1 %v3563_v58, %s5100_s7  ;;  %3666 = vrot.lane.b32.xlu0 %v3563_v58, %s5094_s0 }
 0x5a5   :  { %3730 = vrot.lane.b32.xlu1 %v3532_v23, %s5096_s20  ;;  %3920 = vrot.lane.b32.xlu0 %v3532_v23, %s5104_s12 }
 0x5a9   :  { %3982 = vrot.lane.b32.xlu1 %v6984_v51, %s5102_s25  ;;  %3664 = vrot.lane.b32.xlu0 %v3515_v61, %s5094_s0 }
 0x5ad   :  { %4046 = vrot.lane.b32.xlu1 %v3563_v58, %s5103_s21  ;;  %3728 = vrot.lane.b32.xlu0 %v3531_v60, %s5096_s20 }
 0x5b1   :  { %4110 = vrot.lane.b32.xlu1 %v3532_v23, %s5101_s19  ;;  %3980 = vrot.lane.b32.xlu0 %v6998_v45, %s5102_s25 }
 0x5b5   :  { %3790 = vrot.lane.b32.xlu1 %v6998_v45, %s5098_s27  ;;  %4044 = vrot.lane.b32.xlu0 %v3515_v61, %s5103_s21 }
 0x5b9   :  { %3854 = vrot.lane.b32.xlu1 %v3515_v61, %s5100_s7  ;;  %3918 = vrot.lane.b32.xlu0 %v3531_v60, %s5104_s12  ;;  %v4856_v31 = vpop.f32.mrb[24].mxu0  ;;  %v4150_v61 = vsel %vm11_vm0, %v3494_v18, %v7012_v36 }
 0x5ba   :  { %v3364_v49 = vadd.f32 %v4856_v31, %v6896_v47  ;;  %v3358_v16 = vpop.f32.mrb[25].mxu0 }
 0x5bb   :  { %v3359_v1 = vadd.f32 %v6896_v47, %v3358_v16 }
 0x5bc   :  { %v3422_v34 = vmul.f32 0.70710677, %v3364_v49  ;;  %v3406_v14 = vmul.f32 0.5, %v3364_v49 }
 0x5bd   :  { %v3421_v56 = vmul.f32 0.70710677, %v3359_v1  ;;  %4108 = vrot.lane.b32.xlu1 %v3531_v60, %s5101_s19  ;;  %3796 = vrot.lane.b32.xlu0 %v3549_v15, %s5098_s27  ;;  %v3405_v41 = vmul.f32 0.5, %v3359_v1 }
 0x5be   :  { %5042 = verf.f32 %v3422_v34 }
 0x5bf   :  { %5044 = verf.f32 %v3421_v56 }
 0x5c1   :  { %3860 = vrot.lane.b32.xlu1 %v3565_v4, %s5100_s7  ;;  %3924 = vrot.lane.b32.xlu0 %v3581_v55, %s5104_s12 }
 0x5c5   :  { %3986 = vrot.lane.b32.xlu1 %v3549_v15, %s5102_s25  ;;  %3668 = vrot.lane.b32.xlu0 %v3517_v37, %s5094_s0  ;;  %v4166_v15 = vsel %vm917_vm6, %v4150_v61, %v7018_v59 }
 0x5c8   :  { %v5043_v62 = vpop.eup %5042 }
 0x5c9   :  { %v5045_v8 = vpop.eup %5044  ;;  %v3454_v50 = vadd.f32 1.0, %v5043_v62  ;;  %4050 = vrot.lane.b32.xlu1 %v3565_v4, %s5103_s21  ;;  %3732 = vrot.lane.b32.xlu0 %v3533_v42, %s5096_s20 }
 0x5ca   :  { %v3453_v29 = vadd.f32 1.0, %v5045_v8 }
 0x5cb   :  { %v3470_v27 = vmul.f32 %v3454_v50, %v3406_v14 }
 0x5cc   :  { %v3469_v35 = vmul.f32 %v3453_v29, %v3405_v41 }
 0x5cd   :  { %3486 = vst.msk [vmem:[#allocation2 + $0xc1] sm:$0xff] %vm11_vm0, %v3470_v27  ;;  %4114 = vrot.lane.b32.xlu1 %v3581_v55, %s5101_s19  ;;  %3984 = vrot.lane.b32.xlu0 %v7032_v54, %s5102_s25 }
 0x5ce   :  { %3485 = vst.msk [vmem:[#allocation2 + $0xb1] sm:$0xff] %vm11_vm0, %v3469_v35 }
 0x5cf   :  { %v7041_v44 = vpop.permute.xlu1 %3784 }
 0x5d0   :  { %v7056_v43 = vpop.permute.xlu0 %3848 }
 0x5d1   :  { %3794 = vrot.lane.b32.xlu1 %v7032_v54, %s5098_s27  ;;  %4048 = vrot.lane.b32.xlu0 %v3517_v37, %s5103_s21 }
 0x5d3   :  { %v7048_v26 = vpop.permute.xlu1 %3658 }
 0x5d4   :  { %v7054_v24 = vld [vmem:[#allocation2 + $0xc0] sm:$0xff]  ;;  %v7065_v9 = vpop.permute.xlu0 %3912 }
 0x5d5   :  { %3858 = vrot.lane.b32.xlu1 %v3517_v37, %s5100_s7  ;;  %3922 = vrot.lane.b32.xlu0 %v3533_v42, %s5104_s12  ;;  %v3567_v33 = vld [vmem:[#allocation2 + $0xc1] sm:$0xff]  ;;  %v3519_v52 = vld [vmem:[#allocation2 + $0xb1] sm:$0xff] }
 0x5d6   :  { %v3536_v46 = vld [vmem:[#allocation2 + $0xc2] sm:$0xff]  ;;  %v3535_v30 = vld [vmem:[#allocation2 + $0xb2] sm:$0xff] }
 0x5d7   :  { %v7052_v17 = vpop.permute.xlu1 %3722  ;;  %v7089_v37 = vld [vmem:[#allocation2 + $0xb0] sm:$0xff] }
 0x5d8   :  { %v3783_v63 = vpop.permute.xlu0 %3782 }
 0x5d9   :  { %4112 = vrot.lane.b32.xlu1 %v3533_v42, %s5101_s19  ;;  %3800 = vrot.lane.b32.xlu0 %v7054_v24, %s5098_s27  ;;  %v4859_v7 = vpop.f32.mrb[26].mxu0  ;;  %v4182_v56 = vsel %vm951_vm8, %v4166_v15, %v3783_v63 }
 0x5da   :  { %v3374_v11 = vadd.f32 %v4859_v7, %v6896_v47  ;;  %v3368_v13 = vpop.f32.mrb[27].mxu0 }
 0x5db   :  { %v3369_v39 = vadd.f32 %v6896_v47, %v3368_v13  ;;  %v3975_v19 = vpop.permute.xlu1 %3974 }
 0x5dc   :  { %v3424_v20 = vmul.f32 0.70710677, %v3374_v11  ;;  %v3408_v58 = vmul.f32 0.5, %v3374_v11  ;;  %v3847_v16 = vpop.permute.xlu0 %3846 }
 0x5dd   :  { %v3423_v21 = vmul.f32 0.70710677, %v3369_v39  ;;  %3864 = vrot.lane.b32.xlu1 %v3567_v33, %s5100_s7  ;;  %3674 = vrot.lane.b32.xlu0 %v3567_v33, %s5094_s0  ;;  %v3407_v60 = vmul.f32 0.5, %v3369_v39  ;;  %v4198_v36 = vsel %vm985_vm10, %v4182_v56, %v3847_v16 }
 0x5de   :  { %5046 = verf.f32 %v3424_v20 }
 0x5df   :  { %5048 = verf.f32 %v3423_v21  ;;  %v4039_v0 = vpop.permute.xlu1 %4038 }
 0x5e1   :  { %3738 = vrot.lane.b32.xlu1 %v3536_v46, %s5096_s20  ;;  %3928 = vrot.lane.b32.xlu0 %v3536_v46, %s5104_s12 }
 0x5e3   :  { %v4103_v2 = vpop.permute.xlu1 %4102 }
 0x5e5   :  { %3990 = vrot.lane.b32.xlu1 %v7054_v24, %s5102_s25  ;;  %3672 = vrot.lane.b32.xlu0 %v3519_v52, %s5094_s0 }
 0x5e7   :  { %v7072_v25 = vpop.permute.xlu1 %3656 }
 0x5e8   :  { %v5047_v53 = vpop.eup %5046 }
 0x5e9   :  { %v5049_v40 = vpop.eup %5048  ;;  %v3456_v23 = vadd.f32 1.0, %v5047_v53  ;;  %4054 = vrot.lane.b32.xlu1 %v3567_v33, %s5103_s21  ;;  %3736 = vrot.lane.b32.xlu0 %v3535_v30, %s5096_s20 }
 0x5ea   :  { %v3455_v31 = vadd.f32 1.0, %v5049_v40 }
 0x5eb   :  { %v3472_v49 = vmul.f32 %v3456_v23, %v3408_v58  ;;  %v3721_v1 = vpop.permute.xlu1 %3720 }
 0x5ec   :  { %v3471_v34 = vmul.f32 %v3455_v31, %v3407_v60 }
 0x5ed   :  { %3488 = vst.msk [vmem:[#allocation2 + $0xe1] sm:$0xff] %vm11_vm0, %v3472_v49  ;;  %4118 = vrot.lane.b32.xlu1 %v3536_v46, %s5101_s19  ;;  %3926 = vrot.lane.b32.xlu0 %v3535_v30, %s5104_s12  ;;  %v4151_v30 = vsel %vm11_vm0, %v6911_v12, %v7072_v25 }
 0x5ee   :  { %3487 = vst.msk [vmem:[#allocation2 + $0xd1] sm:$0xff] %vm11_vm0, %v3471_v34  ;;  %v4167_v61 = vsel %vm917_vm6, %v4151_v30, %v3721_v1 }
 0x5ef   :  { %v3911_v4 = vpop.permute.xlu1 %3910  ;;  %v7086_v55 = vpop.permute.xlu0 %3788  ;;  %v4183_v16 = vsel %vm951_vm8, %v4167_v61, %v7041_v44 }
 0x5f0   :  { %v4215_v59 = vsel %vm4214_vm12, %v4198_v36, %v3911_v4  ;;  %v4199_v44 = vsel %vm985_vm10, %v4183_v16, %v7056_v43 }
 0x5f1   :  { %v4232_v62 = vsel %vm4231_vm13, %v4215_v59, %v3975_v19  ;;  %3798 = vrot.lane.b32.xlu1 %v7089_v37, %s5098_s27 }
 0x5f2   :  { %v4249_v42 = vsel %vm4248_vm14, %v4232_v62, %v4039_v0 }
 0x5f3   :  { %v7095_v8 = vpop.permute.xlu1 %3852  ;;  %v7097_v14 = vpop.permute.xlu0 %3662  ;;  %v4266_v50 = vsel %vm4265_vm15, %v4249_v42, %v4103_v2 }
 0x5f4   :  { %4884 = vmatprep.mubr.msk.f32.mxu1 %vm4295_vm1, %v4266_v50  ;;  %v7101_v41 = vld [vmem:[#allocation2 + $0xe0] sm:$0xff] }
 0x5f5   :  { %3862 = vrot.lane.b32.xlu1 %v3519_v52, %s5100_s7  ;;  %3804 = vrot.lane.b32.xlu0 %v7101_v41, %s5098_s27  ;;  %v3569_v35 = vld [vmem:[#allocation2 + $0xe1] sm:$0xff]  ;;  %v3521_v52 = vld [vmem:[#allocation2 + $0xd1] sm:$0xff] }
 0x5f6   :  { %v3538_v13 = vld [vmem:[#allocation2 + $0xe2] sm:$0xff]  ;;  %v3537_v31 = vld [vmem:[#allocation2 + $0xd2] sm:$0xff] }
 0x5f7   :  { %v7106_v29 = vpop.permute.xlu1 %3726  ;;  %v7108_v27 = vpop.permute.xlu0 %3916  ;;  %v7133_v25 = vld [vmem:[#allocation2 + $0xd0] sm:$0xff] }
 0x5f9   :  { %3868 = vrot.lane.b32.xlu1 %v3569_v35, %s5100_s7  ;;  %3678 = vrot.lane.b32.xlu0 %v3569_v35, %s5094_s0 }
 0x5fb   :  { %v3979_v7 = vpop.permute.xlu1 %3978  ;;  %v7112_v11 = vpop.permute.xlu0 %3660 }
 0x5fd   :  { %3742 = vrot.lane.b32.xlu1 %v3538_v13, %s5096_s20  ;;  %3932 = vrot.lane.b32.xlu0 %v3538_v13, %s5104_s12 }
 0x5fe   :  { %v4862_v39 = vpop.f32.mrb[28].mxu0 }
 0x5ff   :  { %v3384_v19 = vadd.f32 %v4862_v39, %v6896_v47  ;;  %v3378_v20 = vpop.f32.mrb[29].mxu0  ;;  %v4043_v0 = vpop.permute.xlu1 %4042 }
 0x600   :  { %v3379_v33 = vadd.f32 %v6896_v47, %v3378_v20  ;;  %v7118_v46 = vpop.permute.xlu0 %3724 }
 0x601   :  { %v3426_v21 = vmul.f32 0.70710677, %v3384_v19  ;;  %3994 = vrot.lane.b32.xlu1 %v7101_v41, %s5102_s25  ;;  %3676 = vrot.lane.b32.xlu0 %v3521_v52, %s5094_s0  ;;  %v3410_v62 = vmul.f32 0.5, %v3384_v19 }
 0x602   :  { %v3425_v2 = vmul.f32 0.70710677, %v3379_v33 }
 0x603   :  { %5050 = verf.f32 %v3426_v21  ;;  %v4865_v63 = vpop.f32.mrb[30].mxu0  ;;  %v4107_v40 = vpop.permute.xlu1 %4106 }
 0x604   :  { %5052 = verf.f32 %v3425_v2  ;;  %v3394_v18 = vadd.f32 %v4865_v63, %v6896_v47  ;;  %v3388_v53 = vpop.f32.mrb[31].mxu0  ;;  %v3977_v23 = vpop.permute.xlu0 %3976 }
 0x605   :  { %v3389_v58 = vadd.f32 %v6896_v47, %v3388_v53  ;;  %4058 = vrot.lane.b32.xlu1 %v3569_v35, %s5103_s21  ;;  %3740 = vrot.lane.b32.xlu0 %v3537_v31, %s5096_s20  ;;  %v4152_v47 = vsel %vm11_vm0, %v6902_v6, %v7048_v26  ;;  %v3409_v26 = vmul.f32 0.5, %v3379_v33  ;;  %v4216_v35 = vsel %vm4214_vm12, %v4199_v44, %v7065_v9 }
 0x606   :  { %v3428_v60 = vmul.f32 0.70710677, %v3394_v18  ;;  %v4168_v1 = vsel %vm917_vm6, %v4152_v47, %v7052_v17 }
 0x607   :  { %v3427_v49 = vmul.f32 0.70710677, %v3389_v58  ;;  %v3787_v34 = vpop.permute.xlu1 %3786  ;;  %v3411_v61 = vmul.f32 0.5, %v3389_v58 }
 0x608   :  { %5054 = verf.f32 %v3428_v60  ;;  %v4041_v12 = vpop.permute.xlu0 %4040  ;;  %v4184_v56 = vsel %vm951_vm8, %v4168_v1, %v3787_v34 }
 0x609   :  { %5056 = verf.f32 %v3427_v49  ;;  %4122 = vrot.lane.b32.xlu1 %v3538_v13, %s5101_s19  ;;  %3992 = vrot.lane.b32.xlu0 %v7133_v25, %s5102_s25  ;;  %v4233_v13 = vsel %vm4231_vm13, %v4216_v35, %v3977_v23  ;;  %v3412_v23 = vmul.f32 0.5, %v3394_v18 }
 0x60a   :  { %v4250_v20 = vsel %vm4248_vm14, %v4233_v13, %v4041_v12 }
 0x60b   :  { %v3851_v36 = vpop.permute.xlu1 %3850 }
 0x60c   :  { %v3915_v4 = vpop.permute.xlu0 %3914  ;;  %v4200_v6 = vsel %vm985_vm10, %v4184_v56, %v3851_v36 }
 0x60d   :  { %v5051_v15 = vpop.eup %5050  ;;  %v4217_v17 = vsel %vm4214_vm12, %v4200_v6, %v3915_v4  ;;  %3802 = vrot.lane.b32.xlu1 %v7133_v25, %s5098_s27  ;;  %4056 = vrot.lane.b32.xlu0 %v3521_v52, %s5103_s21 }
 0x60e   :  { %v5053_v59 = vpop.eup %5052  ;;  %v3458_v42 = vadd.f32 1.0, %v5051_v15  ;;  %v4234_v39 = vsel %vm4231_vm13, %v4217_v17, %v3979_v7  ;;  %v4153_v15 = vsel %vm11_vm0, %v6970_v28, %v7112_v11  ;;  %v4154_v28 = vsel %vm11_vm0, %v6925_v22, %v7097_v14 }
 0x60f   :  { %v3457_v50 = vadd.f32 1.0, %v5053_v59  ;;  %v4105_v33 = vpop.permute.xlu1 %4104  ;;  %v4251_v9 = vsel %vm4248_vm14, %v4234_v39, %v4043_v0  ;;  %v4169_v59 = vsel %vm917_vm6, %v4153_v15, %v7118_v46  ;;  %v4170_v11 = vsel %vm917_vm6, %v4154_v28, %v7106_v29 }
 0x610   :  { %v3474_v43 = vmul.f32 %v3458_v42, %v3410_v62  ;;  %v7156_v21 = vpop.permute.xlu0 %3792  ;;  %v4267_v63 = vsel %vm4265_vm15, %v4250_v20, %v4105_v33  ;;  %v4268_v53 = vsel %vm4265_vm15, %v4251_v9, %v4107_v40  ;;  %v4185_v62 = vsel %vm951_vm8, %v4169_v59, %v7086_v55 }
 0x611   :  { %v3473_v19 = vmul.f32 %v3457_v50, %v3409_v26  ;;  %3866 = vrot.lane.b32.xlu1 %v3521_v52, %s5100_s7  ;;  %3930 = vrot.lane.b32.xlu0 %v3537_v31, %s5104_s12  ;;  %v4201_v46 = vsel %vm985_vm10, %v4185_v62, %v7095_v8 }
 0x612   :  { %v5055_v2 = vpop.eup %5054  ;;  %3490 = vst.msk [vmem:[#allocation2 + $0x101] sm:$0xff] %vm11_vm0, %v3474_v43  ;;  %4885 = vmatmul.mubr.msk.f32.vlgmr.msra.gmra.mrb[16].mxu1 %vm4295_vm1, %v4267_v63  ;;  %v4218_v22 = vsel %vm4214_vm12, %v4201_v46, %v7108_v27 }
 0x613   :  { %v5057_v30 = vpop.eup %5056  ;;  %3489 = vst.msk [vmem:[#allocation2 + $0xf1] sm:$0xff] %vm11_vm0, %v3473_v19  ;;  %v3460_v7 = vadd.f32 1.0, %v5055_v2  ;;  %4887 = vmatprep.mubr.msk.f32.mxu1 %vm4295_vm1, %v4268_v53  ;;  %v7167_v49 = vpop.permute.xlu1 %3856 }
 0x614   :  { %v3459_v60 = vadd.f32 1.0, %v5057_v30  ;;  %v7169_v16 = vpop.permute.xlu0 %3666 }
 0x615   :  { %v3476_v0 = vmul.f32 %v3460_v7, %v3412_v23  ;;  %4120 = vrot.lane.b32.xlu1 %v3537_v31, %s5101_s19 }
 0x616   :  { %v3475_v40 = vmul.f32 %v3459_v60, %v3411_v61 }
 0x617   :  { %3492 = vst.msk [vmem:[#allocation2 + $0x121] sm:$0xff] %vm11_vm0, %v3476_v0  ;;  %v7174_v52 = vpop.permute.xlu1 %3730 }
 0x618   :  { %3491 = vst.msk [vmem:[#allocation2 + $0x111] sm:$0xff] %vm11_vm0, %v3475_v40  ;;  %v7176_v18 = vpop.permute.xlu0 %3920 }
 0x619   :  { %v3571_v58 = vld [vmem:[#allocation2 + $0x101] sm:$0xff] }
 0x61a   :  { %v7178_v34 = vld [vmem:[#allocation2 + $0x100] sm:$0xff]  ;;  %3872 = vrot.lane.b32.xlu1 %v3571_v58, %s5100_s7  ;;  %v3523_v4 = vld [vmem:[#allocation2 + $0xf1] sm:$0xff] }
 0x61b   :  { %3808 = vrot.lane.b32.xlu0 %v7178_v34, %s5098_s27  ;;  %v3983_v12 = vpop.permute.xlu1 %3982  ;;  %v3540_v1 = vld [vmem:[#allocation2 + $0x102] sm:$0xff]  ;;  %v3539_v26 = vld [vmem:[#allocation2 + $0xf2] sm:$0xff] }
 0x61c   :  { %v7183_v47 = vpop.permute.xlu0 %3664  ;;  %v7209_v17 = vld [vmem:[#allocation2 + $0xf0] sm:$0xff] }
 0x61e   :  { %3746 = vrot.lane.b32.xlu1 %v3540_v1, %s5096_s20  ;;  %v3557_v30 = vld [vmem:[#allocation2 + $0x120] sm:$0xff] }
 0x61f   :  { %3682 = vrot.lane.b32.xlu0 %v3571_v58, %s5094_s0  ;;  %v4047_v31 = vpop.permute.xlu1 %4046  ;;  %v7231_v23 = vld [vmem:[#allocation2 + $0x122] sm:$0xff]  ;;  %v7236_v0 = vld [vmem:[#allocation2 + $0x110] sm:$0xff] }
 0x620   :  { %v3729_v44 = vpop.permute.xlu0 %3728  ;;  %v3573_v60 = vld [vmem:[#allocation2 + $0x121] sm:$0xff] }
 0x622   :  { %3998 = vrot.lane.b32.xlu1 %v7178_v34, %s5102_s25 }
 0x623   :  { %3936 = vrot.lane.b32.xlu0 %v3540_v1, %s5104_s12  ;;  %v4111_v56 = vpop.permute.xlu1 %4110 }
 0x624   :  { %v3981_v36 = vpop.permute.xlu0 %3980 }
 0x625   :  { %v4235_v8 = vsel %vm4231_vm13, %v4218_v22, %v3981_v36 }
 0x626   :  { %4062 = vrot.lane.b32.xlu1 %v3571_v58, %s5103_s21 }
 0x627   :  { %3680 = vrot.lane.b32.xlu0 %v3523_v4, %s5094_s0  ;;  %v3791_v42 = vpop.permute.xlu1 %3790 }
 0x628   :  { %v4045_v6 = vpop.permute.xlu0 %4044  ;;  %v4186_v50 = vsel %vm951_vm8, %v4170_v11, %v3791_v42  ;;  %v3588_v42 = vld [vmem:[#allocation2 + $0x112] sm:$0xff] }
 0x629   :  { %v4252_v13 = vsel %vm4248_vm14, %v4235_v8, %v4045_v6 }
 0x62a   :  { %4126 = vrot.lane.b32.xlu1 %v3540_v1, %s5101_s19 }
 0x62b   :  { %3744 = vrot.lane.b32.xlu0 %v3539_v26, %s5096_s20  ;;  %v3855_v55 = vpop.permute.xlu1 %3854 }
 0x62c   :  { %v3919_v35 = vpop.permute.xlu0 %3918  ;;  %v4202_v43 = vsel %vm985_vm10, %v4186_v50, %v3855_v55 }
 0x62d   :  { %v4219_v14 = vsel %vm4214_vm12, %v4202_v43, %v3919_v35 }
 0x62e   :  { %3806 = vrot.lane.b32.xlu1 %v7209_v17, %s5098_s27  ;;  %v4236_v29 = vsel %vm4231_vm13, %v4219_v14, %v3983_v12  ;;  %v4155_v12 = vsel %vm11_vm0, %v6998_v45, %v7183_v47  ;;  %v4156_v45 = vsel %vm11_vm0, %v6984_v51, %v7169_v16 }
 0x62f   :  { %3996 = vrot.lane.b32.xlu0 %v7209_v17, %s5102_s25  ;;  %v4109_v39 = vpop.permute.xlu1 %4108  ;;  %v4253_v20 = vsel %vm4248_vm14, %v4236_v29, %v4047_v31  ;;  %v4171_v15 = vsel %vm917_vm6, %v4155_v12, %v3729_v44  ;;  %v4172_v47 = vsel %vm917_vm6, %v4156_v45, %v7174_v52 }
 0x630   :  { %v3797_v19 = vpop.permute.xlu0 %3796  ;;  %v4269_v33 = vsel %vm4265_vm15, %v4252_v13, %v4109_v39  ;;  %v4270_v27 = vsel %vm4265_vm15, %v4253_v20, %v4111_v56  ;;  %v3572_v56 = vld [vmem:[#allocation2 + $0x111] sm:$0xff] }
 0x631   :  { %4888 = vmatmul.mubr.msk.f32.gmra.mrb[18].mxu1 %vm4295_vm1, %v4269_v33 }
 0x632   :  { %3870 = vrot.lane.b32.xlu1 %v3523_v4, %s5100_s7  ;;  %4890 = vmatprep.mubr.msk.f32.mxu1 %vm4295_vm1, %v4270_v27 }
 0x633   :  { %4060 = vrot.lane.b32.xlu0 %v3523_v4, %s5103_s21  ;;  %v3861_v9 = vpop.permute.xlu1 %3860 }
 0x634   :  { %v3925_v2 = vpop.permute.xlu0 %3924 }
 0x636   :  { %4124 = vrot.lane.b32.xlu1 %v3539_v26, %s5101_s19 }
 0x637   :  { %3934 = vrot.lane.b32.xlu0 %v3539_v26, %s5104_s12  ;;  %v3987_v63 = vpop.permute.xlu1 %3986 }
 0x638   :  { %v3669_v53 = vpop.permute.xlu0 %3668 }
 0x639   :  { %v4157_v40 = vsel %vm11_vm0, %v7032_v54, %v3669_v53  ;;  %v4187_v54 = vsel %vm951_vm8, %v4171_v15, %v7156_v21  ;;  %v3637_v21 = vld [vmem:[#allocation2 + $0x132] sm:$0xff] }
 0x63a   :  { %3940 = vrot.lane.b32.xlu1 %v7231_v23, %s5104_s12  ;;  %v4203_v44 = vsel %vm985_vm10, %v4187_v54, %v7167_v49 }
 0x63b   :  { %3812 = vrot.lane.b32.xlu0 %v3557_v30, %s5098_s27  ;;  %v4051_v7 = vpop.permute.xlu1 %4050  ;;  %v4220_v51 = vsel %vm4214_vm12, %v4203_v44, %v7176_v18 }
 0x63c   :  { %v3733_v61 = vpop.permute.xlu0 %3732 }
 0x63d   :  { %v4173_v58 = vsel %vm917_vm6, %v4157_v40, %v3733_v61 }
 0x63e   :  { %3810 = vrot.lane.b32.xlu1 %v7236_v0, %s5098_s27  ;;  %v4189_v36 = vsel %vm951_vm8, %v4173_v58, %v3797_v19 }
 0x63f   :  { %3876 = vrot.lane.b32.xlu0 %v3573_v60, %s5100_s7  ;;  %v4115_v1 = vpop.permute.xlu1 %4114  ;;  %v4205_v62 = vsel %vm985_vm10, %v4189_v36, %v3861_v9 }
 0x640   :  { %v3985_v31 = vpop.permute.xlu0 %3984  ;;  %v4222_v6 = vsel %vm4214_vm12, %v4205_v62, %v3925_v2  ;;  %v3502_v2 = vld [vmem:[#allocation2 + $0xa0] sm:$0xff] }
 0x641   :  { %v4237_v49 = vsel %vm4231_vm13, %v4220_v51, %v3985_v31  ;;  %v4239_v50 = vsel %vm4231_vm13, %v4222_v6, %v7035_v3 }
 0x642   :  { %3874 = vrot.lane.b32.xlu1 %v3572_v56, %s5100_s7  ;;  %v4256_v8 = vsel %vm4248_vm14, %v4239_v50, %v7046_v32 }
 0x643   :  { %4002 = vrot.lane.b32.xlu0 %v3557_v30, %s5102_s25  ;;  %v3795_v4 = vpop.permute.xlu1 %3794  ;;  %v4273_v13 = vsel %vm4265_vm15, %v4256_v8, %v7016_v38  ;;  %v4158_v38 = vsel %vm11_vm0, %v3502_v2, %v7026_v48 }
 0x644   :  { %v4049_v59 = vpop.permute.xlu0 %4048  ;;  %v4188_v26 = vsel %vm951_vm8, %v4172_v47, %v3795_v4  ;;  %v4174_v30 = vsel %vm917_vm6, %v4158_v38, %v7006_v10 }
 0x645   :  { %v4254_v55 = vsel %vm4248_vm14, %v4237_v49, %v4049_v59 }
 0x646   :  { %3938 = vrot.lane.b32.xlu1 %v3588_v42, %s5104_s12 }
 0x647   :  { %4066 = vrot.lane.b32.xlu0 %v3573_v60, %s5103_s21  ;;  %v3859_v28 = vpop.permute.xlu1 %3858 }
 0x648   :  { %v3923_v11 = vpop.permute.xlu0 %3922  ;;  %v4204_v46 = vsel %vm985_vm10, %v4188_v26, %v3859_v28 }
 0x649   :  { %v4221_v16 = vsel %vm4214_vm12, %v4204_v46, %v3923_v11 }
 0x64a   :  { %4132 = vrot.lane.b32.xlu1 %v3637_v21, %s5101_s19  ;;  %v4238_v52 = vsel %vm4231_vm13, %v4221_v16, %v3987_v63 }
 0x64b   :  { %3684 = vrot.lane.b32.xlu0 %v3572_v56, %s5094_s0  ;;  %v4113_v35 = vpop.permute.xlu1 %4112  ;;  %v4255_v22 = vsel %vm4248_vm14, %v4238_v52, %v4051_v7 }
 0x64c   :  { %v3801_v43 = vpop.permute.xlu0 %3800  ;;  %v4271_v14 = vsel %vm4265_vm15, %v4254_v55, %v4113_v35  ;;  %v4272_v18 = vsel %vm4265_vm15, %v4255_v22, %v4115_v1 }
 0x64d   :  { %4891 = vmatmul.mubr.msk.f32.gmra.mrb[20].mxu1 %vm4295_vm1, %v4271_v14 }
 0x64e   :  { %4893 = vmatprep.mubr.msk.f32.mxu1 %vm4295_vm1, %v4272_v18 }
 0x64f   :  { %3748 = vrot.lane.b32.xlu0 %v3588_v42, %s5096_s20  ;;  %v3865_v3 = vpop.permute.xlu1 %3864 }
 0x650   :  { %v3675_v29 = vpop.permute.xlu0 %3674 }
 0x651   :  { %4894 = vmatmul.mubr.msk.f32.gmra.mrb[22].mxu1 %vm4295_vm1, %v4273_v13  ;;  %v4160_v6 = vsel %vm11_vm0, %v7054_v24, %v3675_v29 }
 0x653   :  { %4000 = vrot.lane.b32.xlu0 %v7236_v0, %s5102_s25  ;;  %v3739_v39 = vpop.permute.xlu1 %3738 }
 0x654   :  { %v3929_v19 = vpop.permute.xlu0 %3928  ;;  %v4176_v26 = vsel %vm917_vm6, %v4160_v6, %v3739_v39 }
 0x657   :  { %4064 = vrot.lane.b32.xlu0 %v3572_v56, %s5103_s21  ;;  %v3991_v20 = vpop.permute.xlu1 %3990 }
 0x658   :  { %v3673_v33 = vpop.permute.xlu0 %3672 }
 0x659   :  { %v4159_v59 = vsel %vm11_vm0, %v7089_v37, %v3673_v33 }
 0x65b   :  { %4128 = vrot.lane.b32.xlu0 %v3588_v42, %s5101_s19  ;;  %v4055_v32 = vpop.permute.xlu1 %4054 }
 0x65c   :  { %v3737_v27 = vpop.permute.xlu0 %3736 }
 0x65d   :  { %v4175_v45 = vsel %vm917_vm6, %v4159_v59, %v3737_v27 }
 0x65e   :  { %v4191_v47 = vsel %vm951_vm8, %v4175_v45, %v3801_v43 }
 0x65f   :  { %4130 = vrot.lane.b32.xlu0 %v7231_v23, %s5101_s19  ;;  %v4119_v9 = vpop.permute.xlu1 %4118  ;;  %v4207_v28 = vsel %vm985_vm10, %v4191_v47, %v3865_v3 }
 0x660   :  { %v3927_v63 = vpop.permute.xlu0 %3926  ;;  %v4224_v16 = vsel %vm4214_vm12, %v4207_v28, %v3929_v19 }
 0x663   :  { %v3799_v53 = vpop.permute.xlu1 %3798 }
 0x664   :  { %v4190_v7 = vsel %vm951_vm8, %v4174_v30, %v3799_v53 }
 0x667   :  { %v3863_v61 = vpop.permute.xlu1 %3862  ;;  %v3805_v60 = vpop.permute.xlu0 %3804 }
 0x668   :  { %v4206_v40 = vsel %vm985_vm10, %v4190_v7, %v3863_v61 }
 0x669   :  { %v4223_v58 = vsel %vm4214_vm12, %v4206_v40, %v3927_v63 }
 0x66a   :  { %v4240_v23 = vsel %vm4231_vm13, %v4223_v58, %v3991_v20 }
 0x66b   :  { %v3869_v12 = vpop.permute.xlu1 %3868  ;;  %v3679_v1 = vpop.permute.xlu0 %3678  ;;  %v4257_v31 = vsel %vm4248_vm14, %v4240_v23, %v4055_v32 }
 0x66c   :  { %v4274_v48 = vsel %vm4265_vm15, %v4257_v31, %v4119_v9  ;;  %v4162_v30 = vsel %vm11_vm0, %v7101_v41, %v3679_v1 }
 0x66d   :  { %4896 = vmatprep.mubr.msk.f32.mxu1 %vm4295_vm1, %v4274_v48 }
 0x66f   :  { %v3743_v15 = vpop.permute.xlu1 %3742  ;;  %v3933_v10 = vpop.permute.xlu0 %3932 }
 0x670   :  { %v4178_v61 = vsel %vm917_vm6, %v4162_v30, %v3743_v15 }
 0x673   :  { %v3995_v56 = vpop.permute.xlu1 %3994  ;;  %v3677_v36 = vpop.permute.xlu0 %3676 }
 0x674   :  { %v4161_v33 = vsel %vm11_vm0, %v7133_v25, %v3677_v36 }
 0x677   :  { %v4059_v54 = vpop.permute.xlu1 %4058  ;;  %v3741_v4 = vpop.permute.xlu0 %3740 }
 0x678   :  { %v4177_v27 = vsel %vm917_vm6, %v4161_v33, %v3741_v4 }
 0x679   :  { %v4193_v2 = vsel %vm951_vm8, %v4177_v27, %v3805_v60 }
 0x67a   :  { %v4209_v63 = vsel %vm985_vm10, %v4193_v2, %v3869_v12 }
 0x67b   :  { %v4123_v62 = vpop.permute.xlu1 %4122  ;;  %v3993_v42 = vpop.permute.xlu0 %3992  ;;  %v4226_v25 = vsel %vm4214_vm12, %v4209_v63, %v3933_v10 }
 0x67c   :  { %v4241_v52 = vsel %vm4231_vm13, %v4224_v16, %v3993_v42 }
 0x67f   :  { %v3803_v44 = vpop.permute.xlu1 %3802  ;;  %v4057_v21 = vpop.permute.xlu0 %4056 }
 0x680   :  { %v4192_v11 = vsel %vm951_vm8, %v4176_v26, %v3803_v44  ;;  %v4258_v24 = vsel %vm4248_vm14, %v4241_v52, %v4057_v21 }
 0x683   :  { %v3867_v46 = vpop.permute.xlu1 %3866  ;;  %v3931_v51 = vpop.permute.xlu0 %3930 }
 0x684   :  { %v4208_v37 = vsel %vm985_vm10, %v4192_v11, %v3867_v46 }
 0x685   :  { %v4225_v49 = vsel %vm4214_vm12, %v4208_v37, %v3931_v51 }
 0x686   :  { %v4242_v50 = vsel %vm4231_vm13, %v4225_v49, %v3995_v56 }
 0x687   :  { %v4121_v55 = vpop.permute.xlu1 %4120  ;;  %v4259_v35 = vsel %vm4248_vm14, %v4242_v50, %v4059_v54 }
 0x688   :  { %v4275_v43 = vsel %vm4265_vm15, %v4258_v24, %v4121_v55  ;;  %v4276_v22 = vsel %vm4265_vm15, %v4259_v35, %v4123_v62 }
 0x689   :  { %4897 = vmatmul.mubr.msk.f32.gmra.mrb[24].mxu1 %vm4295_vm1, %v4275_v43 }
 0x68a   :  { %4899 = vmatprep.mubr.msk.f32.mxu1 %vm4295_vm1, %v4276_v22 }
 0x68c   :  { %v3873_v18 = vpop.permute.xlu1 %3872 }
 0x68d   :  { %v3809_v14 = vpop.permute.xlu0 %3808 }
 0x690   :  { %v3747_v3 = vpop.permute.xlu1 %3746 }
 0x691   :  { %v3683_v8 = vpop.permute.xlu0 %3682 }
 0x692   :  { %v4164_v11 = vsel %vm11_vm0, %v7178_v34, %v3683_v8 }
 0x694   :  { %v3999_v13 = vpop.permute.xlu1 %3998 }
 0x695   :  { %v3937_v29 = vpop.permute.xlu0 %3936 }
 0x698   :  { %v4063_v19 = vpop.permute.xlu1 %4062 }
 0x699   :  { %v3681_v39 = vpop.permute.xlu0 %3680 }
 0x69a   :  { %v4163_v45 = vsel %vm11_vm0, %v7209_v17, %v3681_v39  ;;  %v4180_v17 = vsel %vm917_vm6, %v4164_v11, %v3747_v3 }
 0x69c   :  { %v4127_v32 = vpop.permute.xlu1 %4126 }
 0x69d   :  { %v3745_v20 = vpop.permute.xlu0 %3744 }
 0x69e   :  { %v4179_v21 = vsel %vm917_vm6, %v4163_v45, %v3745_v20  ;;  %v7379_v20 = vld [vmem:[%s7462_s1 + $0xb7] ss:$0 sm:$0xff] }
 0x69f   :  { %v4195_v46 = vsel %vm951_vm8, %v4179_v21, %v3809_v14 }
 0x6a0   :  { %v3807_v38 = vpop.permute.xlu1 %3806 }
 0x6a1   :  { %v3997_v9 = vpop.permute.xlu0 %3996  ;;  %v4194_v40 = vsel %vm951_vm8, %v4178_v61, %v3807_v38 }
 0x6a2   :  { %v4243_v58 = vsel %vm4231_vm13, %v4226_v25, %v3997_v9 }
 0x6a4   :  { %v3871_v7 = vpop.permute.xlu1 %3870 }
 0x6a5   :  { %v4061_v53 = vpop.permute.xlu0 %4060  ;;  %v4210_v23 = vsel %vm985_vm10, %v4194_v40, %v3871_v7 }
 0x6a6   :  { %v4260_v60 = vsel %vm4248_vm14, %v4243_v58, %v4061_v53 }
 0x6a8   :  { %v4125_v48 = vpop.permute.xlu1 %4124 }
 0x6a9   :  { %v3935_v31 = vpop.permute.xlu0 %3934  ;;  %v4277_v56 = vsel %vm4265_vm15, %v4260_v60, %v4125_v48 }
 0x6aa   :  { %v4227_v12 = vsel %vm4214_vm12, %v4210_v23, %v3935_v31  ;;  %4900 = vmatmul.mubr.msk.f32.gmra.mrb[26].mxu1 %vm4295_vm1, %v4277_v56 }
 0x6ab   :  { %v4244_v41 = vsel %vm4231_vm13, %v4227_v12, %v3999_v13 }
 0x6ac   :  { %v4261_v1 = vsel %vm4248_vm14, %v4244_v41, %v4063_v19  ;;  %v3941_v4 = vpop.permute.xlu1 %3940 }
 0x6ad   :  { %v3813_v15 = vpop.permute.xlu0 %3812  ;;  %v4278_v10 = vsel %vm4265_vm15, %v4261_v1, %v4127_v32 }
 0x6ae   :  { %4902 = vmatprep.mubr.msk.f32.mxu1 %vm4295_vm1, %v4278_v10 }
 0x6b0   :  { %v3811_v62 = vpop.permute.xlu1 %3810 }
 0x6b1   :  { %v3877_v36 = vpop.permute.xlu0 %3876  ;;  %v4196_v49 = vsel %vm951_vm8, %v4180_v17, %v3811_v62 }
 0x6b4   :  { %v3875_v6 = vpop.permute.xlu1 %3874 }
 0x6b5   :  { %v4003_v54 = vpop.permute.xlu0 %4002  ;;  %v4212_v50 = vsel %vm985_vm10, %v4196_v49, %v3875_v6 }
 0x6b8   :  { %v3939_v16 = vpop.permute.xlu1 %3938 }
 0x6b9   :  { %v4067_v59 = vpop.permute.xlu0 %4066  ;;  %v4229_v55 = vsel %vm4214_vm12, %v4212_v50, %v3939_v16 }
 0x6bc   :  { %v4133_v3 = vpop.permute.xlu1 %4132 }
 0x6bd   :  { %v3685_v42 = vpop.permute.xlu0 %3684 }
 0x6be   :  { %v4165_v47 = vsel %vm11_vm0, %v7236_v0, %v3685_v42  ;;  %v4211_v0 = vsel %vm985_vm10, %v4195_v46, %v3873_v18  ;;  %v4246_v18 = vsel %vm4231_vm13, %v4229_v55, %v4003_v54 }
 0x6bf   :  { %v4228_v34 = vsel %vm4214_vm12, %v4211_v0, %v3937_v29  ;;  %v4263_v29 = vsel %vm4248_vm14, %v4246_v18, %v4067_v59 }
 0x6c1   :  { %v3749_v44 = vpop.permute.xlu0 %3748 }
 0x6c2   :  { %v4181_v26 = vsel %vm917_vm6, %v4165_v47, %v3749_v44 }
 0x6c3   :  { %v4197_v28 = vsel %vm951_vm8, %v4181_v26, %v3813_v15 }
 0x6c4   :  { %v4213_v37 = vsel %vm985_vm10, %v4197_v28, %v3877_v36 }
 0x6c5   :  { %v4001_v51 = vpop.permute.xlu0 %4000  ;;  %v4230_v24 = vsel %vm4214_vm12, %v4213_v37, %v3941_v4 }
 0x6c6   :  { %v4245_v35 = vsel %vm4231_vm13, %v4228_v34, %v4001_v51  ;;  %v4247_v43 = vsel %vm4231_vm13, %v4230_v24, %v7022_v57 }
 0x6c7   :  { %v4264_v13 = vsel %vm4248_vm14, %v4247_v43, %v7030_v5 }
 0x6c8   :  { %v4281_v57 = vsel %vm4265_vm15, %v4264_v13, %v4133_v3 }
 0x6c9   :  { %v4065_v52 = vpop.permute.xlu0 %4064 }
 0x6ca   :  { %v4262_v22 = vsel %vm4248_vm14, %v4245_v35, %v4065_v52 }
 0x6cd   :  { %v4129_v14 = vpop.permute.xlu0 %4128 }
 0x6ce   :  { %v4279_v8 = vsel %vm4265_vm15, %v4262_v22, %v4129_v14 }
 0x6cf   :  { %4903 = vmatmul.mubr.msk.f32.gmra.mrb[28].mxu1 %vm4295_vm1, %v4279_v8 }
 0x6d1   :  { %v4131_v39 = vpop.permute.xlu0 %4130 }
 0x6d2   :  { %v4280_v19 = vsel %vm4265_vm15, %v4263_v29, %v4131_v39 }
 0x6d3   :  { %4905 = vmatprep.mubr.msk.f32.mxu1 %vm4295_vm1, %v4280_v19 }
 0x6d4   :  { %4906 = vmatmul.mubr.msk.f32.gmra.mrb[30].mxu1 %vm4295_vm1, %v4281_v57 }
 0x6e5   :  { %v4886_v33 = vpop.f32.mrb[16].mxu1 }
 0x6e6   :  { %v4416_v32 = vadd.f32 %v4886_v33, %v7379_v20  ;;  %v4410_v5 = vpop.f32.mrb[17].mxu1 }
 0x6e7   :  { %v4411_v27 = vadd.f32 %v7379_v20, %v4410_v5 }
 0x6e8   :  { %v4506_v9 = vmul.f32 0.70710677, %v4416_v32  ;;  %v4490_v53 = vmul.f32 0.5, %v4416_v32 }
 0x6e9   :  { %v4505_v2 = vmul.f32 0.70710677, %v4411_v27  ;;  %v4489_v7 = vmul.f32 0.5, %v4411_v27 }
 0x6ea   :  { %5058 = verf.f32 %v4506_v9 }
 0x6eb   :  { %5060 = verf.f32 %v4505_v2 }
 0x6f4   :  { %v5059_v38 = vpop.eup %5058 }
 0x6f5   :  { %v5061_v63 = vpop.eup %5060  ;;  %v4538_v30 = vadd.f32 1.0, %v5059_v38 }
 0x6f6   :  { %v4537_v61 = vadd.f32 1.0, %v5061_v63 }
 0x6f7   :  { %v4554_v40 = vmul.f32 %v4538_v30, %v4490_v53 }
 0x6f8   :  { %v4553_v25 = vmul.f32 %v4537_v61, %v4489_v7 }
 0x6f9   :  { %4570 = vst.msk [vmem:[%s7463_s2 + $0x8] sm:$0xff] %vm11_vm0, %v4554_v40 }
 0x6fa   :  { %4569 = vst.msk [vmem:[%s7463_s2] sm:$0xff] %vm11_vm0, %v4553_v25 }
 0x704   :  { %v4889_v58 = vpop.f32.mrb[18].mxu1 }
 0x705   :  { %v4426_v23 = vadd.f32 %v4889_v58, %v7379_v20  ;;  %v4420_v31 = vpop.f32.mrb[19].mxu1 }
 0x706   :  { %v4421_v60 = vadd.f32 %v7379_v20, %v4420_v31 }
 0x707   :  { %v4508_v48 = vmul.f32 0.70710677, %v4426_v23  ;;  %v4492_v1 = vmul.f32 0.5, %v4426_v23 }
 0x708   :  { %v4507_v12 = vmul.f32 0.70710677, %v4421_v60  ;;  %v4491_v10 = vmul.f32 0.5, %v4421_v60 }
 0x709   :  { %5062 = verf.f32 %v4508_v48 }
 0x70a   :  { %5064 = verf.f32 %v4507_v12 }
 0x713   :  { %v5063_v56 = vpop.eup %5062 }
 0x714   :  { %v5065_v41 = vpop.eup %5064  ;;  %v4540_v15 = vadd.f32 1.0, %v5063_v56 }
 0x715   :  { %v4539_v36 = vadd.f32 1.0, %v5065_v41 }
 0x716   :  { %v4556_v54 = vmul.f32 %v4540_v15, %v4492_v1 }
 0x717   :  { %v4555_v4 = vmul.f32 %v4539_v36, %v4491_v10 }
 0x718   :  { %4572 = vst.msk [vmem:[%s7463_s2 + $0x18] sm:$0xff] %vm11_vm0, %v4556_v54 }
 0x719   :  { %4571 = vst.msk [vmem:[%s7463_s2 + $0x10] sm:$0xff] %vm11_vm0, %v4555_v4 }
 0x720   :  { %v4892_v59 = vpop.f32.mrb[20].mxu1 }
 0x721   :  { %v4436_v62 = vadd.f32 %v4892_v59, %v7379_v20  ;;  %v4430_v42 = vpop.f32.mrb[21].mxu1 }
 0x722   :  { %v4431_v45 = vadd.f32 %v7379_v20, %v4430_v42 }
 0x723   :  { %v4510_v47 = vmul.f32 0.70710677, %v4436_v62  ;;  %v4494_v17 = vmul.f32 0.5, %v4436_v62 }
 0x724   :  { %v4509_v44 = vmul.f32 0.70710677, %v4431_v45  ;;  %v4895_v21 = vpop.f32.mrb[22].mxu1  ;;  %v4493_v0 = vmul.f32 0.5, %v4431_v45 }
 0x725   :  { %5066 = verf.f32 %v4510_v47  ;;  %v4446_v6 = vadd.f32 %v4895_v21, %v7379_v20  ;;  %v4440_v26 = vpop.f32.mrb[23].mxu1 }
 0x726   :  { %5068 = verf.f32 %v4509_v44  ;;  %v4441_v28 = vadd.f32 %v7379_v20, %v4440_v26 }
 0x727   :  { %v4512_v11 = vmul.f32 0.70710677, %v4446_v6  ;;  %v4496_v34 = vmul.f32 0.5, %v4446_v6 }
 0x728   :  { %v4511_v46 = vmul.f32 0.70710677, %v4441_v28  ;;  %v4495_v43 = vmul.f32 0.5, %v4441_v28 }
 0x729   :  { %5070 = verf.f32 %v4512_v11 }
 0x72a   :  { %5072 = verf.f32 %v4511_v46 }
 0x72f   :  { %v5067_v51 = vpop.eup %5066 }
 0x730   :  { %v5069_v37 = vpop.eup %5068  ;;  %v4542_v16 = vadd.f32 1.0, %v5067_v51 }
 0x731   :  { %v4541_v49 = vadd.f32 1.0, %v5069_v37 }
 0x732   :  { %v4558_v52 = vmul.f32 %v4542_v16, %v4494_v17 }
 0x733   :  { %v5071_v50 = vpop.eup %5070  ;;  %v4557_v24 = vmul.f32 %v4541_v49, %v4493_v0 }
 0x734   :  { %v5073_v55 = vpop.eup %5072  ;;  %4574 = vst.msk [vmem:[%s7463_s2 + $0x28] sm:$0xff] %vm11_vm0, %v4558_v52  ;;  %v4544_v35 = vadd.f32 1.0, %v5071_v50 }
 0x735   :  { %4573 = vst.msk [vmem:[%s7463_s2 + $0x20] sm:$0xff] %vm11_vm0, %v4557_v24  ;;  %v4543_v22 = vadd.f32 1.0, %v5073_v55 }
 0x736   :  { %v4560_v14 = vmul.f32 %v4544_v35, %v4496_v34 }
 0x737   :  { %v4559_v18 = vmul.f32 %v4543_v22, %v4495_v43 }
 0x738   :  { %4576 = vst.msk [vmem:[%s7463_s2 + $0x38] sm:$0xff] %vm11_vm0, %v4560_v14 }
 0x739   :  { %4575 = vst.msk [vmem:[%s7463_s2 + $0x30] sm:$0xff] %vm11_vm0, %v4559_v18 }
 0x75c   :  { %v4898_v8 = vpop.f32.mrb[24].mxu1 }
 0x75d   :  { %v4456_v3 = vadd.f32 %v4898_v8, %v7379_v20  ;;  %v4450_v13 = vpop.f32.mrb[25].mxu1 }
 0x75e   :  { %v4451_v29 = vadd.f32 %v7379_v20, %v4450_v13 }
 0x75f   :  { %v4514_v39 = vmul.f32 0.70710677, %v4456_v3  ;;  %v4498_v32 = vmul.f32 0.5, %v4456_v3 }
 0x760   :  { %v4513_v19 = vmul.f32 0.70710677, %v4451_v29  ;;  %v4497_v27 = vmul.f32 0.5, %v4451_v29 }
 0x761   :  { %5074 = verf.f32 %v4514_v39 }
 0x762   :  { %5076 = verf.f32 %v4513_v19 }
 0x76b   :  { %v5075_v57 = vpop.eup %5074 }
 0x76c   :  { %v5077_v33 = vpop.eup %5076  ;;  %v4546_v5 = vadd.f32 1.0, %v5075_v57 }
 0x76d   :  { %v4545_v9 = vadd.f32 1.0, %v5077_v33 }
 0x76e   :  { %v4562_v2 = vmul.f32 %v4546_v5, %v4498_v32 }
 0x76f   :  { %v4561_v38 = vmul.f32 %v4545_v9, %v4497_v27 }
 0x770   :  { %4578 = vst.msk [vmem:[%s7463_s2 + $0x48] sm:$0xff] %vm11_vm0, %v4562_v2 }
 0x771   :  { %4577 = vst.msk [vmem:[%s7463_s2 + $0x40] sm:$0xff] %vm11_vm0, %v4561_v38 }
 0x77d   :  { %v4901_v63 = vpop.f32.mrb[26].mxu1 }
 0x77e   :  { %v4466_v53 = vadd.f32 %v4901_v63, %v7379_v20  ;;  %v4460_v30 = vpop.f32.mrb[27].mxu1 }
 0x77f   :  { %v4461_v7 = vadd.f32 %v7379_v20, %v4460_v30 }
 0x780   :  { %v4516_v61 = vmul.f32 0.70710677, %v4466_v53  ;;  %v4500_v23 = vmul.f32 0.5, %v4466_v53 }
 0x781   :  { %v4515_v40 = vmul.f32 0.70710677, %v4461_v7  ;;  %v4499_v60 = vmul.f32 0.5, %v4461_v7 }
 0x782   :  { %5078 = verf.f32 %v4516_v61 }
 0x783   :  { %5080 = verf.f32 %v4515_v40 }
 0x78c   :  { %v5079_v25 = vpop.eup %5078 }
 0x78d   :  { %v5081_v58 = vpop.eup %5080  ;;  %v4548_v31 = vadd.f32 1.0, %v5079_v25 }
 0x78e   :  { %v4547_v48 = vadd.f32 1.0, %v5081_v58 }
 0x78f   :  { %v4564_v12 = vmul.f32 %v4548_v31, %v4500_v23 }
 0x790   :  { %v4563_v56 = vmul.f32 %v4547_v48, %v4499_v60 }
 0x791   :  { %4580 = vst.msk [vmem:[%s7463_s2 + $0x58] sm:$0xff] %vm11_vm0, %v4564_v12 }
 0x792   :  { %4579 = vst.msk [vmem:[%s7463_s2 + $0x50] sm:$0xff] %vm11_vm0, %v4563_v56 }
 0x7a2   :  { %v4904_v41 = vpop.f32.mrb[28].mxu1 }
 0x7a3   :  { %v4476_v1 = vadd.f32 %v4904_v41, %v7379_v20  ;;  %v4470_v15 = vpop.f32.mrb[29].mxu1 }
 0x7a4   :  { %v4471_v10 = vadd.f32 %v7379_v20, %v4470_v15 }
 0x7a5   :  { %v4518_v36 = vmul.f32 0.70710677, %v4476_v1  ;;  %v4502_v6 = vmul.f32 0.5, %v4476_v1 }
 0x7a6   :  { %v4517_v54 = vmul.f32 0.70710677, %v4471_v10  ;;  %v4501_v28 = vmul.f32 0.5, %v4471_v10 }
 0x7a7   :  { %5082 = verf.f32 %v4518_v36  ;;  %v4907_v4 = vpop.f32.mrb[30].mxu1 }
 0x7a8   :  { %5084 = verf.f32 %v4517_v54  ;;  %v4486_v59 = vadd.f32 %v4907_v4, %v7379_v20  ;;  %v4480_v62 = vpop.f32.mrb[31].mxu1 }
 0x7a9   :  { %v4481_v42 = vadd.f32 %v7379_v20, %v4480_v62 }
 0x7aa   :  { %v4520_v45 = vmul.f32 0.70710677, %v4486_v59  ;;  %v4504_v20 = vmul.f32 0.5, %v4486_v59 }
 0x7ab   :  { %v4519_v47 = vmul.f32 0.70710677, %v4481_v42  ;;  %v4503_v0 = vmul.f32 0.5, %v4481_v42 }
 0x7ac   :  { %5086 = verf.f32 %v4520_v45 }
 0x7ad   :  { %5088 = verf.f32 %v4519_v47 }
 0x7b1   :  { %v5083_v44 = vpop.eup %5082 }
 0x7b2   :  { %v5085_v21 = vpop.eup %5084  ;;  %v4550_v26 = vadd.f32 1.0, %v5083_v44 }
 0x7b3   :  { %v4549_v11 = vadd.f32 1.0, %v5085_v21 }
 0x7b4   :  { %v4566_v46 = vmul.f32 %v4550_v26, %v4502_v6 }
 0x7b5   :  { %v4565_v51 = vmul.f32 %v4549_v11, %v4501_v28 }
 0x7b6   :  { %v5087_v37 = vpop.eup %5086  ;;  %4582 = vst.msk [vmem:[%s7463_s2 + $0x68] sm:$0xff] %vm11_vm0, %v4566_v46 }
 0x7b7   :  { %v5089_v17 = vpop.eup %5088  ;;  %4581 = vst.msk [vmem:[%s7463_s2 + $0x60] sm:$0xff] %vm11_vm0, %v4565_v51  ;;  %v4552_v16 = vadd.f32 1.0, %v5087_v37 }
 0x7b8   :  { %v4551_v49 = vadd.f32 1.0, %v5089_v17 }
 0x7b9   :  { %v4568_v52 = vmul.f32 %v4552_v16, %v4504_v20 }
 0x7ba   :  { %v4567_v50 = vmul.f32 %v4551_v49, %v4503_v0 }
 0x7bb   :  { %4584 = vst.msk [vmem:[%s7463_s2 + $0x78] sm:$0xff] %vm11_vm0, %v4568_v52 }
 0x7bc   :  { %4583 = vst.msk [vmem:[%s7463_s2 + $0x70] sm:$0xff] %vm11_vm0, %v4567_v50 }

</bundles_post_ra>
